<compile_context>
chip_gen: v7x
topology: tpu7x:2x2x1
jax: 0.10.0
libtpu: 0.0.40
codegen_flags: <defaults>
</compile_context>

<pallas_src>
import functools
import math

import jax
import jax.numpy as jnp
import numpy as np
from jax import lax
from jax.experimental import pallas as pl
from jax.experimental.pallas import tpu as pltpu


# --------------------------------------------------------------------------
# fused multi-layer kernel
# --------------------------------------------------------------------------
def _hgt_fused_kernel(x_ref, mask_ref, wq_ref, wkattT_ref, wvmsg_ref, wa_ref,
                      wres_ref, out_ref, h_ref, kwbd_ref, msgbd_ref, *,
                      num_heads, head_size, num_etypes, f_pad):
    """One grid step == one HGTConv layer; activations live in VMEM scratch."""
    H, D, T = num_heads, head_size, num_etypes
    HD = H * D
    f32, bf16 = jnp.float32, jnp.bfloat16
    l = pl.program_id(0)
    n = x_ref.shape[0]
    TN = T * n
    HTN = H * TN

    @pl.when(l == 0)
    def _init():
        h_ref[...] = x_ref[...]
        # off-diagonal blocks of the head-block-diagonal operands stay zero
        # for the whole kernel; write the zeros exactly once.
        kwbd_ref[...] = jnp.zeros_like(kwbd_ref)
        msgbd_ref[...] = jnp.zeros_like(msgbd_ref)

    h = h_ref[...]                         # (N, F_pad) f32 resident features
    hb = h.astype(bf16)                    # bf16 view for MXU inputs

    # ---- projections (K = F_pad contractions, bf16 in, f32 accum) ---------
    q = jnp.dot(hb, wq_ref[...], preferred_element_type=f32)          # (N,HD)
    qb = q.astype(bf16)

    # k-side: Watt (scaled by pri/sqrt(D)) already folded into Wk on host;
    # produced directly transposed (HD, N) per etype via an NT dot_general.
    kwT = jnp.concatenate(
        [lax.dot_general(wkattT_ref[t], hb, (((1,), (1,)), ((), ())),
                         preferred_element_type=f32) for t in range(T)],
        axis=1)                                                        # (HD,T*N)
    # v-side: Wmsg folded into Wv on host.
    msg = jnp.concatenate(
        [jnp.dot(hb, wvmsg_ref[t], preferred_element_type=f32)
         for t in range(T)],
        axis=0)                                                        # (T*N,HD)

    # ---- head-block-diagonal operands (diagonal blocks rewritten/layer) ---
    for hh in range(H):
        r0 = hh * D
        c0 = hh * TN
        kwbd_ref[r0:r0 + D, c0:c0 + TN] = kwT[r0:r0 + D, :]
        msgbd_ref[c0:c0 + TN, r0:r0 + D] = msg[:, r0:r0 + D]

    # ---- one lane-dense score matmul for all heads: (N,HD)@(HD,H*T*N) -----
    scores = jnp.dot(qb, kwbd_ref[...].astype(bf16),
                     preferred_element_type=f32)                       # (N,HTN)

    # ---- edge softmax in f32; additive mask precomputed on host -----------
    s3 = scores.reshape(n, H, TN) + mask_ref[...][:, None, :]
    m = jnp.max(s3, axis=-1, keepdims=True)                            # (N,H,1)
    e = jnp.exp(s3 - m)
    den = jnp.sum(e, axis=-1, keepdims=True)                           # >= 1
    inv = jnp.where(m > -1e29, 1.0 / den, 0.0)        # zero-indegree rows -> 0
    p = (e * inv).astype(bf16).reshape(n, HTN)

    # ---- one lane-dense aggregation matmul: (N,H*T*N)@(H*T*N,HD) ----------
    agg = jnp.dot(p, msgbd_ref[...].astype(bf16), preferred_element_type=f32)

    # ---- output projection + skip (alpha folded into wa / wres on host) ---
    h_new = (jnp.dot(agg.astype(bf16), wa_ref[...],
                     preferred_element_type=f32) +
             jnp.dot(hb, wres_ref[...], preferred_element_type=f32))   # (N,HD)

    if f_pad == HD:
        h_ref[...] = h_new
    else:
        # pad columns only ever multiply zero weight rows -> leave them alone.
        h_ref[:, :HD] = h_new

    @pl.when(l == pl.num_programs(0) - 1)
    def _store():
        out_ref[...] = h_new
    # TODO(synk): training-mode dropout (F.dropout / HGTConv.drop) omitted
    # (eval only); dst-row tiling + second-TensorCore sharding for large N
    # not implemented at these shapes.


def hgt_forward(x, adj, layer_params, *, num_heads, head_size, num_etypes):
    """HGT.forward in eval mode (dropout identity, head = Identity)."""
    H, D, T = num_heads, head_size, num_etypes
    HD = H * D
    N, fin0 = x.shape
    L = len(layer_params)
    in_dims = [fin0] + [HD] * (L - 1)
    F_pad = max(max(in_dims), HD)
    inv_sqrt_d = 1.0 / math.sqrt(D)
    f32, bf16 = jnp.float32, jnp.bfloat16

    # The kernel softmaxes per (edge, etype) column (DGL edge_softmax); the
    # dense form below requires at most one edge per (src, dst) pair.
    adj_np = np.asarray(adj, np.float32)
    assert adj_np.max() <= 1.0 and adj_np.sum(0).max() <= 1.0, (
        "dense HGT kernel requires at most one edge per (src, dst) pair")

    def _pad_rows(w):
        return jnp.pad(w.astype(f32), ((0, F_pad - w.shape[0]), (0, 0)))

    def _block_diag(blocks):
        out = jnp.zeros((HD, HD), f32)
        for h, b in enumerate(blocks):
            out = out.at[h * D:(h + 1) * D, h * D:(h + 1) * D].set(b)
        return out

    wq_l, wkattT_l, wvmsg_l, wa_l, wres_l = [], [], [], [], []
    for l, p in enumerate(layer_params):
        fin = in_dims[l]
        alpha = jax.nn.sigmoid(p["skip"][0]).astype(f32)
        wk_pad = _pad_rows(p["wk"])
        wq_pad = _pad_rows(p["wq"])
        wv_pad = _pad_rows(p["wv"])

        wkattT_t, wvmsg_t = [], []
        for t in range(T):
            att_bd = _block_diag(
                [p["watt"][h * T + t] * (p["pri"][h * T + t] * inv_sqrt_d)
                 for h in range(H)])
            msg_bd = _block_diag([p["wmsg"][h * T + t] for h in range(H)])
            wkattT_t.append((wk_pad @ att_bd).T)          # (HD, F_pad)
            wvmsg_t.append(wv_pad @ msg_bd)               # (F_pad, HD)

        wq_l.append(wq_pad)
        wkattT_l.append(jnp.stack(wkattT_t))
        wvmsg_l.append(jnp.stack(wvmsg_t))
        wa_l.append(p["wa"].astype(f32) * alpha)
        wres = p["wres"] if fin != HD else jnp.eye(HD, dtype=f32)
        wres_l.append(_pad_rows(wres) * (1.0 - alpha))

    # all weights stored bf16 (folding done in f32 above).
    wq = jnp.stack(wq_l).astype(bf16)            # (L, F_pad, HD)
    wkattT = jnp.stack(wkattT_l).astype(bf16)    # (L, T, HD, F_pad)
    wvmsg = jnp.stack(wvmsg_l).astype(bf16)      # (L, T, F_pad, HD)
    wa = jnp.stack(wa_l).astype(bf16)            # (L, HD, HD)
    wres = jnp.stack(wres_l).astype(bf16)        # (L, F_pad, HD)

    x_pad = jnp.pad(x.astype(f32), ((0, 0), (0, F_pad - fin0)))
    # additive softmax mask over hstacked etypes: 0 where edge, -1e30 else.
    adj_cat = jnp.concatenate([adj[t] for t in range(T)], axis=1).astype(f32)
    mask = (adj_cat - 1.0) * 1e30                           # (N, T*N)

    kernel = functools.partial(_hgt_fused_kernel, num_heads=H, head_size=D,
                               num_etypes=T, f_pad=F_pad)

    grid_spec = pltpu.PrefetchScalarGridSpec(
        num_scalar_prefetch=0,
        grid=(L,),
        in_specs=[
            pl.BlockSpec((N, F_pad), lambda l: (0, 0)),               # x
            pl.BlockSpec((N, T * N), lambda l: (0, 0)),               # mask
            pl.BlockSpec((None, F_pad, HD), lambda l: (l, 0, 0)),     # wq
            pl.BlockSpec((None, T, HD, F_pad), lambda l: (l, 0, 0, 0)),  # wkattT
            pl.BlockSpec((None, T, F_pad, HD), lambda l: (l, 0, 0, 0)),  # wvmsg
            pl.BlockSpec((None, HD, HD), lambda l: (l, 0, 0)),        # wa
            pl.BlockSpec((None, F_pad, HD), lambda l: (l, 0, 0)),     # wres
        ],
        out_specs=pl.BlockSpec((N, HD), lambda l: (0, 0)),
        scratch_shapes=[
            pltpu.VMEM((N, F_pad), jnp.float32),         # resident activations
            pltpu.VMEM((HD, H * T * N), jnp.float32),    # head-block-diag kw^T
            pltpu.VMEM((H * T * N, HD), jnp.float32),    # head-block-diag msg
        ],
    )

    return pl.pallas_call(
        kernel,
        out_shape=jax.ShapeDtypeStruct((N, HD), jnp.float32),
        grid_spec=grid_spec,
        compiler_params=pltpu.CompilerParams(
            dimension_semantics=("arbitrary",),          # layers are sequential
            vmem_limit_bytes=32 * 1024 * 1024),
    )(x_pad, mask, wq, wkattT, wvmsg, wa, wres)


# --------------------------------------------------------------------------
# pure-JAX reference (original per-(head,etype) math, f32)
# --------------------------------------------------------------------------
def _hgt_conv_ref(x, adj, params, *, num_heads, head_size, num_etypes):
    H, D, T = num_heads, head_size, num_etypes
    HD = H * D
    N = x.shape[0]
    k = x @ params["wk"]
    q = x @ params["wq"]
    v = x @ params["wv"]
    has_edge = adj.sum(0) > 0.0
    cols = []
    for h in range(H):
        kh, qh, vh = (k[:, h * D:(h + 1) * D], q[:, h * D:(h + 1) * D],
                      v[:, h * D:(h + 1) * D])
        logits = jnp.zeros((N, N), jnp.float32)
        msgs = []
        for t in range(T):
            kw = kh @ params["watt"][h * T + t]
            a_t = qh @ kw.T * (params["pri"][h * T + t] / math.sqrt(D))
            logits = logits + adj[t] * a_t
            msgs.append(vh @ params["wmsg"][h * T + t])
        masked = jnp.where(has_edge, logits, -1e30)
        p = jnp.where(has_edge, jnp.exp(masked - masked.max(-1, keepdims=True)), 0.0)
        den = p.sum(-1, keepdims=True)
        p = p / jnp.where(den > 0.0, den, 1.0)
        agg = sum(jnp.dot(p * adj[t], msgs[t]) for t in range(T))
        cols.append(agg)
    h_agg = jnp.concatenate(cols, axis=-1)
    h_lin = h_agg @ params["wa"]
    resid = x @ params["wres"] if x.shape[1] != HD else x
    alpha = jax.nn.sigmoid(params["skip"][0])
    return h_lin * alpha + resid * (1.0 - alpha)


def hgt_forward_ref(x, adj, layer_params, **kw):
    h = x
    for p in layer_params:
        h = _hgt_conv_ref(h, adj, p, **kw)
    return h


# --------------------------------------------------------------------------
# deterministic params / synthetic graph
# --------------------------------------------------------------------------
def init_layer_params(key, fin, num_heads, head_size, num_etypes):
    H, D, T = num_heads, head_size, num_etypes
    HD = H * D
    ks = jax.random.split(key, 7)
    s_in = 1.0 / math.sqrt(fin)
    s_d = 1.0 / math.sqrt(D)
    s_hd = 1.0 / math.sqrt(HD)
    p = {
        "wk": jax.random.normal(ks[0], (fin, HD), jnp.float32) * s_in,
        "wq": jax.random.normal(ks[1], (fin, HD), jnp.float32) * s_in,
        "wv": jax.random.normal(ks[2], (fin, HD), jnp.float32) * s_in,
        "watt": jax.random.normal(ks[3], (H * T, D, D), jnp.float32) * s_d,
        "wmsg": jax.random.normal(ks[4], (H * T, D, D), jnp.float32) * s_d,
        "wa": jax.random.normal(ks[5], (HD, HD), jnp.float32) * s_hd,
        "pri": jnp.ones((H * T,), jnp.float32),      # relation_pri init = ones
        "skip": jnp.ones((1,), jnp.float32),         # skip init = ones (1 ntype)
    }
    if fin != HD:
        p["wres"] = jax.random.normal(ks[6], (fin, HD), jnp.float32) * s_in
    return p


def build_graph(n_nodes, num_etypes):
    # deterministic directed graph: each dst has 3 in-edges, and at most one
    # edge per (src, dst) pair (precondition of the dense form).
    adj = np.zeros((num_etypes, n_nodes, n_nodes), np.float32)
    for d in range(n_nodes):
        for off in (1, 3, 7):
            s = (d + off) % n_nodes
            t = (d * 3 + off) % num_etypes
            adj[t, d, s] = 1.0
    assert adj.max() <= 1.0 and adj.sum(0).max() <= 1.0
    return jnp.asarray(adj)


if __name__ == "__main__":
    # Shapes consistent with HGT(in_dim, num_hidden, out_dim, nhead, num_layers,...)
    N = 64            # g.num_nodes()
    IN_DIM = 16
    NHEAD = 8         # -> DGL head_size D
    NUM_HIDDEN = 4    # -> DGL num_heads H  (layer output dim = NHEAD*NUM_HIDDEN = 32)
    NUM_LAYERS = 2
    NUM_ETYPES = 2
    D, H = NHEAD, NUM_HIDDEN

    key = jax.random.PRNGKey(0)
    kx, kp = jax.random.split(key)
    x = jax.random.normal(kx, (N, IN_DIM), jnp.float32)
    adj = build_graph(N, NUM_ETYPES)

    in_dims = [IN_DIM] + [H * D] * (NUM_LAYERS - 1)
    layer_params = [
        init_layer_params(jax.random.fold_in(kp, l), in_dims[l], H, D, NUM_ETYPES)
        for l in range(NUM_LAYERS)
    ]

    out = hgt_forward(x, adj, layer_params, num_heads=H, head_size=D,
                      num_etypes=NUM_ETYPES)
    out = jax.block_until_ready(out)

    ref = hgt_forward_ref(x, adj, layer_params, num_heads=H, head_size=D,
                          num_etypes=NUM_ETYPES)
    assert out.shape == (N, H * D)
    assert np.allclose(np.asarray(out), np.asarray(ref), atol=5e-2, rtol=5e-2)
    print("KERNEL_OK")
</pallas_src>

<mosaic_0001>
module attributes {stable_mosaic.version = 11 : i64} {
  func.func @_hgt_fused_kernel(%arg0: i32, %arg1: memref<64x32xf32, #tpu.memory_space<vmem>>, %arg2: memref<64x128xf32, #tpu.memory_space<vmem>>, %arg3: memref<1x32x32xbf16, #tpu.memory_space<vmem>>, %arg4: memref<1x2x32x32xbf16, #tpu.memory_space<vmem>>, %arg5: memref<1x2x32x32xbf16, #tpu.memory_space<vmem>>, %arg6: memref<1x32x32xbf16, #tpu.memory_space<vmem>>, %arg7: memref<1x32x32xbf16, #tpu.memory_space<vmem>>, %arg8: memref<64x32xf32, #tpu.memory_space<vmem>>, %arg9: memref<64x32xf32, #tpu.memory_space<vmem>>, %arg10: memref<32x512xf32, #tpu.memory_space<vmem>>, %arg11: memref<512x32xf32, #tpu.memory_space<vmem>>) attributes {dimension_semantics = [#tpu.dimension_semantics<arbitrary>], iteration_bounds = array<i64: 2>, scalar_prefetch = 0 : i64, scratch_operands = 3 : i64, tpu.core_type = #tpu.core_type<tc>, window_params = [{pipeline_mode = #tpu.pipeline_mode<synchronous>, transform_indices = @transform_0, window_bounds = array<i64: 64, 32>}, {pipeline_mode = #tpu.pipeline_mode<synchronous>, transform_indices = @transform_1, window_bounds = array<i64: 64, 128>}, {transform_indices = @transform_2, window_bounds = array<i64: 1, 32, 32>}, {transform_indices = @transform_3, window_bounds = array<i64: 1, 2, 32, 32>}, {transform_indices = @transform_4, window_bounds = array<i64: 1, 2, 32, 32>}, {transform_indices = @transform_5, window_bounds = array<i64: 1, 32, 32>}, {transform_indices = @transform_6, window_bounds = array<i64: 1, 32, 32>}, {pipeline_mode = #tpu.pipeline_mode<synchronous>, transform_indices = @transform_7, window_bounds = array<i64: 64, 32>}]} {
    %c0_i32 = arith.constant 0 : i32
    %0 = arith.cmpi eq, %arg0, %c0_i32 : i32
    %1 = arith.extui %0 : i1 to i32
    %c0_i32_0 = arith.constant 0 : i32
    %2 = arith.cmpi ne, %1, %c0_i32_0 : i32
    scf.if %2 {
      %c0_58 = arith.constant 0 : index
      %c0_59 = arith.constant 0 : index
      %79 = vector.load %arg1[%c0_58, %c0_59] : memref<64x32xf32, #tpu.memory_space<vmem>>, vector<64x32xf32>
      %c0_60 = arith.constant 0 : index
      %c0_61 = arith.constant 0 : index
      %80 = vector.load %arg9[%c0_60, %c0_61] : memref<64x32xf32, #tpu.memory_space<vmem>>, vector<64x32xf32>
      tpu.vector_store %arg9[%c0_60, %c0_61], %79 {strides = array<i32>} : memref<64x32xf32, #tpu.memory_space<vmem>>, vector<64x32xf32>,
      %cst_62 = arith.constant 0.000000e+00 : f32
      %81 = vector.broadcast %cst_62 : f32 to vector<32x512xf32>
      %c0_63 = arith.constant 0 : index
      %c0_64 = arith.constant 0 : index
      %82 = vector.load %arg10[%c0_63, %c0_64] : memref<32x512xf32, #tpu.memory_space<vmem>>, vector<32x512xf32>
      tpu.vector_store %arg10[%c0_63, %c0_64], %81 {strides = array<i32>} : memref<32x512xf32, #tpu.memory_space<vmem>>, vector<32x512xf32>,
      %cst_65 = arith.constant 0.000000e+00 : f32
      %83 = vector.broadcast %cst_65 : f32 to vector<512x32xf32>
      %c0_66 = arith.constant 0 : index
      %c0_67 = arith.constant 0 : index
      %84 = vector.load %arg11[%c0_66, %c0_67] : memref<512x32xf32, #tpu.memory_space<vmem>>, vector<512x32xf32>
      tpu.vector_store %arg11[%c0_66, %c0_67], %83 {strides = array<i32>} : memref<512x32xf32, #tpu.memory_space<vmem>>, vector<512x32xf32>,
    } else {
    }
    %c0 = arith.constant 0 : index
    %c0_1 = arith.constant 0 : index
    %3 = vector.load %arg9[%c0, %c0_1] : memref<64x32xf32, #tpu.memory_space<vmem>>, vector<64x32xf32>
    %4 = arith.truncf %3 : vector<64x32xf32> to vector<64x32xbf16>
    %c0_2 = arith.constant 0 : index
    %c0_3 = arith.constant 0 : index
    %c0_4 = arith.constant 0 : index
    %5 = vector.load %arg3[%c0_2, %c0_3, %c0_4] : memref<1x32x32xbf16, #tpu.memory_space<vmem>>, vector<1x32x32xbf16>
    %6 = vector.shape_cast %5 : vector<1x32x32xbf16> to vector<32x32xbf16>
    %cst = arith.constant dense<0.000000e+00> : vector<64x32xf32>
    %7 = tpu.matmul %4, %6, %cst {dimension_numbers = #tpu.dot_dimension_numbers<[1], [0], [0], [1], [0, 0, 1, 1], [], []>} : vector<64x32xbf16>, vector<32x32xbf16>, vector<64x32xf32> -> vector<64x32xf32>
    %8 = arith.truncf %7 : vector<64x32xf32> to vector<64x32xbf16>
    %c0_5 = arith.constant 0 : index
    %c0_6 = arith.constant 0 : index
    %c0_7 = arith.constant 0 : index
    %c0_8 = arith.constant 0 : index
    %9 = vector.load %arg4[%c0_5, %c0_6, %c0_7, %c0_8] : memref<1x2x32x32xbf16, #tpu.memory_space<vmem>>, vector<1x1x32x32xbf16>
    %10 = vector.shape_cast %9 : vector<1x1x32x32xbf16> to vector<32x32xbf16>
    %cst_9 = arith.constant dense<0.000000e+00> : vector<32x64xf32>
    %11 = tpu.matmul %10, %4, %cst_9 {dimension_numbers = #tpu.dot_dimension_numbers<[1], [1], [0], [0], [0, 0, 1, 0], [], []>} : vector<32x32xbf16>, vector<64x32xbf16>, vector<32x64xf32> -> vector<32x64xf32>
    %c0_10 = arith.constant 0 : index
    %c1 = arith.constant 1 : index
    %c0_11 = arith.constant 0 : index
    %c0_12 = arith.constant 0 : index
    %12 = vector.load %arg4[%c0_10, %c1, %c0_11, %c0_12] : memref<1x2x32x32xbf16, #tpu.memory_space<vmem>>, vector<1x1x32x32xbf16>
    %13 = vector.shape_cast %12 : vector<1x1x32x32xbf16> to vector<32x32xbf16>
    %cst_13 = arith.constant dense<0.000000e+00> : vector<32x64xf32>
    %14 = tpu.matmul %13, %4, %cst_13 {dimension_numbers = #tpu.dot_dimension_numbers<[1], [1], [0], [0], [0, 0, 1, 0], [], []>} : vector<32x32xbf16>, vector<64x32xbf16>, vector<32x64xf32> -> vector<32x64xf32>
    %15 = tpu.concatenate %11, %14 in 1 : vector<32x64xf32>, vector<32x64xf32> -> vector<32x128xf32>
    %c0_14 = arith.constant 0 : index
    %c0_15 = arith.constant 0 : index
    %c0_16 = arith.constant 0 : index
    %c0_17 = arith.constant 0 : index
    %16 = vector.load %arg5[%c0_14, %c0_15, %c0_16, %c0_17] : memref<1x2x32x32xbf16, #tpu.memory_space<vmem>>, vector<1x1x32x32xbf16>
    %17 = vector.shape_cast %16 : vector<1x1x32x32xbf16> to vector<32x32xbf16>
    %cst_18 = arith.constant dense<0.000000e+00> : vector<64x32xf32>
    %18 = tpu.matmul %4, %17, %cst_18 {dimension_numbers = #tpu.dot_dimension_numbers<[1], [0], [0], [1], [0, 0, 1, 1], [], []>} : vector<64x32xbf16>, vector<32x32xbf16>, vector<64x32xf32> -> vector<64x32xf32>
    %c0_19 = arith.constant 0 : index
    %c1_20 = arith.constant 1 : index
    %c0_21 = arith.constant 0 : index
    %c0_22 = arith.constant 0 : index
    %19 = vector.load %arg5[%c0_19, %c1_20, %c0_21, %c0_22] : memref<1x2x32x32xbf16, #tpu.memory_space<vmem>>, vector<1x1x32x32xbf16>
    %20 = vector.shape_cast %19 : vector<1x1x32x32xbf16> to vector<32x32xbf16>
    %cst_23 = arith.constant dense<0.000000e+00> : vector<64x32xf32>
    %21 = tpu.matmul %4, %20, %cst_23 {dimension_numbers = #tpu.dot_dimension_numbers<[1], [0], [0], [1], [0, 0, 1, 1], [], []>} : vector<64x32xbf16>, vector<32x32xbf16>, vector<64x32xf32> -> vector<64x32xf32>
    %22 = tpu.concatenate %18, %21 in 0 : vector<64x32xf32>, vector<64x32xf32> -> vector<128x32xf32>
    %23 = vector.extract_strided_slice %15 {offsets = [0, 0], sizes = [8, 128], strides = [1, 1]} : vector<32x128xf32> to vector<8x128xf32>
    %c0_24 = arith.constant 0 : index
    %c0_25 = arith.constant 0 : index
    %24 = vector.load %arg10[%c0_24, %c0_25] : memref<32x512xf32, #tpu.memory_space<vmem>>, vector<8x128xf32>
    tpu.vector_store %arg10[%c0_24, %c0_25], %23 {strides = array<i32>} : memref<32x512xf32, #tpu.memory_space<vmem>>, vector<8x128xf32>,
    %25 = vector.extract_strided_slice %22 {offsets = [0, 0], sizes = [128, 8], strides = [1, 1]} : vector<128x32xf32> to vector<128x8xf32>
    %c0_26 = arith.constant 0 : index
    %c0_27 = arith.constant 0 : index
    %26 = vector.load %arg11[%c0_26, %c0_27] : memref<512x32xf32, #tpu.memory_space<vmem>>, vector<128x8xf32>
    tpu.vector_store %arg11[%c0_26, %c0_27], %25 {strides = array<i32>} : memref<512x32xf32, #tpu.memory_space<vmem>>, vector<128x8xf32>,
    %27 = vector.extract_strided_slice %15 {offsets = [8, 0], sizes = [8, 128], strides = [1, 1]} : vector<32x128xf32> to vector<8x128xf32>
    %c8 = arith.constant 8 : index
    %c128 = arith.constant 128 : index
    %28 = vector.load %arg10[%c8, %c128] : memref<32x512xf32, #tpu.memory_space<vmem>>, vector<8x128xf32>
    tpu.vector_store %arg10[%c8, %c128], %27 {strides = array<i32>} : memref<32x512xf32, #tpu.memory_space<vmem>>, vector<8x128xf32>,
    %29 = vector.extract_strided_slice %22 {offsets = [0, 8], sizes = [128, 8], strides = [1, 1]} : vector<128x32xf32> to vector<128x8xf32>
    %c128_28 = arith.constant 128 : index
    %c8_29 = arith.constant 8 : index
    %30 = vector.load %arg11[%c128_28, %c8_29] : memref<512x32xf32, #tpu.memory_space<vmem>>, vector<128x8xf32>
    tpu.vector_store %arg11[%c128_28, %c8_29], %29 {strides = array<i32>} : memref<512x32xf32, #tpu.memory_space<vmem>>, vector<128x8xf32>,
    %31 = vector.extract_strided_slice %15 {offsets = [16, 0], sizes = [8, 128], strides = [1, 1]} : vector<32x128xf32> to vector<8x128xf32>
    %c16 = arith.constant 16 : index
    %c256 = arith.constant 256 : index
    %32 = vector.load %arg10[%c16, %c256] : memref<32x512xf32, #tpu.memory_space<vmem>>, vector<8x128xf32>
    tpu.vector_store %arg10[%c16, %c256], %31 {strides = array<i32>} : memref<32x512xf32, #tpu.memory_space<vmem>>, vector<8x128xf32>,
    %33 = vector.extract_strided_slice %22 {offsets = [0, 16], sizes = [128, 8], strides = [1, 1]} : vector<128x32xf32> to vector<128x8xf32>
    %c256_30 = arith.constant 256 : index
    %c16_31 = arith.constant 16 : index
    %34 = vector.load %arg11[%c256_30, %c16_31] : memref<512x32xf32, #tpu.memory_space<vmem>>, vector<128x8xf32>
    tpu.vector_store %arg11[%c256_30, %c16_31], %33 {strides = array<i32>} : memref<512x32xf32, #tpu.memory_space<vmem>>, vector<128x8xf32>,
    %35 = vector.extract_strided_slice %15 {offsets = [24, 0], sizes = [8, 128], strides = [1, 1]} : vector<32x128xf32> to vector<8x128xf32>
    %c24 = arith.constant 24 : index
    %c384 = arith.constant 384 : index
    %36 = vector.load %arg10[%c24, %c384] : memref<32x512xf32, #tpu.memory_space<vmem>>, vector<8x128xf32>
    tpu.vector_store %arg10[%c24, %c384], %35 {strides = array<i32>} : memref<32x512xf32, #tpu.memory_space<vmem>>, vector<8x128xf32>,
    %37 = vector.extract_strided_slice %22 {offsets = [0, 24], sizes = [128, 8], strides = [1, 1]} : vector<128x32xf32> to vector<128x8xf32>
    %c384_32 = arith.constant 384 : index
    %c24_33 = arith.constant 24 : index
    %38 = vector.load %arg11[%c384_32, %c24_33] : memref<512x32xf32, #tpu.memory_space<vmem>>, vector<128x8xf32>
    tpu.vector_store %arg11[%c384_32, %c24_33], %37 {strides = array<i32>} : memref<512x32xf32, #tpu.memory_space<vmem>>, vector<128x8xf32>,
    %c0_34 = arith.constant 0 : index
    %c0_35 = arith.constant 0 : index
    %39 = vector.load %arg10[%c0_34, %c0_35] : memref<32x512xf32, #tpu.memory_space<vmem>>, vector<32x512xf32>
    %40 = arith.truncf %39 : vector<32x512xf32> to vector<32x512xbf16>
    %cst_36 = arith.constant dense<0.000000e+00> : vector<64x512xf32>
    %41 = tpu.matmul %8, %40, %cst_36 {dimension_numbers = #tpu.dot_dimension_numbers<[1], [0], [0], [1], [0, 0, 1, 1], [], []>} : vector<64x32xbf16>, vector<32x512xbf16>, vector<64x512xf32> -> vector<64x512xf32>
    %42 = vector.shape_cast %41 : vector<64x512xf32> to vector<64x4x128xf32>
    %c0_37 = arith.constant 0 : index
    %c0_38 = arith.constant 0 : index
    %43 = vector.load %arg2[%c0_37, %c0_38] : memref<64x128xf32, #tpu.memory_space<vmem>>, vector<64x128xf32>
    %44 = vector.shape_cast %43 : vector<64x128xf32> to vector<64x1x128xf32>
    %45 = vector.broadcast %44 : vector<64x1x128xf32> to vector<64x4x128xf32>
    %46 = arith.addf %42, %45 : vector<64x4x128xf32>
    %cst_39 = arith.constant dense<0xFF800000> : vector<64x4xf32>
    %47 = vector.multi_reduction <maximumf>, %46, %cst_39 [2] : vector<64x4x128xf32> to vector<64x4xf32>
    %48 = vector.shape_cast %47 : vector<64x4xf32> to vector<64x4x1xf32>
    %49 = vector.broadcast %48 : vector<64x4x1xf32> to vector<64x4x128xf32>
    %50 = arith.subf %46, %49 : vector<64x4x128xf32>
    %51 = math.exp %50 : vector<64x4x128xf32>
    %cst_40 = arith.constant dense<0.000000e+00> : vector<64x4xf32>
    %52 = vector.multi_reduction <add>, %51, %cst_40 [2] : vector<64x4x128xf32> to vector<64x4xf32>
    %53 = vector.shape_cast %52 : vector<64x4xf32> to vector<64x4x1xf32>
    %cst_41 = arith.constant -1.000000e+29 : f32
    %54 = vector.broadcast %cst_41 : f32 to vector<64x4x1xf32>
    %55 = arith.cmpf ogt, %48, %54 : vector<64x4x1xf32>
    %cst_42 = arith.constant 1.000000e+00 : f32
    %56 = vector.broadcast %cst_42 : f32 to vector<64x4x1xf32>
    %57 = arith.divf %56, %53 : vector<64x4x1xf32>
    %cst_43 = arith.constant 0.000000e+00 : f32
    %58 = vector.broadcast %cst_43 : f32 to vector<64x4x1xf32>
    %59 = arith.select %55, %57, %58 : vector<64x4x1xi1>, vector<64x4x1xf32>
    %60 = vector.broadcast %59 : vector<64x4x1xf32> to vector<64x4x128xf32>
    %61 = arith.mulf %51, %60 : vector<64x4x128xf32>
    %62 = arith.truncf %61 : vector<64x4x128xf32> to vector<64x4x128xbf16>
    %63 = vector.shape_cast %62 : vector<64x4x128xbf16> to vector<64x512xbf16>
    %c0_44 = arith.constant 0 : index
    %c0_45 = arith.constant 0 : index
    %64 = vector.load %arg11[%c0_44, %c0_45] : memref<512x32xf32, #tpu.memory_space<vmem>>, vector<512x32xf32>
    %65 = arith.truncf %64 : vector<512x32xf32> to vector<512x32xbf16>
    %cst_46 = arith.constant dense<0.000000e+00> : vector<64x32xf32>
    %66 = tpu.matmul %63, %65, %cst_46 {dimension_numbers = #tpu.dot_dimension_numbers<[1], [0], [0], [1], [0, 0, 1, 1], [], []>} : vector<64x512xbf16>, vector<512x32xbf16>, vector<64x32xf32> -> vector<64x32xf32>
    %67 = arith.truncf %66 : vector<64x32xf32> to vector<64x32xbf16>
    %c0_47 = arith.constant 0 : index
    %c0_48 = arith.constant 0 : index
    %c0_49 = arith.constant 0 : index
    %68 = vector.load %arg6[%c0_47, %c0_48, %c0_49] : memref<1x32x32xbf16, #tpu.memory_space<vmem>>, vector<1x32x32xbf16>
    %69 = vector.shape_cast %68 : vector<1x32x32xbf16> to vector<32x32xbf16>
    %cst_50 = arith.constant dense<0.000000e+00> : vector<64x32xf32>
    %70 = tpu.matmul %67, %69, %cst_50 {dimension_numbers = #tpu.dot_dimension_numbers<[1], [0], [0], [1], [0, 0, 1, 1], [], []>} : vector<64x32xbf16>, vector<32x32xbf16>, vector<64x32xf32> -> vector<64x32xf32>
    %c0_51 = arith.constant 0 : index
    %c0_52 = arith.constant 0 : index
    %c0_53 = arith.constant 0 : index
    %71 = vector.load %arg7[%c0_51, %c0_52, %c0_53] : memref<1x32x32xbf16, #tpu.memory_space<vmem>>, vector<1x32x32xbf16>
    %72 = vector.shape_cast %71 : vector<1x32x32xbf16> to vector<32x32xbf16>
    %cst_54 = arith.constant dense<0.000000e+00> : vector<64x32xf32>
    %73 = tpu.matmul %4, %72, %cst_54 {dimension_numbers = #tpu.dot_dimension_numbers<[1], [0], [0], [1], [0, 0, 1, 1], [], []>} : vector<64x32xbf16>, vector<32x32xbf16>, vector<64x32xf32> -> vector<64x32xf32>
    %74 = arith.addf %70, %73 : vector<64x32xf32>
    %c0_55 = arith.constant 0 : index
    %c0_56 = arith.constant 0 : index
    %75 = vector.load %arg9[%c0_55, %c0_56] : memref<64x32xf32, #tpu.memory_space<vmem>>, vector<64x32xf32>
    tpu.vector_store %arg9[%c0_55, %c0_56], %74 {strides = array<i32>} : memref<64x32xf32, #tpu.memory_space<vmem>>, vector<64x32xf32>,
    %c1_i32 = arith.constant 1 : i32
    %76 = arith.cmpi eq, %arg0, %c1_i32 : i32
    %77 = arith.extui %76 : i1 to i32
    %c0_i32_57 = arith.constant 0 : i32
    %78 = arith.cmpi ne, %77, %c0_i32_57 : i32
    scf.if %78 {
      %c0_58 = arith.constant 0 : index
      %c0_59 = arith.constant 0 : index
      %79 = vector.load %arg8[%c0_58, %c0_59] : memref<64x32xf32, #tpu.memory_space<vmem>>, vector<64x32xf32>
      tpu.vector_store %arg8[%c0_58, %c0_59], %74 {strides = array<i32>} : memref<64x32xf32, #tpu.memory_space<vmem>>, vector<64x32xf32>,
    } else {
    }
    return
  }
  func.func @transform_0(%arg0: i32) -> (i32, i32) {
    %c0_i32 = arith.constant 0 : i32
    %c0_i32_0 = arith.constant 0 : i32
    %c0_i32_1 = arith.constant 0 : i32
    return %c0_i32, %c0_i32_0 : i32, i32
  }
  func.func @transform_1(%arg0: i32) -> (i32, i32) {
    %c0_i32 = arith.constant 0 : i32
    %c0_i32_0 = arith.constant 0 : i32
    %c0_i32_1 = arith.constant 0 : i32
    return %c0_i32, %c0_i32_0 : i32, i32
  }
  func.func @transform_2(%arg0: i32) -> (i32, i32, i32) {
    %c0_i32 = arith.constant 0 : i32
    %c0_i32_0 = arith.constant 0 : i32
    %c0_i32_1 = arith.constant 0 : i32
    return %arg0, %c0_i32, %c0_i32_0 : i32, i32, i32
  }
  func.func @transform_3(%arg0: i32) -> (i32, i32, i32, i32) {
    %c0_i32 = arith.constant 0 : i32
    %c0_i32_0 = arith.constant 0 : i32
    %c0_i32_1 = arith.constant 0 : i32
    %c0_i32_2 = arith.constant 0 : i32
    return %arg0, %c0_i32, %c0_i32_0, %c0_i32_1 : i32, i32, i32, i32
  }
  func.func @transform_4(%arg0: i32) -> (i32, i32, i32, i32) {
    %c0_i32 = arith.constant 0 : i32
    %c0_i32_0 = arith.constant 0 : i32
    %c0_i32_1 = arith.constant 0 : i32
    %c0_i32_2 = arith.constant 0 : i32
    return %arg0, %c0_i32, %c0_i32_0, %c0_i32_1 : i32, i32, i32, i32
  }
  func.func @transform_5(%arg0: i32) -> (i32, i32, i32) {
    %c0_i32 = arith.constant 0 : i32
    %c0_i32_0 = arith.constant 0 : i32
    %c0_i32_1 = arith.constant 0 : i32
    return %arg0, %c0_i32, %c0_i32_0 : i32, i32, i32
  }
  func.func @transform_6(%arg0: i32) -> (i32, i32, i32) {
    %c0_i32 = arith.constant 0 : i32
    %c0_i32_0 = arith.constant 0 : i32
    %c0_i32_1 = arith.constant 0 : i32
    return %arg0, %c0_i32, %c0_i32_0 : i32, i32, i32
  }
  func.func @transform_7(%arg0: i32) -> (i32, i32) {
    %c0_i32 = arith.constant 0 : i32
    %c0_i32_0 = arith.constant 0 : i32
    %c0_i32_1 = arith.constant 0 : i32
    return %c0_i32, %c0_i32_0 : i32, i32
  }
}

</mosaic_0001>

<bundles_post_ra>
// kernel: tpu_custom_call.1
= control target key start
LH: loop header
LB: loop body
LE: loop exit
PB: predicated region body
PF: predicated region fallthrough
CT: control target
= control target key end

     0   :  { %s7797_s0 = inlined_call_operand.vmem [shape: f32[64,32], index: 0, kind: input, shape index: {}]   ;;  %s7798_s1 = inlined_call_operand.vmem [shape: f32[64,128], index: 1, kind: input, shape index: {}]   ;;  %s7799_s2 = inlined_call_operand.vmem [shape: bf16[2,32,32], index: 2, kind: input, shape index: {}]   ;;  %s7800_s3 = inlined_call_operand.hbm [shape: bf16[2,2,32,32], index: 3, kind: input, shape index: {}]   ;;  %s7801_s4 = inlined_call_operand.hbm [shape: bf16[2,2,32,32], index: 4, kind: input, shape index: {}]   ;;  %s7802_s5 = inlined_call_operand.hbm [shape: bf16[2,32,32], index: 5, kind: input, shape index: {}]   ;;  %s7803_s6 = inlined_call_operand.hbm [shape: bf16[2,32,32], index: 6, kind: input, shape index: {}]   ;;  %s7804_s7 = inlined_call_operand.vmem [shape: f32[64,32], index: 7, kind: output, shape index: {}]  }
   0x1   :  { %7944 = sst [smem:[#allocation110_spill]] %s7800_s3 }
   0x2   :  { %7945 = sst [smem:[#allocation111_spill]] %s7801_s4 }
   0x3   :  { %12 = vsyncpa [#allocation6], 0 }
   0x4   :  { %14 = vsyncpa [#allocation6 + $0x1], 0 }
   0x5   :  { %15 = vsyncpa [#allocation8], 0 }
   0x6   :  { %17 = vsyncpa [#allocation8 + $0x1], 0 }
   0x7   :  { %18 = vsyncpa [#allocation11], 0 }
   0x8   :  { %20 = vsyncpa [#allocation11 + $0x1], 0  ;;  %s5409_s24 = smov 0   ;;  %s5411_s25 = smov 0  }
   0x9   :  { %s5413_s26 = smov 0   ;;  %s5415_s27 = smov 0  }
   0xa LB: > { %s5428_s28 = sadd.s32 4294967295, %s5354_s27   ;;  %s5431_s29 = sadd.s32 1, %s5354_s27   ;;  %s5354_s27 = sphi %s5415_s27, %s8228_s27   ;;  %s5350_s26 = sphi %s5413_s26, %s8227_s26   ;;  %s5346_s25 = sphi %s5411_s25, %s8226_s25   ;;  %s5342_s24 = sphi %s5409_s24, %s8225_s24  }
   0xb   : > { %s98_s30 = ssub.s32 %s5354_s27, %s5431_s29  ;;  %s101_s8 = sadd.s32 1, %s5350_s26 }
   0xc   : > { %p99_p0 = scmp.eq.s32.totalorder %s98_s30, 0  ;;  %p108_p1 = scmp.ne.s32.totalorder %s5350_s26, %s5346_s25 }
   0xd   : > { %p109_p2 = scmp.eq.s32.totalorder %s5354_s27, 0  ;;  %p114_p3 = scmp.ne.s32.totalorder %s5346_s25, %s5342_s24 }
   0xe   : > { %s5441_s9 = scalar_select %p99_p0, %s5350_s26, %s101_s8  }
   0xf   : > { %p110_p4 = por %p109_p2, %p108_p1  ;;  %p115_p5 = scmp.eq.s32.totalorder %s5428_s28, 0 }
  0x10   : > { %p4872_p6 = scmp.lt.s32.totalorder %s5354_s27, 2  ;;  %s5450_s11 = sand.u32 1, %s5350_s26  }
  0x11   : > { %p5445_p7 = por %p115_p5, %p114_p3  ;;  %s4515_s12 = sshll.u32 %s5450_s11, 5 }
  0x12   : > { %s4624_s13 = sshll.u32 %s5354_s27, 9  ;;  %p5454_p8 = pnand %p4872_p6, %p110_p4 }
  0x13   : > { %s7946_s10 = scalar_select %p5445_p7, 1, 0 }
  0x14   : > { %s272_s15 = sand.u32 1, %s5354_s27   ;;  %s7948_s4 = sld [smem:[#allocation111_spill]] }
  0x15   : > { %s276_s19 = scalar_lea.vmem [#allocation7], %s4515_s12  ;;  %s5472_s21 = scalar_lea.sflag [#allocation8], %s272_s15 }
  0x16   : > { %s283_s20 = sshll.u32 %s276_s19, 4  ;;  %p5478_p12 = pneg %p5454_p8  ;;  %s5469_s20 = int_to_ptr.vmem [resolvable:$true] %s283_s20 }
  0x1a   : > { %s5464_s18 = scalar_lea.hbm %s7948_s4, %s4624_s13  ;;  %s5197_s8 = scalar_lea.hbm %s7948_s4, 1024 }
  0x1b   : > { %s5192_s22 = scalar_lea.hbm %s5464_s18, 512  ;;  %p5198_p1 = scmp.lt.u32.totalorder %s5464_s18, %s7948_s4 }
  0x1c   : > { %p5193_p11 = scmp.ne.s32.totalorder %s5464_s18, %s5192_s22  ;;  %p5199_p2 = scmp.lt.u32.totalorder %s5197_s8, %s5192_s22 }
  0x1d   : > { %p5201_p4 = scmp.lt.u32.totalorder %s5192_s22, %s5464_s18 }
  0x1e   : > { %p5195_p13 = pnand %p5478_p12, %p5193_p11  ;;  %p5200_p3 = por %p5199_p2, %p5198_p1 }
  0x20   : > { %p5196_p0 = pneg %p5195_p13  ;;  %p5202_p5 = por %p5201_p4, %p5200_p3 }
  0x22   : > { %p5203_p6 = pnand %p5202_p5, %p5196_p0 }
  0x24   : > { %5206 = shalt.err (!%p5203_p6)
}
  0x25   : > { %s5207_s15 = scalar_lea.vmem %s5469_s20, 512  ;;  %s5356_s19 = smov [#allocation7]  }
  0x26   : > { %p5208_p11 = scmp.ne.s32.totalorder %s5469_s20, %s5207_s15  ;;  %s5212_s24 = sshll.u32 %s5356_s19, 4  ;;  %s5213_s24 = int_to_ptr.vmem [resolvable:$false] %s5212_s24 }
  0x27   : > { %s5214_s30 = scalar_lea.vmem %s5213_s24, 1024  ;;  %p5215_p10 = scmp.lt.s32.totalorder %s5469_s20, %s5213_s24 }
  0x28   : > { %p5210_p13 = pnand %p5208_p11, %p5478_p12  ;;  %p5216_p7 = scmp.lt.s32.totalorder %s5214_s30, %s5207_s15 }
  0x2a   : > { %p5211_p9 = pneg %p5210_p13  ;;  %p5217_p1 = por %p5216_p7, %p5215_p10 }
  0x2c   : > { %p5218_p2 = pnand %p5217_p1, %p5211_p9 }
  0x2e   : > { %5221 = shalt.err (!%p5218_p2)
}
  0x2f   : > { %s7806_s22 = smov 64   ;;  %s7808_s8 = smov 4  }
  0x30   : > { %4865 = dma.hbm_to_vmem [thread:$0]  (!%p5454_p8), %s5464_s18, 512, %s5469_s20, %s5472_s21, %s7806_s22, %s7806_s22, %s7808_s8  }
  0x31   : > { %p7950_p7 = scmp.lt.s32.totalorder %s5354_s27, 3  ;;  %p7951_p9 = scmp.ge.s32.totalorder %s5354_s27, 1 }
  0x32   : > { %s7953_s3 = sld [smem:[#allocation110_spill]]  ;;  %s255_s24 = scalar_lea.vmem [#allocation5], %s4515_s12 }
  0x33   : > { %p5509_p10 = pnand %p7951_p9, %p7950_p7  ;;  %s262_s30 = sshll.u32 %s255_s24, 4  ;;  %s5523_s30 = int_to_ptr.vmem [resolvable:$true] %s262_s30 }
  0x34   : > { %s7810_s18 = sshll.u32 %s5450_s11, 4  ;;  %s252_s20 = scalar_lea.sflag [#allocation6], %s5450_s11 }
  0x35   : > { %s7952_s16 = scalar_select %p5509_p10, 1, 0 }
  0x38   : > { %s5518_s19 = scalar_lea.hbm %s7953_s3, %s4624_s13  ;;  %s5227_s13 = scalar_lea.hbm %s7953_s3, 1024 }
  0x39   : > { %s5222_s22 = scalar_lea.hbm %s5518_s19, 512  ;;  %p5228_p5 = scmp.lt.u32.totalorder %s5518_s19, %s7953_s3 }
  0x3a   : > { %p5223_p0 = scmp.ne.s32.totalorder %s5518_s19, %s5222_s22  ;;  %p5229_p6 = scmp.lt.u32.totalorder %s5227_s13, %s5222_s22 }
  0x3b   : > { %p5231_p13 = scmp.lt.u32.totalorder %s5222_s22, %s5518_s19 }
  0x3c   : > { %p5225_p3 = pnand %p5223_p0, %p5478_p12  ;;  %p5230_p11 = por %p5229_p6, %p5228_p5 }
  0x3e   : > { %p5226_p4 = pneg %p5225_p3  ;;  %p5232_p1 = por %p5231_p13, %p5230_p11 }
  0x40   : > { %p5233_p2 = pnand %p5232_p1, %p5226_p4 }
  0x42   : > { %5236 = shalt.err (!%p5233_p2)
}
  0x43   : > { %s5237_s12 = scalar_lea.vmem %s5523_s30, 512  ;;  %s5359_s8 = smov [#allocation5]  }
  0x44   : > { %p5238_p7 = scmp.ne.s32.totalorder %s5523_s30, %s5237_s12  ;;  %s5242_s24 = sshll.u32 %s5359_s8, 4  ;;  %s5243_s24 = int_to_ptr.vmem [resolvable:$false] %s5242_s24 }
  0x45   : > { %s5244_s4 = scalar_lea.vmem %s5243_s24, 1024  ;;  %p5245_p3 = scmp.lt.s32.totalorder %s5523_s30, %s5243_s24 }
  0x46   : > { %p5240_p9 = pnand %p5238_p7, %p5478_p12  ;;  %p5246_p10 = scmp.lt.s32.totalorder %s5244_s4, %s5237_s12 }
  0x48   : > { %p5241_p0 = pneg %p5240_p9  ;;  %p5247_p5 = por %p5246_p10, %p5245_p3 }
  0x4a   : > { %p5248_p6 = pnand %p5247_p5, %p5241_p0 }
  0x4c   : > { %5251 = shalt.err (!%p5248_p6)
}
  0x4d   : > { %s7954_s22 = smov 4   ;;  %s7955_s17 = smov 64  }
  0x4e   : > { %4862 = dma.hbm_to_vmem [thread:$0]  (!%p5454_p8), %s5518_s19, 512, %s5523_s30, %s252_s20, %s7955_s17, %s7955_s17, %s7954_s22  }
  0x4f   : > { %s4626_s13 = sshll.u32 %s5354_s27, 8  ;;  %s297_s15 = scalar_lea.vmem [#allocation9], %s7810_s18 }
  0x50   : > { %s304_s12 = sshll.u32 %s297_s15, 4  ;;  %s5560_s4 = scalar_lea.hbm %s7802_s5, %s4626_s13  ;;  %s5562_s12 = int_to_ptr.vmem [resolvable:$true] %s304_s12 }
  0x51   : > { %s5252_s3 = scalar_lea.hbm %s5560_s4, 256  ;;  %s5257_s20 = scalar_lea.hbm %s7802_s5, 512 }
  0x52   : > { %p5253_p10 = scmp.ne.s32.totalorder %s5560_s4, %s5252_s3  ;;  %p5258_p13 = scmp.lt.u32.totalorder %s5560_s4, %s7802_s5 }
  0x53   : > { %p5259_p1 = scmp.lt.u32.totalorder %s5257_s20, %s5252_s3  ;;  %p5261_p7 = scmp.lt.u32.totalorder %s5252_s3, %s5560_s4 }
  0x54   : > { %p5255_p4 = pnand %p5253_p10, %p5478_p12 }
  0x55   : > { %p5260_p2 = por %p5259_p1, %p5258_p13 }
  0x56   : > { %p5256_p11 = pneg %p5255_p4 }
  0x57   : > { %p5262_p9 = por %p5261_p7, %p5260_p2 }
  0x59   : > { %p5263_p0 = pnand %p5262_p9, %p5256_p11 }
  0x5b   : > { %5266 = shalt.err (!%p5263_p0)
}
  0x5c   : > { %s5267_s8 = scalar_lea.vmem %s5562_s12, 256  ;;  %s5360_s24 = smov [#allocation9]  }
  0x5d   : > { %p5268_p3 = scmp.ne.s32.totalorder %s5562_s12, %s5267_s8  ;;  %s5272_s19 = sshll.u32 %s5360_s24, 4  ;;  %s5273_s19 = int_to_ptr.vmem [resolvable:$false] %s5272_s19 }
  0x5e   : > { %s5274_s18 = scalar_lea.vmem %s5273_s19, 512  ;;  %p5275_p10 = scmp.lt.s32.totalorder %s5562_s12, %s5273_s19 }
  0x5f   : > { %p5270_p5 = pnand %p5268_p3, %p5478_p12  ;;  %p5276_p4 = scmp.lt.s32.totalorder %s5274_s18, %s5267_s8 }
  0x61   : > { %p5271_p6 = pneg %p5270_p5  ;;  %p5277_p13 = por %p5276_p4, %p5275_p10 }
  0x63   : > { %p5278_p1 = pnand %p5277_p13, %p5271_p6 }
  0x65   : > { %5281 = shalt.err (!%p5278_p1)
}
  0x66   : > { %4868 = dma.hbm_to_vmem [thread:$0]  (!%p5454_p8), %s5560_s4, 256, %s5562_s12, %s5472_s21, %s7955_s17, %s7955_s17, %s7954_s22  }
  0x67   : > { %s5594_s20 = scalar_lea.hbm %s7803_s6, %s4626_s13  ;;  %s7956_s15 = sshll.u32 %s5450_s11, 4 }
  0x68   : > { %s318_s8 = scalar_lea.vmem [#allocation10], %s7956_s15  ;;  %s315_s19 = scalar_lea.sflag [#allocation11], %s5450_s11 }
  0x69   : > { %s325_s24 = sshll.u32 %s318_s8, 4  ;;  %s5282_s18 = scalar_lea.hbm %s5594_s20, 256  ;;  %s5598_s24 = int_to_ptr.vmem [resolvable:$true] %s325_s24 }
  0x6a   : > { %p5283_p11 = scmp.ne.s32.totalorder %s5594_s20, %s5282_s18  ;;  %s5287_s13 = scalar_lea.hbm %s7803_s6, 512 }
  0x6b   : > { %p5288_p9 = scmp.lt.u32.totalorder %s5594_s20, %s7803_s6  ;;  %p5289_p0 = scmp.lt.u32.totalorder %s5287_s13, %s5282_s18 }
  0x6c   : > { %p5285_p2 = pnand %p5283_p11, %p5478_p12  ;;  %p5291_p5 = scmp.lt.u32.totalorder %s5282_s18, %s5594_s20 }
  0x6d   : > { %p5290_p3 = por %p5289_p0, %p5288_p9 }
  0x6e   : > { %p5286_p7 = pneg %p5285_p2 }
  0x6f   : > { %p5292_p6 = por %p5291_p5, %p5290_p3 }
  0x71   : > { %p5293_p10 = pnand %p5292_p6, %p5286_p7 }
  0x73   : > { %5296 = shalt.err (!%p5293_p10)
}
  0x74   : > { %s5297_s3 = scalar_lea.vmem %s5598_s24, 256  ;;  %s5361_s30 = smov [#allocation10]  }
  0x75   : > { %p5298_p4 = scmp.ne.s32.totalorder %s5598_s24, %s5297_s3  ;;  %s5302_s15 = sshll.u32 %s5361_s30, 4  ;;  %s5303_s15 = int_to_ptr.vmem [resolvable:$false] %s5302_s15 }
  0x76   : > { %s5304_s8 = scalar_lea.vmem %s5303_s15, 512  ;;  %p5305_p11 = scmp.lt.s32.totalorder %s5598_s24, %s5303_s15 }
  0x77   : > { %p5300_p13 = pnand %p5298_p4, %p5478_p12  ;;  %p5306_p2 = scmp.lt.s32.totalorder %s5304_s8, %s5297_s3 }
  0x79   : > { %p5301_p1 = pneg %p5300_p13  ;;  %p5307_p9 = por %p5306_p2, %p5305_p11 }
  0x7b   : > { %p5308_p0 = pnand %p5307_p9, %p5301_p1 }
  0x7d   : > { %5311 = shalt.err (!%p5308_p0)
}
  0x7e   : > { %4871 = dma.hbm_to_vmem [thread:$0]  (!%p5454_p8), %s5594_s20, 256, %s5598_s24, %s315_s19, %s7955_s17, %s7955_s17, %s7954_s22  }
  0x7f   : > { %p7957_p12 = scmp.ne.s32.totalorder %s7952_s16, 0 }
  0x81   : > { %337 = sbr.rel (%p7957_p12) target bundleno = 1712 (0x6b0), region = 48 }
  0x88   : > { %s339_s23 = sand.u32 1, %s5346_s25   ;;  %p7958_p7 = scmp.ne.s32.totalorder %s7946_s10, 0 }
  0x89   : > { %s4528_s18 = sshll.u32 %s339_s23, 5  ;;  %s340_s27 = scalar_lea.sflag [#allocation6], %s339_s23 }
  0x8a   : > { %s5630_s21 = scalar_lea.vmem [#allocation5], %s4528_s18 }
  0x8b   : > { %5329 = dma.done.wait (%p7958_p7), %s340_s27, 512  }
  0x8c   : > { %5331 = vsyncadd (%p7958_p7), %s340_s27, 4294966784  ;;  %s348_s11 = sand.u32 1, %s5428_s28   ;;  %s5637_s22 = scalar_lea.vmem [#allocation7], %s4528_s18 }
  0x8d   : > { %s349_s14 = scalar_lea.sflag [#allocation8], %s348_s11 }
  0x8e   : > { %5333 = dma.done.wait (%p7958_p7), %s349_s14, 768  }
  0x8f   : > { %5335 = vsyncadd (%p7958_p7), %s349_s14, 4294966528  ;;  %s4530_s16 = sshll.u32 %s339_s23, 4  ;;  %s367_s20 = scalar_lea.sflag [#allocation11], %s339_s23 }
  0x90   : > { %s5643_s17 = scalar_lea.vmem [#allocation9], %s4530_s16  ;;  %s5645_s24 = scalar_lea.vmem [#allocation10], %s4530_s16 }
  0x91   : > { %5337 = dma.done.wait (%p7958_p7), %s367_s20, 256  }
  0x92   : > { %5339 = vsyncadd (%p7958_p7), %s367_s20, 4294967040  ;;  %p416_p8 = scmp.lt.s32.totalorder %s5428_s28, 1  ;;  %p4534_p3 = scmp.ne.s32.totalorder %s5428_s28, 0 }
  0x93   : > { %v426_v0 = vld [vmem:[%s7797_s0] sm:$0xff] (!%p4534_p3)  ;;  %vm434_vm0 = vcmask (!%p4534_p3), 261120   ;;  %v427_v1 = vld [vmem:[%s7797_s0 + $0x8] sm:$0xff] (!%p4534_p3)  ;;  %v428_v2 = vld [vmem:[%s7797_s0 + $0x10] sm:$0xff] (!%p4534_p3)  ;;  %v5362_v6 = vmov (!%p4534_p3), 0.0  }
  0x94   : > { %s417_s19 = scalar_select %p416_p8, %s5428_s28, 1 }
  0x95   : > { %425 = sbr.rel (%p4534_p3) target bundleno = 191 (0xbf), region = 68  ;;  %435 = vst.msk [vmem:[#allocation2] sm:$0xff] (!%p4534_p3), %vm434_vm0, %v426_v0  ;;  %436 = vst.msk [vmem:[#allocation2 + $0x8] sm:$0xff] (!%p4534_p3), %vm434_vm0, %v427_v1  ;;  %v5674_v3 = vld [vmem:[%s7797_s0 + $0x18] sm:$0xff] (!%p4534_p3)  ;;  %v5679_v4 = vld [vmem:[%s7797_s0 + $0x20] sm:$0xff] (!%p4534_p3) }
  0x96   : > { %s4628_s13 = sshll.u32 %s417_s19, 4  ;;  %437 = vst.msk [vmem:[#allocation2 + $0x10] sm:$0xff] (!%p4534_p3), %vm434_vm0, %v428_v2  ;;  %v5684_v5 = vld [vmem:[%s7797_s0 + $0x28] sm:$0xff] (!%p4534_p3)  ;;  %444 = vst [vmem:[#allocation3 + $0x8] sm:$0xff] (!%p4534_p3), %v5362_v6  ;;  %v432_v7 = vld [vmem:[%s7797_s0 + $0x30] sm:$0xff] (!%p4534_p3) }
  0x97   : > { %s5656_s3 = scalar_lea.vmem %s7799_s2, %s4628_s13  ;;  %445 = vst [vmem:[#allocation3 + $0x10] sm:$0xff] (!%p4534_p3), %v5362_v6  ;;  %446 = vst [vmem:[#allocation3 + $0x18] sm:$0xff] (!%p4534_p3), %v5362_v6  ;;  %v433_v8 = vld [vmem:[%s7797_s0 + $0x38] sm:$0xff] (!%p4534_p3) }
  0x98   : > { %447 = vst [vmem:[#allocation3 + $0x20] sm:$0xff] (!%p4534_p3), %v5362_v6  ;;  %449 = vst [vmem:[#allocation3 + $0x30] sm:$0xff] (!%p4534_p3), %v5362_v6 }
  0x99   : > { %450 = vst [vmem:[#allocation3 + $0x38] sm:$0xff] (!%p4534_p3), %v5362_v6  ;;  %451 = vst [vmem:[#allocation3 + $0x40] sm:$0xff] (!%p4534_p3), %v5362_v6 }
  0x9a   : > { %452 = vst [vmem:[#allocation3 + $0x48] sm:$0xff] (!%p4534_p3), %v5362_v6  ;;  %454 = vst [vmem:[#allocation3 + $0x58] sm:$0xff] (!%p4534_p3), %v5362_v6 }
  0x9b   : > { %455 = vst [vmem:[#allocation3 + $0x60] sm:$0xff] (!%p4534_p3), %v5362_v6  ;;  %456 = vst [vmem:[#allocation3 + $0x68] sm:$0xff] (!%p4534_p3), %v5362_v6 }
  0x9c   : > { %457 = vst [vmem:[#allocation3 + $0x70] sm:$0xff] %v5362_v6  ;;  %459 = vst.msk [vmem:[#allocation4] sm:$0xff] %vm434_vm0, %v5362_v6 }
  0x9d   : > { %460 = vst.msk [vmem:[#allocation4 + $0x8] sm:$0xff] %vm434_vm0, %v5362_v6  ;;  %461 = vst.msk [vmem:[#allocation4 + $0x10] sm:$0xff] %vm434_vm0, %v5362_v6 }
  0x9e   : > { %462 = vst.msk [vmem:[#allocation4 + $0x18] sm:$0xff] %vm434_vm0, %v5362_v6  ;;  %463 = vst.msk [vmem:[#allocation4 + $0x20] sm:$0xff] %vm434_vm0, %v5362_v6 }
  0x9f   : > { %464 = vst.msk [vmem:[#allocation4 + $0x28] sm:$0xff] %vm434_vm0, %v5362_v6  ;;  %465 = vst.msk [vmem:[#allocation4 + $0x30] sm:$0xff] %vm434_vm0, %v5362_v6 }
  0xa0   : > { %466 = vst.msk [vmem:[#allocation4 + $0x38] sm:$0xff] %vm434_vm0, %v5362_v6  ;;  %467 = vst.msk [vmem:[#allocation4 + $0x40] sm:$0xff] %vm434_vm0, %v5362_v6 }
  0xa1   : > { %468 = vst.msk [vmem:[#allocation4 + $0x48] sm:$0xff] %vm434_vm0, %v5362_v6  ;;  %469 = vst.msk [vmem:[#allocation4 + $0x50] sm:$0xff] %vm434_vm0, %v5362_v6 }
  0xa2   : > { %470 = vst.msk [vmem:[#allocation4 + $0x58] sm:$0xff] %vm434_vm0, %v5362_v6  ;;  %471 = vst.msk [vmem:[#allocation4 + $0x60] sm:$0xff] %vm434_vm0, %v5362_v6 }
  0xa3   : > { %472 = vst.msk [vmem:[#allocation4 + $0x68] sm:$0xff] %vm434_vm0, %v5362_v6  ;;  %473 = vst.msk [vmem:[#allocation4 + $0x70] sm:$0xff] %vm434_vm0, %v5362_v6 }
  0xa4   : > { %474 = vst.msk [vmem:[#allocation4 + $0x78] sm:$0xff] %vm434_vm0, %v5362_v6  ;;  %475 = vst.msk [vmem:[#allocation4 + $0x80] sm:$0xff] %vm434_vm0, %v5362_v6 }
  0xa5   : > { %476 = vst.msk [vmem:[#allocation4 + $0x88] sm:$0xff] %vm434_vm0, %v5362_v6  ;;  %477 = vst.msk [vmem:[#allocation4 + $0x90] sm:$0xff] %vm434_vm0, %v5362_v6 }
  0xa6   : > { %478 = vst.msk [vmem:[#allocation4 + $0x98] sm:$0xff] %vm434_vm0, %v5362_v6  ;;  %479 = vst.msk [vmem:[#allocation4 + $0xa0] sm:$0xff] %vm434_vm0, %v5362_v6 }
  0xa7   : > { %480 = vst.msk [vmem:[#allocation4 + $0xa8] sm:$0xff] %vm434_vm0, %v5362_v6  ;;  %481 = vst.msk [vmem:[#allocation4 + $0xb0] sm:$0xff] %vm434_vm0, %v5362_v6 }
  0xa8   : > { %482 = vst.msk [vmem:[#allocation4 + $0xb8] sm:$0xff] %vm434_vm0, %v5362_v6  ;;  %483 = vst.msk [vmem:[#allocation4 + $0xc0] sm:$0xff] %vm434_vm0, %v5362_v6 }
  0xa9   : > { %484 = vst.msk [vmem:[#allocation4 + $0xc8] sm:$0xff] %vm434_vm0, %v5362_v6  ;;  %485 = vst.msk [vmem:[#allocation4 + $0xd0] sm:$0xff] %vm434_vm0, %v5362_v6 }
  0xaa   : > { %486 = vst.msk [vmem:[#allocation4 + $0xd8] sm:$0xff] %vm434_vm0, %v5362_v6  ;;  %487 = vst.msk [vmem:[#allocation4 + $0xe0] sm:$0xff] %vm434_vm0, %v5362_v6 }
  0xab   : > { %488 = vst.msk [vmem:[#allocation4 + $0xe8] sm:$0xff] %vm434_vm0, %v5362_v6  ;;  %489 = vst.msk [vmem:[#allocation4 + $0xf0] sm:$0xff] %vm434_vm0, %v5362_v6 }
  0xac   : > { %490 = vst.msk [vmem:[#allocation4 + $0xf8] sm:$0xff] %vm434_vm0, %v5362_v6  ;;  %491 = vst.msk [vmem:[#allocation4 + $0x100] sm:$0xff] %vm434_vm0, %v5362_v6 }
  0xad   : > { %492 = vst.msk [vmem:[#allocation4 + $0x108] sm:$0xff] %vm434_vm0, %v5362_v6  ;;  %493 = vst.msk [vmem:[#allocation4 + $0x110] sm:$0xff] %vm434_vm0, %v5362_v6 }
  0xae   : > { %494 = vst.msk [vmem:[#allocation4 + $0x118] sm:$0xff] %vm434_vm0, %v5362_v6  ;;  %495 = vst.msk [vmem:[#allocation4 + $0x120] sm:$0xff] %vm434_vm0, %v5362_v6 }
  0xaf   : > { %496 = vst.msk [vmem:[#allocation4 + $0x128] sm:$0xff] %vm434_vm0, %v5362_v6  ;;  %497 = vst.msk [vmem:[#allocation4 + $0x130] sm:$0xff] %vm434_vm0, %v5362_v6 }
  0xb0   : > { %498 = vst.msk [vmem:[#allocation4 + $0x138] sm:$0xff] %vm434_vm0, %v5362_v6  ;;  %499 = vst.msk [vmem:[#allocation4 + $0x140] sm:$0xff] %vm434_vm0, %v5362_v6 }
  0xb1   : > { %500 = vst.msk [vmem:[#allocation4 + $0x148] sm:$0xff] %vm434_vm0, %v5362_v6  ;;  %501 = vst.msk [vmem:[#allocation4 + $0x150] sm:$0xff] %vm434_vm0, %v5362_v6 }
  0xb2   : > { %502 = vst.msk [vmem:[#allocation4 + $0x158] sm:$0xff] %vm434_vm0, %v5362_v6  ;;  %503 = vst.msk [vmem:[#allocation4 + $0x160] sm:$0xff] %vm434_vm0, %v5362_v6 }
  0xb3   : > { %504 = vst.msk [vmem:[#allocation4 + $0x168] sm:$0xff] %vm434_vm0, %v5362_v6  ;;  %505 = vst.msk [vmem:[#allocation4 + $0x170] sm:$0xff] %vm434_vm0, %v5362_v6 }
  0xb4   : > { %506 = vst.msk [vmem:[#allocation4 + $0x178] sm:$0xff] %vm434_vm0, %v5362_v6  ;;  %507 = vst.msk [vmem:[#allocation4 + $0x180] sm:$0xff] %vm434_vm0, %v5362_v6 }
  0xb5   : > { %508 = vst.msk [vmem:[#allocation4 + $0x188] sm:$0xff] %vm434_vm0, %v5362_v6  ;;  %509 = vst.msk [vmem:[#allocation4 + $0x190] sm:$0xff] %vm434_vm0, %v5362_v6 }
  0xb6   : > { %510 = vst.msk [vmem:[#allocation4 + $0x198] sm:$0xff] %vm434_vm0, %v5362_v6  ;;  %511 = vst.msk [vmem:[#allocation4 + $0x1a0] sm:$0xff] %vm434_vm0, %v5362_v6 }
  0xb7   : > { %512 = vst.msk [vmem:[#allocation4 + $0x1a8] sm:$0xff] %vm434_vm0, %v5362_v6  ;;  %513 = vst.msk [vmem:[#allocation4 + $0x1b0] sm:$0xff] %vm434_vm0, %v5362_v6 }
  0xb8   : > { %514 = vst.msk [vmem:[#allocation4 + $0x1b8] sm:$0xff] %vm434_vm0, %v5362_v6  ;;  %515 = vst.msk [vmem:[#allocation4 + $0x1c0] sm:$0xff] %vm434_vm0, %v5362_v6 }
  0xb9   : > { %516 = vst.msk [vmem:[#allocation4 + $0x1c8] sm:$0xff] %vm434_vm0, %v5362_v6  ;;  %517 = vst.msk [vmem:[#allocation4 + $0x1d0] sm:$0xff] %vm434_vm0, %v5362_v6 }
  0xba   : > { %518 = vst.msk [vmem:[#allocation4 + $0x1d8] sm:$0xff] %vm434_vm0, %v5362_v6  ;;  %519 = vst.msk [vmem:[#allocation4 + $0x1e0] sm:$0xff] %vm434_vm0, %v5362_v6 }
  0xbb   : > { %520 = vst.msk [vmem:[#allocation4 + $0x1e8] sm:$0xff] %vm434_vm0, %v5362_v6  ;;  %521 = vst.msk [vmem:[#allocation4 + $0x1f0] sm:$0xff] %vm434_vm0, %v5362_v6 }
  0xbc   : > { %522 = vst.msk [vmem:[#allocation4 + $0x1f8] sm:$0xff] %vm434_vm0, %v5362_v6  ;;  %438 = vst.msk [vmem:[#allocation2 + $0x18] sm:$0xff] %vm434_vm0, %v5674_v3 }
  0xbd   : > { %439 = vst.msk [vmem:[#allocation2 + $0x20] sm:$0xff] %vm434_vm0, %v5679_v4  ;;  %440 = vst.msk [vmem:[#allocation2 + $0x28] sm:$0xff] %vm434_vm0, %v5684_v5 }
  0xbe   : > { %441 = vst.msk [vmem:[#allocation2 + $0x30] sm:$0xff] %vm434_vm0, %v432_v7  ;;  %442 = vst.msk [vmem:[#allocation2 + $0x38] sm:$0xff] %vm434_vm0, %v433_v8 }
  0xbf PF: > { %v4914_v9 = vld [vmem:[%s5656_s3] sm:$0xff]   ;;  %v4915_v10 = vld [vmem:[%s5656_s3 + $0x8] sm:$0xff]   ;;  %vm551_vm1 = vcmask 261120   ;;  %v4916_v26 = vld [vmem:[%s5630_s21 + $0x10] sm:$0xff]   ;;  %v5363_v57 = vmov 0   ;;  %vm957_vm2 = vcmask 64512  }
  0xc0   : > { %4751 = vmatprep.subr.bf16.mxu0 %v4914_v9  ;;  %v523_v11 = vld [vmem:[#allocation2] sm:$0xff]  ;;  %v524_v12 = vld [vmem:[#allocation2 + $0x8] sm:$0xff]  ;;  %v525_v13 = vld [vmem:[#allocation2 + $0x10] sm:$0xff]  ;;  %vm975_vm3 = vcmask 130112   ;;  %vm993_vm4 = vcmask 195712   ;;  %vm1011_vm5 = vcmask 261312  }
  0xc1   : > { %4752 = vmatpush3.bf16.msra.mxu0 %v4914_v9  ;;  %v5842_v14 = vpack.c.bf16 %v524_v12, %v523_v11  ;;  %v4918_v20 = vld [vmem:[%s5630_s21] sm:$0xff]   ;;  %v4919_v29 = vld [vmem:[%s5630_s21 + $0x8] sm:$0xff]   ;;  %v4917_v30 = vld [vmem:[%s5630_s21 + $0x18] sm:$0xff]   ;;  %s5364_s21 = smov 64   ;;  %vm788_vm6 = vcmask 523264   ;;  %vm2546_vm7 = vcmask 1043456  }
  0xc2   : > { %4753 = vmatprep.subr.bf16.mxu0 %v4915_v10  ;;  %4771 = vmatprep.mubr.msk.bf16.mxu1 %vm551_vm1, %v4918_v20  ;;  %v4920_v31 = vld [vmem:[%s5637_s22] sm:$0xff]   ;;  %v4921_v32 = vld [vmem:[%s5637_s22 + $0x8] sm:$0xff]   ;;  %v4922_v33 = vld [vmem:[%s5637_s22 + $0x10] sm:$0xff]   ;;  %p4621_p5 = scmp.ne.s32.totalorder %s5428_s28, 1 }
  0xc3   : > { %7959 = vst [vmem:[#allocation15_spill] sm:$0xff] %v5842_v14  ;;  %v526_v15 = vld [vmem:[#allocation2 + $0x18] sm:$0xff]  ;;  %4755 = vmatprep.mubr.msk.bf16.mxu0 %vm551_vm1, %v5842_v14  ;;  %v553_v17 = vsel %vm551_vm1, %v5842_v14, 0  ;;  %4843 = vmatprep.subr.msk.bf16.mxu1 %vm551_vm1, %v5842_v14  ;;  %v1030_v50 = vld [vmem:[#allocation3 + $0x10] sm:$0xff]  ;;  %v1029_v8 = vld [vmem:[#allocation3 + $0x8] sm:$0xff] }
  0xc4   : > { %v5846_v16 = vpack.c.bf16 %v526_v15, %v525_v13  ;;  %v527_v18 = vld [vmem:[#allocation2 + $0x20] sm:$0xff]  ;;  %v528_v19 = vld [vmem:[#allocation2 + $0x28] sm:$0xff]  ;;  %4764 = vmatpush3.bf16.xpose.msra.mxu1 %v553_v17  ;;  %v4923_v34 = vld [vmem:[%s5637_s22 + $0x18] sm:$0xff]  }
  0xc5   : > { %4754 = vmatpush3.bf16.msra.mxu0 %v4915_v10  ;;  %v5860_v22 = vpack.c.bf16 %v528_v19, %v527_v18  ;;  %v529_v23 = vld [vmem:[#allocation2 + $0x30] sm:$0xff]  ;;  %v530_v24 = vld [vmem:[#allocation2 + $0x38] sm:$0xff] }
  0xc6   : > { %7960 = vst [vmem:[#allocation16_spill] sm:$0xff] %v5846_v16  ;;  %v556_v21 = vsel %vm551_vm1, %v5846_v16, 0  ;;  %4844 = vmatprep.subr.msk.bf16.mxu1 %vm551_vm1, %v5846_v16  ;;  %4847 = vmatprep.subr.msk.bf16.mxu0 %vm551_vm1, %v5842_v14  ;;  %v5866_v25 = vpack.c.bf16 %v530_v24, %v529_v23  ;;  %v1031_v47 = vld [vmem:[#allocation3 + $0x18] sm:$0xff]  ;;  %v1034_v51 = vld [vmem:[#allocation3 + $0x30] sm:$0xff]  ;;  %v1037_v23 = vld [vmem:[#allocation3 + $0x48] sm:$0xff] }
  0xc7   : > { %7961 = vst [vmem:[#allocation17_spill] sm:$0xff] %v5860_v22  ;;  %v559_v27 = vsel %vm551_vm1, %v5860_v22, 0  ;;  %v1035_v48 = vld [vmem:[#allocation3 + $0x38] sm:$0xff]  ;;  %v1046_v53 = vpack.c.bf16 %v1034_v51, %v1030_v50  ;;  %v1041_v24 = vld [vmem:[#allocation3 + $0x68] sm:$0xff] }
  0xc8   : > { %4756 = vmatmul.mubr.msk.bf16.vlgmr.msra.gmra.mrb[0].mxu0 %vm551_vm1, %v5846_v16  ;;  %7962 = vst [vmem:[#allocation18_spill] sm:$0xff] %v5866_v25  ;;  %v562_v28 = vsel %vm551_vm1, %v5866_v25, 0  ;;  %v1047_v49 = vpack.c.bf16 %v1035_v48, %v1031_v47  ;;  %v1039_v6 = vld [vmem:[#allocation3 + $0x58] sm:$0xff] }
  0xc9   : > { %4759 = vmatprep.mubr.msk.bf16.mxu0 %vm551_vm1, %v5860_v22 }
  0xcc   : > { %4766 = vmatpush3.bf16.xpose.msra.mxu1 %v556_v21 }
  0xcd   : > { %4845 = vmatprep.subr.msk.bf16.mxu1 %vm551_vm1, %v5860_v22 }
  0xce   : > { %4776 = vmatpush3.bf16.xpose.msra.mxu0 %v553_v17 }
  0xcf   : > { %4848 = vmatprep.subr.msk.bf16.mxu0 %vm551_vm1, %v5846_v16 }
  0xd0   : > { %4760 = vmatmul.mubr.msk.bf16.gmra.mrb[4].mxu0 %vm551_vm1, %v5866_v25 }
  0xd1   : > { %4783 = vmatprep.mubr.msk.bf16.mxu0 %vm551_vm1, %v4916_v26 }
  0xd4   : > { %4768 = vmatpush3.bf16.xpose.msra.mxu1 %v559_v27 }
  0xd5   : > { %4846 = vmatprep.subr.msk.bf16.mxu1 %vm551_vm1, %v5866_v25 }
  0xd6   : > { %4778 = vmatpush3.bf16.xpose.msra.mxu0 %v556_v21  ;;  %v1042_v21 = vld [vmem:[#allocation3 + $0x70] sm:$0xff] }
  0xd7   : > { %4849 = vmatprep.subr.msk.bf16.mxu0 %vm551_vm1, %v5860_v22 }
  0xdc   : > { %4770 = vmatpush3.bf16.xpose.msra.mxu1 %v562_v28 }
  0xde   : > { %4780 = vmatpush3.bf16.xpose.msra.mxu0 %v559_v27 }
  0xdf   : > { %4850 = vmatprep.subr.msk.bf16.mxu0 %vm551_vm1, %v5866_v25 }
  0xe3   : > { %4772 = vmatmul.mubr.msk.bf16.vlgmr.msra.gmra.mrb[0].mxu1 %vm551_vm1, %v4919_v29 }
  0xe4   : > { %1096 = vmatprep.mubr.bf16.mxu1 %v5363_v57 }
  0xe6   : > { %4782 = vmatpush3.bf16.xpose.msra.mxu0 %v562_v28  ;;  %v1032_v28 = vld [vmem:[#allocation3 + $0x20] sm:$0xff] }
  0xe7   : > { %4787 = vmatprep.subr.bf16.mxu0 %v4920_v31 }
  0xed   : > { %4784 = vmatmul.mubr.msk.bf16.vlgmr.msra.gmra.mrb[8].mxu0 %vm551_vm1, %v4917_v30 }
  0xee   : > { %4791 = vmatprep.mubr.msk.bf16.mxu0 %vm551_vm1, %v5842_v14  ;;  %4788 = vmatpush3.bf16.msra.mxu0 %v4920_v31  ;;  %v1036_v31 = vld [vmem:[#allocation3 + $0x40] sm:$0xff] }
  0xef   : > { %4789 = vmatprep.subr.bf16.mxu0 %v4921_v32 }
  0xf2   : > { %4790 = vmatpush3.bf16.msra.mxu0 %v4921_v32 }
  0xf3   : > { %4799 = vmatprep.subr.bf16.mxu0 %v4922_v33 }
  0xf5   : > { %4792 = vmatmul.mubr.msk.bf16.vlgmr.msra.gmra.mrb[12].mxu0 %vm551_vm1, %v5846_v16 }
  0xf6   : > { %4795 = vmatprep.mubr.msk.bf16.mxu0 %vm551_vm1, %v5860_v22  ;;  %4800 = vmatpush3.bf16.msra.mxu0 %v4922_v33 }
  0xf7   : > { %4801 = vmatprep.subr.bf16.mxu0 %v4923_v34 }
  0xfa   : > { %4802 = vmatpush3.bf16.msra.mxu0 %v4923_v34 }
  0xfb   : > { %1137 = vmatprep.subr.bf16.mxu0 %v1047_v49 }
  0xfd   : > { %4796 = vmatmul.mubr.msk.bf16.gmra.mrb[16].mxu0 %vm551_vm1, %v5866_v25 }
  0xfe   : > { %4803 = vmatprep.mubr.msk.bf16.mxu0 %vm551_vm1, %v5842_v14 }
 0x105   : > { %4804 = vmatmul.mubr.msk.bf16.vlgmr.msra.gmra.mrb[20].mxu0 %vm551_vm1, %v5846_v16 }
 0x106   : > { %4807 = vmatprep.mubr.msk.bf16.mxu0 %vm551_vm1, %v5860_v22  ;;  %1138 = vmatpush1.bf16.msra.mxu0 %v1046_v53 }
 0x10d   : > { %4808 = vmatmul.mubr.msk.bf16.gmra.mrb[24].mxu0 %vm551_vm1, %v5866_v25 }
 0x10e   : > { %1169 = vmatprep.mubr.bf16.mxu0 %v5363_v57 }
 0x19b   : > { %v4757_v35 = vpop.f32.mrb[0].mxu0 }
 0x19c   : > { %v598_v36 = vpop.f32.mrb[1].mxu0 }
 0x19d   : > { %v4758_v37 = vpop.f32.mrb[2].mxu0 }
 0x19e   : > { %v5910_v38 = vpack.c.bf16 %v4758_v37, %v4757_v35  ;;  %v601_v39 = vpop.f32.mrb[3].mxu0  ;;  %v1049_v37 = vpack.c.bf16 %v1041_v24, %v1037_v23 }
 0x19f   : > { %v5912_v40 = vpack.c.bf16 %v601_v39, %v598_v36  ;;  %v1040_v39 = vld [vmem:[#allocation3 + $0x60] sm:$0xff] }
 0x1a0   : > { %v1048_v50 = vpack.c.bf16 %v1040_v39, %v1036_v31 }
 0x1a3   : > { %v4761_v41 = vpop.f32.mrb[4].mxu0 }
 0x1a4   : > { %v614_v42 = vpop.f32.mrb[5].mxu0 }
 0x1a5   : > { %v4762_v43 = vpop.f32.mrb[6].mxu0 }
 0x1a6   : > { %v5914_v44 = vpack.c.bf16 %v4762_v43, %v4761_v41  ;;  %v617_v45 = vpop.f32.mrb[7].mxu0 }
 0x1a7   : > { %v5916_v46 = vpack.c.bf16 %v617_v45, %v614_v42 }
 0x1b6   : > { %v5918_v52 = vpop.f32.mrb[0].mxu1 }
 0x1b7   : > { %v5920_v54 = vpop.f32.mrb[1].mxu1 }
 0x1b8   : > { %v5922_v55 = vpop.f32.mrb[2].mxu1 }
 0x1b9   : > { %v5924_v56 = vpop.f32.mrb[3].mxu1 }
 0x1c0   : > { %v4785_v58 = vpop.f32.mrb[8].mxu0 }
 0x1c1   : > { %v757_v59 = vpop.f32.mrb[9].mxu0 }
 0x1c2   : > { %v4786_v60 = vpop.f32.mrb[10].mxu0 }
 0x1c3   : > { %782 = vrot.lane.b32.xlu1 %v4786_v60, %s5364_s21  ;;  %v760_v61 = vpop.f32.mrb[11].mxu0 }
 0x1c4   : > { %778 = vrot.lane.b32.xlu0 %v760_v61, %s5364_s21 }
 0x1c7   : > { %780 = vrot.lane.b32.xlu1 %v4785_v58, %s5364_s21 }
 0x1c8   : > { %776 = vrot.lane.b32.xlu0 %v757_v59, %s5364_s21  ;;  %v4793_v62 = vpop.f32.mrb[12].mxu0 }
 0x1c9   : > { %960 = vst.msk [vmem:[#allocation4 + $0x10] sm:$0xff] %vm957_vm2, %v4793_v62  ;;  %v843_v63 = vpop.f32.mrb[13].mxu0 }
 0x1ca   : > { %978 = vst.msk [vmem:[#allocation4 + $0x90] sm:$0xff] %vm975_vm3, %v4793_v62  ;;  %976 = vst.msk [vmem:[#allocation4 + $0x80] sm:$0xff] %vm975_vm3, %v843_v63  ;;  %v4794_v0 = vpop.f32.mrb[14].mxu0 }
 0x1cb   : > { %996 = vst.msk [vmem:[#allocation4 + $0x110] sm:$0xff] %vm993_vm4, %v4793_v62  ;;  %994 = vst.msk [vmem:[#allocation4 + $0x100] sm:$0xff] %vm993_vm4, %v843_v63  ;;  %v846_v1 = vpop.f32.mrb[15].mxu0 }
 0x1cc   : > { %1014 = vst.msk [vmem:[#allocation4 + $0x190] sm:$0xff] %vm1011_vm5, %v4793_v62  ;;  %1012 = vst.msk [vmem:[#allocation4 + $0x180] sm:$0xff] %vm1011_vm5, %v843_v63 }
 0x1cd   : > { %958 = vst.msk [vmem:[#allocation4] sm:$0xff] %vm957_vm2, %v843_v63  ;;  %961 = vst.msk [vmem:[#allocation4 + $0x18] sm:$0xff] %vm957_vm2, %v4794_v0 }
 0x1ce   : > { %979 = vst.msk [vmem:[#allocation4 + $0x98] sm:$0xff] %vm975_vm3, %v4794_v0  ;;  %977 = vst.msk [vmem:[#allocation4 + $0x88] sm:$0xff] %vm975_vm3, %v846_v1 }
 0x1cf   : > { %997 = vst.msk [vmem:[#allocation4 + $0x118] sm:$0xff] %vm993_vm4, %v4794_v0  ;;  %995 = vst.msk [vmem:[#allocation4 + $0x108] sm:$0xff] %vm993_vm4, %v846_v1 }
 0x1d0   : > { %1015 = vst.msk [vmem:[#allocation4 + $0x198] sm:$0xff] %vm1011_vm5, %v4794_v0  ;;  %1013 = vst.msk [vmem:[#allocation4 + $0x188] sm:$0xff] %vm1011_vm5, %v846_v1  ;;  %v4797_v2 = vpop.f32.mrb[16].mxu0 }
 0x1d1   : > { %959 = vst.msk [vmem:[#allocation4 + $0x8] sm:$0xff] %vm957_vm2, %v846_v1  ;;  %964 = vst.msk [vmem:[#allocation4 + $0x30] sm:$0xff] %vm957_vm2, %v4797_v2  ;;  %v859_v3 = vpop.f32.mrb[17].mxu0  ;;  %v3987_v45 = vld [vmem:[#allocation4 + $0x80] sm:$0xff]  ;;  %v3989_v59 = vld [vmem:[#allocation4 + $0x90] sm:$0xff] }
 0x1d2   : > { %982 = vst.msk [vmem:[#allocation4 + $0xb0] sm:$0xff] %vm975_vm3, %v4797_v2  ;;  %980 = vst.msk [vmem:[#allocation4 + $0xa0] sm:$0xff] %vm975_vm3, %v859_v3  ;;  %v4798_v4 = vpop.f32.mrb[18].mxu0  ;;  %v4003_v33 = vld [vmem:[#allocation4 + $0x100] sm:$0xff] }
 0x1d3   : > { %1000 = vst.msk [vmem:[#allocation4 + $0x130] sm:$0xff] %vm993_vm4, %v4797_v2  ;;  %998 = vst.msk [vmem:[#allocation4 + $0x120] sm:$0xff] %vm993_vm4, %v859_v3  ;;  %v862_v5 = vpop.f32.mrb[19].mxu0  ;;  %v4019_v17 = vld [vmem:[#allocation4 + $0x180] sm:$0xff]  ;;  %v4021_v41 = vld [vmem:[#allocation4 + $0x190] sm:$0xff] }
 0x1d4   : > { %1018 = vst.msk [vmem:[#allocation4 + $0x1b0] sm:$0xff] %vm1011_vm5, %v4797_v2  ;;  %1016 = vst.msk [vmem:[#allocation4 + $0x1a0] sm:$0xff] %vm1011_vm5, %v859_v3 }
 0x1d5   : > { %962 = vst.msk [vmem:[#allocation4 + $0x20] sm:$0xff] %vm957_vm2, %v859_v3  ;;  %965 = vst.msk [vmem:[#allocation4 + $0x38] sm:$0xff] %vm957_vm2, %v4798_v4  ;;  %v3988_v47 = vld [vmem:[#allocation4 + $0x88] sm:$0xff]  ;;  %v3990_v61 = vld [vmem:[#allocation4 + $0x98] sm:$0xff] }
 0x1d6   : > { %983 = vst.msk [vmem:[#allocation4 + $0xb8] sm:$0xff] %vm975_vm3, %v4798_v4  ;;  %981 = vst.msk [vmem:[#allocation4 + $0xa8] sm:$0xff] %vm975_vm3, %v862_v5  ;;  %v4004_v34 = vld [vmem:[#allocation4 + $0x108] sm:$0xff]  ;;  %v4006_v53 = vld [vmem:[#allocation4 + $0x118] sm:$0xff] }
 0x1d7   : > { %1001 = vst.msk [vmem:[#allocation4 + $0x138] sm:$0xff] %vm993_vm4, %v4798_v4  ;;  %999 = vst.msk [vmem:[#allocation4 + $0x128] sm:$0xff] %vm993_vm4, %v862_v5  ;;  %v4020_v18 = vld [vmem:[#allocation4 + $0x188] sm:$0xff]  ;;  %v4022_v42 = vld [vmem:[#allocation4 + $0x198] sm:$0xff]  ;;  %v4051_v48 = vpack.c.bf16 %v4004_v34, %v4003_v33 }
 0x1d8   : > { %1019 = vst.msk [vmem:[#allocation4 + $0x1b8] sm:$0xff] %vm1011_vm5, %v4798_v4  ;;  %1017 = vst.msk [vmem:[#allocation4 + $0x1a8] sm:$0xff] %vm1011_vm5, %v862_v5  ;;  %v4805_v9 = vpop.f32.mrb[20].mxu0  ;;  %v4059_v32 = vpack.c.bf16 %v4020_v18, %v4019_v17  ;;  %v4060_v51 = vpack.c.bf16 %v4022_v42, %v4021_v41  ;;  %v3972_v58 = vld [vmem:[#allocation4 + $0x8] sm:$0xff]  ;;  %v3973_v3 = vld [vmem:[#allocation4 + $0x10] sm:$0xff] }
 0x1d9   : > { %963 = vst.msk [vmem:[#allocation4 + $0x28] sm:$0xff] %vm957_vm2, %v862_v5  ;;  %968 = vst.msk [vmem:[#allocation4 + $0x50] sm:$0xff] %vm957_vm2, %v4805_v9  ;;  %v925_v12 = vpop.f32.mrb[21].mxu0  ;;  %v3993_v24 = vld [vmem:[#allocation4 + $0xb0] sm:$0xff] }
 0x1da   : > { %986 = vst.msk [vmem:[#allocation4 + $0xd0] sm:$0xff] %vm975_vm3, %v4805_v9  ;;  %984 = vst.msk [vmem:[#allocation4 + $0xc0] sm:$0xff] %vm975_vm3, %v925_v12  ;;  %v4806_v19 = vpop.f32.mrb[22].mxu0  ;;  %v4007_v4 = vld [vmem:[#allocation4 + $0x120] sm:$0xff]  ;;  %v4009_v18 = vld [vmem:[#allocation4 + $0x130] sm:$0xff] }
 0x1db   : > { %1004 = vst.msk [vmem:[#allocation4 + $0x150] sm:$0xff] %vm993_vm4, %v4805_v9  ;;  %1002 = vst.msk [vmem:[#allocation4 + $0x140] sm:$0xff] %vm993_vm4, %v925_v12  ;;  %v928_v26 = vpop.f32.mrb[23].mxu0  ;;  %v4023_v62 = vld [vmem:[#allocation4 + $0x1a0] sm:$0xff]  ;;  %v3977_v33 = vld [vmem:[#allocation4 + $0x30] sm:$0xff] }
 0x1dc   : > { %1022 = vst.msk [vmem:[#allocation4 + $0x1d0] sm:$0xff] %vm1011_vm5, %v4805_v9  ;;  %1020 = vst.msk [vmem:[#allocation4 + $0x1c0] sm:$0xff] %vm1011_vm5, %v925_v12  ;;  %v4025_v9 = vld [vmem:[#allocation4 + $0x1b0] sm:$0xff]  ;;  %v3978_v34 = vld [vmem:[#allocation4 + $0x38] sm:$0xff] }
 0x1dd   : > { %966 = vst.msk [vmem:[#allocation4 + $0x40] sm:$0xff] %vm957_vm2, %v925_v12  ;;  %969 = vst.msk [vmem:[#allocation4 + $0x58] sm:$0xff] %vm957_vm2, %v4806_v19  ;;  %v3992_v12 = vld [vmem:[#allocation4 + $0xa8] sm:$0xff]  ;;  %v4038_v41 = vpack.c.bf16 %v3978_v34, %v3977_v33 }
 0x1de   : > { %987 = vst.msk [vmem:[#allocation4 + $0xd8] sm:$0xff] %vm975_vm3, %v4806_v19  ;;  %985 = vst.msk [vmem:[#allocation4 + $0xc8] sm:$0xff] %vm975_vm3, %v928_v26  ;;  %v4008_v5 = vld [vmem:[#allocation4 + $0x128] sm:$0xff] }
 0x1df   : > { %1005 = vst.msk [vmem:[#allocation4 + $0x158] sm:$0xff] %vm993_vm4, %v4806_v19  ;;  %1003 = vst.msk [vmem:[#allocation4 + $0x148] sm:$0xff] %vm993_vm4, %v928_v26  ;;  %v4024_v63 = vld [vmem:[#allocation4 + $0x1a8] sm:$0xff] }
 0x1e0   : > { %1023 = vst.msk [vmem:[#allocation4 + $0x1d8] sm:$0xff] %vm1011_vm5, %v4806_v19  ;;  %1021 = vst.msk [vmem:[#allocation4 + $0x1c8] sm:$0xff] %vm1011_vm5, %v928_v26  ;;  %v4809_v49 = vpop.f32.mrb[24].mxu0  ;;  %v4010_v19 = vld [vmem:[#allocation4 + $0x138] sm:$0xff]  ;;  %v3976_v23 = vld [vmem:[#allocation4 + $0x28] sm:$0xff] }
 0x1e1   : > { %967 = vst.msk [vmem:[#allocation4 + $0x48] sm:$0xff] %vm957_vm2, %v928_v26  ;;  %972 = vst.msk [vmem:[#allocation4 + $0x70] sm:$0xff] %vm957_vm2, %v4809_v49  ;;  %v3994_v26 = vld [vmem:[#allocation4 + $0xb8] sm:$0xff] }
 0x1e2   : > { %990 = vst.msk [vmem:[#allocation4 + $0xf0] sm:$0xff] %vm975_vm3, %v4809_v49 }
 0x1e3   : > { %1008 = vst.msk [vmem:[#allocation4 + $0x170] sm:$0xff] %vm993_vm4, %v4809_v49 }
 0x1e4   : > { %1026 = vst.msk [vmem:[#allocation4 + $0x1f0] sm:$0xff] %vm1011_vm5, %v4809_v49  ;;  %v4029_v49 = vld [vmem:[#allocation4 + $0x1d0] sm:$0xff] }
 0x1e6   : > { %v4012_v31 = vld [vmem:[#allocation4 + $0x148] sm:$0xff] }
 0x235   : > { %v783_v7 = vpop.permute.xlu1 %782 }
 0x236   : > { %v792_v10 = vsel %vm788_vm6, %v5922_v55, %v783_v7  ;;  %v779_v11 = vpop.permute.xlu0 %778  ;;  %v4043_v55 = vpack.c.bf16 %v3988_v47, %v3987_v45  ;;  %v3974_v7 = vld [vmem:[#allocation4 + $0x18] sm:$0xff]  ;;  %v3980_v45 = vld [vmem:[#allocation4 + $0x48] sm:$0xff] }
 0x237   : > { %v790_v13 = vsel %vm788_vm6, %v5924_v56, %v779_v11  ;;  %v1051_v15 = vpack.c.bf16 %v792_v10, %v1039_v6  ;;  %v3971_v56 = vld [vmem:[#allocation4] sm:$0xff]  ;;  %v4044_v6 = vpack.c.bf16 %v3990_v61, %v3989_v59  ;;  %v4026_v10 = vld [vmem:[#allocation4 + $0x1b8] sm:$0xff] }
 0x238   : > { %v1045_v20 = vpack.c.bf16 %v790_v13, %v1029_v8  ;;  %v4035_v2 = vpack.c.bf16 %v3972_v58, %v3971_v56  ;;  %v4061_v8 = vpack.c.bf16 %v4024_v63, %v4023_v62  ;;  %v3991_v11 = vld [vmem:[#allocation4 + $0xa0] sm:$0xff]  ;;  %v4053_v13 = vpack.c.bf16 %v4008_v5, %v4007_v4  ;;  %v4013_v56 = vld [vmem:[#allocation4 + $0x150] sm:$0xff] }
 0x239   : > { %v781_v27 = vpop.permute.xlu1 %780  ;;  %1139 = vmatprep.subr.bf16.mxu0 %v1051_v15  ;;  %v4036_v15 = vpack.c.bf16 %v3974_v7, %v3973_v3  ;;  %v4062_v17 = vpack.c.bf16 %v4026_v10, %v4025_v9  ;;  %v4001_v5 = vld [vmem:[#allocation4 + $0xf0] sm:$0xff] }
 0x23a   : > { %v791_v29 = vsel %vm788_vm6, %v5918_v52, %v781_v27  ;;  %v777_v30 = vpop.permute.xlu0 %776  ;;  %1064 = vmatprep.subr.bf16.mxu1 %v1045_v20  ;;  %v4005_v52 = vld [vmem:[#allocation4 + $0x110] sm:$0xff]  ;;  %v4045_v20 = vpack.c.bf16 %v3992_v12, %v3991_v11  ;;  %v4028_v27 = vld [vmem:[#allocation4 + $0x1c8] sm:$0xff] }
 0x23b   : > { %v789_v35 = vsel %vm788_vm6, %v5920_v54, %v777_v30  ;;  %v1050_v36 = vpack.c.bf16 %v1042_v21, %v791_v29  ;;  %v941_v54 = vpop.f32.mrb[25].mxu0  ;;  %v4052_v1 = vpack.c.bf16 %v4006_v53, %v4005_v52  ;;  %v3975_v21 = vld [vmem:[#allocation4 + $0x20] sm:$0xff]  ;;  %v3981_v52 = vld [vmem:[#allocation4 + $0x50] sm:$0xff]  ;;  %v3982_v53 = vld [vmem:[#allocation4 + $0x58] sm:$0xff] }
 0x23c   : > { %v1044_v43 = vpack.c.bf16 %v1032_v28, %v789_v35  ;;  %970 = vst.msk [vmem:[#allocation4 + $0x60] sm:$0xff] %vm957_vm2, %v941_v54  ;;  %v4810_v60 = vpop.f32.mrb[26].mxu0  ;;  %v4054_v28 = vpack.c.bf16 %v4010_v19, %v4009_v18  ;;  %v4037_v29 = vpack.c.bf16 %v3976_v23, %v3975_v21  ;;  %v4011_v30 = vld [vmem:[#allocation4 + $0x140] sm:$0xff]  ;;  %v4033_v7 = vld [vmem:[#allocation4 + $0x1f0] sm:$0xff]  ;;  %v1215_v19 = vlaneseq }
 0x23d   : > { %1140 = vmatpush1.bf16.msra.mxu0 %v1050_v36  ;;  %988 = vst.msk [vmem:[#allocation4 + $0xe0] sm:$0xff] %vm975_vm3, %v941_v54  ;;  %991 = vst.msk [vmem:[#allocation4 + $0xf8] sm:$0xff] %vm975_vm3, %v4810_v60  ;;  %v944_v0 = vpop.f32.mrb[27].mxu0  ;;  %v3995_v36 = vld [vmem:[#allocation4 + $0xc0] sm:$0xff]  ;;  %v4055_v39 = vpack.c.bf16 %v4012_v31, %v4011_v30  ;;  %v3985_v10 = vld [vmem:[#allocation4 + $0x70] sm:$0xff] }
 0x23e   : > { %1065 = vmatpush1.bf16.msra.mxu1 %v1044_v43  ;;  %4699 = vmatprep.subr.bf16.mxu0 %v4059_v32  ;;  %1006 = vst.msk [vmem:[#allocation4 + $0x160] sm:$0xff] %vm993_vm4, %v941_v54  ;;  %1009 = vst.msk [vmem:[#allocation4 + $0x178] sm:$0xff] %vm993_vm4, %v4810_v60  ;;  %v4046_v32 = vpack.c.bf16 %v3994_v26, %v3993_v24  ;;  %v3979_v43 = vld [vmem:[#allocation4 + $0x40] sm:$0xff]  ;;  %v1216_v23 = vshrl.u32 %v1215_v19, 7  ;;  %v1755_v30 = vld [vmem:[%s7798_s1 + $0x8] sm:$0xff] }
 0x23f   : > { %1066 = vmatprep.subr.bf16.mxu1 %v1049_v37  ;;  %1024 = vst.msk [vmem:[#allocation4 + $0x1e0] sm:$0xff] %vm1011_vm5, %v941_v54  ;;  %1027 = vst.msk [vmem:[#allocation4 + $0x1f8] sm:$0xff] %vm1011_vm5, %v4810_v60  ;;  %v3996_v37 = vld [vmem:[#allocation4 + $0xc8] sm:$0xff]  ;;  %v4039_v47 = vpack.c.bf16 %v3980_v45, %v3979_v43  ;;  %v1754_v26 = vld [vmem:[%s7798_s1] sm:$0xff]  ;;  %v1819_v34 = vcombine.high %v1755_v30, %v1755_v30 }
 0x240   : > { %4573 = vmatmul.mubr.msk.bf16.vlgmr.msra.gmra.mrb[28].mxu0 %vm551_vm1, %v5912_v40  ;;  %973 = vst.msk [vmem:[#allocation4 + $0x78] sm:$0xff] %vm957_vm2, %v4810_v60  ;;  %971 = vst.msk [vmem:[#allocation4 + $0x68] sm:$0xff] %vm957_vm2, %v944_v0  ;;  %v4047_v42 = vpack.c.bf16 %v3996_v37, %v3995_v36  ;;  %v5367_v37 = vmov 1934713408  }
 0x241   : > { %1179 = vmatprep.mubr.bf16.mxu0 %v5363_v57  ;;  %4700 = vmatpush3.bf16.msra.mxu0 %v4051_v48  ;;  %989 = vst.msk [vmem:[#allocation4 + $0xe8] sm:$0xff] %vm975_vm3, %v944_v0  ;;  %v3998_v48 = vld [vmem:[#allocation4 + $0xd8] sm:$0xff] }
 0x242   : > { %1007 = vst.msk [vmem:[#allocation4 + $0x168] sm:$0xff] %vm993_vm4, %v944_v0  ;;  %1067 = vmatpush1.bf16.msra.mxu1 %v1048_v50  ;;  %4701 = vmatprep.subr.bf16.mxu0 %v4060_v51  ;;  %v4030_v51 = vld [vmem:[#allocation4 + $0x1d8] sm:$0xff] }
 0x243   : > { %1025 = vst.msk [vmem:[#allocation4 + $0x1e8] sm:$0xff] %vm1011_vm5, %v944_v0  ;;  %4659 = vmatprep.subr.bf16.mxu1 %v4043_v55  ;;  %v4064_v54 = vpack.c.bf16 %v4030_v51, %v4029_v49  ;;  %v4040_v55 = vpack.c.bf16 %v3982_v53, %v3981_v52  ;;  %v3983_v62 = vld [vmem:[#allocation4 + $0x60] sm:$0xff] }
 0x244   : > { %v3999_v58 = vld [vmem:[#allocation4 + $0xe0] sm:$0xff] }
 0x245   : > { %4569 = vmatmul.mubr.msk.bf16.vlgmr.msra.gmra.mrb[4].mxu1 %vm551_vm1, %v5912_v40  ;;  %4702 = vmatpush3.bf16.msra.mxu0 %v4052_v1  ;;  %v4027_v40 = vld [vmem:[#allocation4 + $0x1c0] sm:$0xff] }
 0x246   : > { %1106 = vmatprep.mubr.bf16.mxu1 %v5363_v57  ;;  %4660 = vmatpush3.bf16.msra.mxu1 %v4035_v2  ;;  %v4063_v35 = vpack.c.bf16 %v4028_v27, %v4027_v40  ;;  %v4031_v60 = vld [vmem:[#allocation4 + $0x1e0] sm:$0xff]  ;;  %v4034_v9 = vld [vmem:[#allocation4 + $0x1f8] sm:$0xff]  ;;  %v1770_v27 = vcombine.high %v1754_v26, %v1754_v26 }
 0x247   : > { %4661 = vmatprep.subr.bf16.mxu1 %v4044_v6  ;;  %4703 = vmatprep.subr.bf16.mxu0 %v4061_v8  ;;  %v3984_v63 = vld [vmem:[#allocation4 + $0x68] sm:$0xff]  ;;  %v4015_v2 = vld [vmem:[#allocation4 + $0x160] sm:$0xff]  ;;  %v4002_v6 = vld [vmem:[#allocation4 + $0xf8] sm:$0xff]  ;;  %v4066_v12 = vpack.c.bf16 %v4034_v9, %v4033_v7 }
 0x248   : > { %4574 = vmatmul.mubr.msk.bf16.gmra.mrb[32].mxu0 %vm551_vm1, %v5910_v38  ;;  %v4000_v59 = vld [vmem:[#allocation4 + $0xe8] sm:$0xff]  ;;  %v4041_v1 = vpack.c.bf16 %v3984_v63, %v3983_v62  ;;  %v4050_v8 = vpack.c.bf16 %v4002_v6, %v4001_v5  ;;  %v3986_v11 = vld [vmem:[#allocation4 + $0x78] sm:$0xff]  ;;  %v1756_v7 = vld [vmem:[%s7798_s1 + $0x10] sm:$0xff] }
 0x249   : > { %1189 = vmatprep.mubr.bf16.mxu0 %v5363_v57  ;;  %4704 = vmatpush3.bf16.msra.mxu0 %v4053_v13  ;;  %v4016_v3 = vld [vmem:[#allocation4 + $0x168] sm:$0xff]  ;;  %v4042_v13 = vpack.c.bf16 %v3986_v11, %v3985_v10 }
 0x24a   : > { %4662 = vmatpush3.bf16.msra.mxu1 %v4036_v15  ;;  %4705 = vmatprep.subr.bf16.mxu0 %v4062_v17  ;;  %v4032_v61 = vld [vmem:[#allocation4 + $0x1e8] sm:$0xff]  ;;  %v4057_v4 = vpack.c.bf16 %v4016_v3, %v4015_v2  ;;  %v4017_v15 = vld [vmem:[#allocation4 + $0x170] sm:$0xff]  ;;  %v4018_v17 = vld [vmem:[#allocation4 + $0x178] sm:$0xff] }
 0x24b   : > { %4663 = vmatprep.subr.bf16.mxu1 %v4045_v20  ;;  %v4065_v0 = vpack.c.bf16 %v4032_v61, %v4031_v60  ;;  %v4058_v18 = vpack.c.bf16 %v4018_v17, %v4017_v15  ;;  %v5365_v20 = vmov 1966171168  }
 0x24c   : > { %v1772_v21 = vunpack.c.l.s4 %v5365_v20 }
 0x24d   : > { %4570 = vmatmul.mubr.msk.bf16.gmra.mrb[8].mxu1 %vm551_vm1, %v5910_v38  ;;  %4706 = vmatpush3.bf16.msra.mxu0 %v4054_v28  ;;  %v3997_v38 = vld [vmem:[#allocation4 + $0xd0] sm:$0xff] }
 0x24e   : > { %1116 = vmatprep.mubr.bf16.mxu1 %v5363_v57  ;;  %4664 = vmatpush3.bf16.msra.mxu1 %v4037_v29  ;;  %v4048_v50 = vpack.c.bf16 %v3998_v48, %v3997_v38  ;;  %v1773_v24 = vunpack.c.0.s8 %v1772_v21 }
 0x24f   : > { %4665 = vmatprep.subr.bf16.mxu1 %v4046_v32  ;;  %4707 = vmatprep.subr.bf16.mxu0 %v4063_v35  ;;  %v5366_v35 = vmov 1983009808  }
 0x250   : > { %4575 = vmatmul.mubr.msk.bf16.gmra.mrb[36].mxu0 %vm551_vm1, %v5916_v46  ;;  %v6025_v40 = vsub.s32 %v1773_v24, %v1216_v23  ;;  %v1213_v36 = vunpack.c.l.s4 %v5366_v35 }
 0x251   : > { %1199 = vmatprep.mubr.bf16.mxu0 %v5363_v57  ;;  %4708 = vmatpush3.bf16.msra.mxu0 %v4055_v39  ;;  %v1245_v39 = vunpack.c.l.s4 %v5367_v37 }
 0x252   : > { %4666 = vmatpush3.bf16.msra.mxu1 %v4038_v41  ;;  %4709 = vmatprep.subr.bf16.mxu0 %v4064_v54  ;;  %v1777_v28 = vrot.slane %v1754_v26, %v6025_v40  ;;  %v1784_v29 = vrot.slane %v1770_v27, %v6025_v40  ;;  %v1826_v33 = vrot.slane %v1755_v30, %v6025_v40  ;;  %v1214_v48 = vunpack.c.0.s8 %v1213_v36 }
 0x253   : > { %4667 = vmatprep.subr.bf16.mxu1 %v4047_v42  ;;  %v1833_v38 = vrot.slane %v1819_v34, %v6025_v40  ;;  %v1246_v49 = vunpack.c.0.s8 %v1245_v39  ;;  %v6107_v24 = vrot.slane %v1756_v7, %v6025_v40  ;;  %v1868_v26 = vcombine.high %v1756_v7, %v1756_v7 }
 0x254   : > { %v1785_v31 = vcombine.high %v1777_v28, %v1777_v28  ;;  %v1786_v32 = vcombine.high %v1784_v29, %v1784_v29  ;;  %v6034_v41 = vrot.slane %v1784_v29, %v6025_v40  ;;  %v6037_v42 = vrot.slane %v1777_v28, %v6025_v40 }
 0x255   : > { %4571 = vmatmul.mubr.msk.bf16.gmra.mrb[12].mxu1 %vm551_vm1, %v5916_v46  ;;  %v4014_v46 = vld [vmem:[#allocation4 + $0x158] sm:$0xff]  ;;  %v6064_v60 = vsub.s32 %v1214_v48, %v1216_v23  ;;  %v1835_v62 = vcombine.high %v1833_v38, %v1833_v38 }
 0x256   : > { %1126 = vmatprep.mubr.bf16.mxu1 %v5363_v57  ;;  %4668 = vmatpush3.bf16.msra.mxu1 %v4039_v47  ;;  %v4056_v57 = vpack.c.bf16 %v4014_v46, %v4013_v56  ;;  %v6040_v43 = vrot.slane %v1785_v31, %v6025_v40  ;;  %v6043_v45 = vrot.slane %v1786_v32, %v6025_v40 }
 0x257   : > { %4669 = vmatprep.subr.bf16.mxu1 %v4048_v50  ;;  %v6046_v47 = vrot.slane %v1826_v33, %v6025_v40  ;;  %v6049_v50 = vsub.s32 0, %v1216_v23  ;;  %v1816_v51 = vcombine.high %v6034_v41, %v6034_v41  ;;  %v1815_v52 = vcombine.high %v6037_v42, %v6037_v42  ;;  %7963 = vst [vmem:[#allocation19_spill] sm:$0xff] %v6064_v60 }
 0x258   : > { %4576 = vmatmul.mubr.msk.bf16.gmra.mrb[40].mxu0 %vm551_vm1, %v5914_v44  ;;  %v1817_v54 = vcombine.high %v6040_v43, %v6040_v43  ;;  %v1818_v56 = vcombine.high %v6043_v45, %v6043_v45  ;;  %v6104_v19 = vrot.slane %v1835_v62, %v6025_v40  ;;  %v6134_v62 = vrot.slane %v1868_v26, %v6025_v40 }
 0x259   : > { %4710 = vmatpush3.bf16.msra.mxu0 %v4056_v57  ;;  %v1864_v46 = vcombine.high %v6046_v47, %v6046_v47  ;;  %v6062_v57 = vrot.slane %v1833_v38, %v6025_v40  ;;  %v2181_v61 = vrot.slane %v6034_v41, %v6049_v50  ;;  %v6076_v2 = vrot.slane %v1815_v52, %v6049_v50 }
 0x25a   : > { %4670 = vmatpush3.bf16.msra.mxu1 %v4040_v55  ;;  %4711 = vmatprep.subr.bf16.mxu0 %v4065_v0  ;;  %v2165_v0 = vrot.slane %v6037_v42, %v6049_v50  ;;  %v6079_v3 = vrot.slane %v1817_v54, %v6049_v50  ;;  %v6091_v9 = vrot.slane %v1818_v56, %v6049_v50 }
 0x25b   : > { %v6094_v10 = vrot.slane %v1864_v46, %v6049_v50 }
 0x25d   : > { %4572 = vmatmul.mubr.msk.bf16.gmra.mrb[16].mxu1 %vm551_vm1, %v5914_v44  ;;  %v4049_v44 = vpack.c.bf16 %v4000_v59, %v3999_v58  ;;  %4712 = vmatpush3.bf16.msra.mxu0 %v4057_v4  ;;  %v1834_v58 = vcombine.high %v1826_v33, %v1826_v33  ;;  %v2169_v4 = vrot.slane %v6040_v43, %v6049_v50 }
 0x25e   : > { %4713 = vmatprep.subr.bf16.mxu0 %v4066_v12 }
 0x25f   : > { %4671 = vmatprep.subr.bf16.mxu1 %v4049_v44  ;;  %v6066_v44 = vsub.s32 %v1246_v49, %v1216_v23  ;;  %v6097_v11 = vrot.slane %v1834_v58, %v6025_v40 }
 0x260   : > { %4672 = vmatpush3.bf16.msra.mxu1 %v4041_v1  ;;  %v6073_v1 = vrot.slane %v1816_v51, %v6049_v50 }
 0x261   : > { %4673 = vmatprep.subr.bf16.mxu1 %v4050_v8  ;;  %4714 = vmatpush3.bf16.msra.mxu0 %v4058_v18  ;;  %7964 = vst [vmem:[#allocation20_spill] sm:$0xff] %v6066_v44 }
 0x264   : > { %4674 = vmatpush3.bf16.msra.mxu1 %v4042_v13 }
 0x313   : > { %v1171_v53 = vpop.f32.mrb[28].mxu0 }
 0x314   : > { %v1173_v55 = vpop.f32.mrb[29].mxu0 }
 0x315   : > { %v1175_v59 = vpop.f32.mrb[30].mxu0 }
 0x316   : > { %v1177_v63 = vpop.f32.mrb[31].mxu0 }
 0x318   : > { %v1098_v8 = vpop.f32.mrb[4].mxu1 }
 0x319   : > { %v1210_v13 = vcombine.low %v1098_v8, %v1171_v53  ;;  %v1211_v15 = vcombine.high %v1098_v8, %v1171_v53  ;;  %v1100_v17 = vpop.f32.mrb[5].mxu1 }
 0x31a   : > { %v1226_v20 = vcombine.low %v1100_v17, %v1173_v55  ;;  %v1227_v21 = vcombine.high %v1100_v17, %v1173_v55  ;;  %v1102_v23 = vpop.f32.mrb[6].mxu1 }
 0x31b   : > { %v1218_v27 = vrot.slane %v1210_v13, %v6064_v60  ;;  %v1225_v28 = vrot.slane %v1211_v15, %v6064_v60  ;;  %v1278_v29 = vcombine.low %v1102_v23, %v1175_v59  ;;  %v1279_v30 = vcombine.high %v1102_v23, %v1175_v59  ;;  %v1104_v31 = vpop.f32.mrb[7].mxu1  ;;  %v1181_v32 = vpop.f32.mrb[32].mxu0 }
 0x31c   : > { %v1234_v33 = vrot.slane %v1226_v20, %v6064_v60  ;;  %v1241_v34 = vrot.slane %v1227_v21, %v6064_v60  ;;  %v1294_v35 = vcombine.low %v1104_v31, %v1177_v63  ;;  %v1295_v36 = vcombine.high %v1104_v31, %v1177_v63  ;;  %v1183_v37 = vpop.f32.mrb[33].mxu0 }
 0x31d   : > { %v6114_v39 = vrot.slane %v1278_v29, %v6064_v60  ;;  %v6117_v38 = vrot.slane %v1279_v30, %v6064_v60  ;;  %v1185_v48 = vpop.f32.mrb[34].mxu0  ;;  %v6131_v59 = vrot.slane %v6107_v24, %v6025_v40 }
 0x31e   : > { %v1242_v52 = vcombine.low %v1218_v27, %v1234_v33  ;;  %v1243_v53 = vcombine.high %v1218_v27, %v1234_v33  ;;  %v1258_v54 = vcombine.low %v1225_v28, %v1241_v34  ;;  %v1259_v55 = vcombine.high %v1225_v28, %v1241_v34  ;;  %v1187_v56 = vpop.f32.mrb[35].mxu0 }
 0x31f   : > { %v6124_v46 = vrot.slane %v1294_v35, %v6064_v60  ;;  %v6127_v58 = vrot.slane %v1295_v36, %v6064_v60 }
 0x320   : > { %v1108_v63 = vpop.f32.mrb[8].mxu1  ;;  %v6137_v7 = vrot.slane %v1258_v54, %v6066_v44  ;;  %v6140_v8 = vrot.slane %v1242_v52, %v6066_v44  ;;  %v6143_v13 = vrot.slane %v1259_v55, %v6066_v44  ;;  %v1257_v15 = vrot.slane %v1243_v53, %v6066_v44 }
 0x321   : > { %v1310_v17 = vcombine.low %v6114_v39, %v6124_v46  ;;  %v1110_v26 = vpop.f32.mrb[9].mxu1  ;;  %v1346_v27 = vcombine.low %v1108_v63, %v1181_v32  ;;  %v1347_v28 = vcombine.high %v1108_v63, %v1181_v32 }
 0x322   : > { %v1362_v29 = vcombine.low %v1110_v26, %v1183_v37  ;;  %v1363_v30 = vcombine.high %v1110_v26, %v1183_v37  ;;  %v1112_v31 = vpop.f32.mrb[10].mxu1  ;;  %v6158_v52 = vadd.f32 %v2181_v61, %v6137_v7  ;;  %v6164_v53 = vadd.f32 %v2165_v0, %v6140_v8 }
 0x323   : > { %v1414_v33 = vcombine.low %v1112_v31, %v1185_v48  ;;  %v1415_v34 = vcombine.high %v1112_v31, %v1185_v48  ;;  %v1114_v35 = vpop.f32.mrb[11].mxu1  ;;  %v1191_v36 = vpop.f32.mrb[36].mxu0  ;;  %v6167_v32 = vrot.slane %v1346_v27, %v6064_v60  ;;  %v6170_v37 = vrot.slane %v1347_v28, %v6064_v60 }
 0x324   : > { %v6173_v48 = vrot.slane %v1362_v29, %v6064_v60  ;;  %v6176_v54 = vrot.slane %v1363_v30, %v6064_v60  ;;  %v1193_v41 = vpop.f32.mrb[37].mxu0  ;;  %v1430_v0 = vcombine.low %v1114_v35, %v1187_v56  ;;  %v1431_v55 = vcombine.high %v1114_v35, %v1187_v56 }
 0x325   : > { %v6179_v61 = vrot.slane %v1414_v33, %v6064_v60  ;;  %v6182_v42 = vrot.slane %v1415_v34, %v6064_v60  ;;  %v1195_v63 = vpop.f32.mrb[38].mxu0  ;;  %v2559_v56 = vsel %vm2546_vm7, %v6158_v52, -inf  ;;  %v2547_v34 = vsel %vm2546_vm7, %v6164_v53, -inf }
 0x326   : > { %v1197_v30 = vpop.f32.mrb[39].mxu0  ;;  %v6193_v31 = vrot.slane %v1430_v0, %v6064_v60  ;;  %v6196_v33 = vrot.slane %v1431_v55, %v6064_v60  ;;  %2560 = vmax.xlane.f32.xlu1 %v2559_v56  ;;  %2548 = vmax.xlane.f32.xlu0 %v2547_v34  ;;  %v6204_v28 = vadd.f32 %v6073_v1, %v6143_v13  ;;  %v7811_v0 = vmov 0.0  }
 0x327   : > { %v6207_v29 = vadd.f32 %v6076_v2, %v1257_v15  ;;  %v1275_v55 = vcombine.high %v1257_v15, %v7811_v0 }
 0x328   : > { %v1118_v35 = vpop.f32.mrb[12].mxu1  ;;  %v2565_v2 = vsel %vm2546_vm7, %v6204_v28, -inf }
 0x329   : > { %v1120_v1 = vpop.f32.mrb[13].mxu1  ;;  %v1482_v49 = vcombine.low %v1118_v35, %v1191_v36  ;;  %v1483_v18 = vcombine.high %v1118_v35, %v1191_v36  ;;  %v2553_v15 = vsel %vm2546_vm7, %v6207_v29, -inf }
 0x32a   : > { %v1122_v51 = vpop.f32.mrb[14].mxu1  ;;  %v1498_v27 = vcombine.low %v1120_v1, %v1193_v41  ;;  %v1499_v12 = vcombine.high %v1120_v1, %v1193_v41  ;;  %2566 = vmax.xlane.f32.xlu1 %v2565_v2  ;;  %2554 = vmax.xlane.f32.xlu0 %v2553_v15  ;;  %v6244_v1 = vadd.f32 %v6079_v3, %v1275_v55 }
 0x32b   : > { %v1550_v23 = vcombine.low %v1122_v51, %v1195_v63  ;;  %v1551_v26 = vcombine.high %v1122_v51, %v1195_v63  ;;  %v1124_v21 = vpop.f32.mrb[15].mxu1  ;;  %v1201_v20 = vpop.f32.mrb[40].mxu0  ;;  %v6223_v56 = vrot.slane %v1482_v49, %v6064_v60  ;;  %v6226_v34 = vrot.slane %v1483_v18, %v6064_v60 }
 0x32c   : > { %v1566_v36 = vcombine.low %v1124_v21, %v1197_v30  ;;  %v1203_v35 = vpop.f32.mrb[41].mxu0  ;;  %v6229_v6 = vrot.slane %v1498_v27, %v6064_v60  ;;  %v6232_v5 = vrot.slane %v1499_v12, %v6064_v60  ;;  %v1567_v63 = vcombine.high %v1124_v21, %v1197_v30 }
 0x32d   : > { %v6235_v51 = vrot.slane %v1550_v23, %v6064_v60  ;;  %v6238_v41 = vrot.slane %v1551_v26, %v6064_v60  ;;  %v1205_v49 = vpop.f32.mrb[42].mxu0  ;;  %v1274_v27 = vcombine.high %v6140_v8, %v7811_v0  ;;  %v2556_v55 = vsel %vm2546_vm7, %v6244_v1, -inf }
 0x32e   : > { %v6241_v18 = vrot.slane %v1566_v36, %v6064_v60  ;;  %v1207_v2 = vpop.f32.mrb[43].mxu0  ;;  %v6257_v30 = vrot.slane %v1567_v63, %v6064_v60  ;;  %2557 = vmax.xlane.f32.xlu0 %v2556_v55  ;;  %v1276_v63 = vcombine.high %v6137_v7, %v7811_v0  ;;  %v1318_v55 = vrot.slane %v1310_v17, %v6066_v44 }
 0x32f   : > { %v6268_v36 = vadd.f32 %v2169_v4, %v1274_v27  ;;  %v7966_v17 = vrot.slane %v6046_v47, %v6049_v50 }
 0x330   : > { %v1128_v15 = vpop.f32.mrb[16].mxu1 }
 0x331   : > { %v1618_v21 = vcombine.low %v1128_v15, %v1201_v20  ;;  %v1619_v26 = vcombine.high %v1128_v15, %v1201_v20  ;;  %v1130_v23 = vpop.f32.mrb[17].mxu1  ;;  %v2550_v20 = vsel %vm2546_vm7, %v6268_v36, -inf  ;;  %v7965_v15 = vrot.slane %v6043_v45, %v6049_v50 }
 0x332   : > { %v1634_v43 = vcombine.low %v1130_v23, %v1203_v35  ;;  %v1132_v4 = vpop.f32.mrb[18].mxu1  ;;  %2551 = vmax.xlane.f32.xlu1 %v2550_v20  ;;  %v6296_v12 = vadd.f32 %v7966_v17, %v1318_v55  ;;  %v1635_v0 = vcombine.high %v1130_v23, %v1203_v35 }
 0x333   : > { %v6283_v27 = vrot.slane %v1618_v21, %v6064_v60  ;;  %v6286_v7 = vrot.slane %v1619_v26, %v6064_v60  ;;  %v6291_v8 = vadd.f32 %v7965_v15, %v1276_v63  ;;  %v1134_v3 = vpop.f32.mrb[19].mxu1  ;;  %v1686_v21 = vcombine.low %v1132_v4, %v1205_v49 }
 0x334   : > { %v6299_v25 = vrot.slane %v1634_v43, %v6064_v60  ;;  %v1687_v22 = vcombine.high %v1132_v4, %v1205_v49  ;;  %v1702_v16 = vcombine.low %v1134_v3, %v1207_v2  ;;  %v1703_v45 = vcombine.high %v1134_v3, %v1207_v2 }
 0x335   : > { %v2562_v26 = vsel %vm2546_vm7, %v6291_v8, -inf  ;;  %v2571_v63 = vsel %vm2546_vm7, %v6296_v12, -inf  ;;  %v6306_v20 = vrot.slane %v1635_v0, %v6064_v60  ;;  %v6313_v23 = vrot.slane %v1686_v21, %v6064_v60 }
 0x336   : > { %2563 = vmax.xlane.f32.xlu0 %v2562_v26  ;;  %v6316_v49 = vrot.slane %v1687_v22, %v6064_v60  ;;  %v6319_v2 = vrot.slane %v1702_v16, %v6064_v60  ;;  %v6322_v3 = vrot.slane %v1703_v45, %v6064_v60  ;;  %2572 = vmax.xlane.f32.xlu1 %v2571_v63  ;;  %v7967_v4 = vmov 0.0  }
 0x337   : > { %v1277_v15 = vcombine.high %v6143_v13, %v7967_v4  ;;  %v7968_v22 = vcombine.high %v6114_v39, %v6124_v46  ;;  %v7971_v39 = vcombine.low %v6117_v38, %v6127_v58  ;;  %v7972_v26 = vcombine.high %v6117_v38, %v6127_v58 }
 0x338   : > { %v7974_v45 = vcombine.high %v6097_v11, %v6097_v11  ;;  %v7975_v38 = vrot.slane %v6062_v57, %v6049_v50  ;;  %v1867_v43 = vcombine.high %v6104_v19, %v6104_v19 }
 0x339   : > { %v1325_v17 = vrot.slane %v7968_v22, %v6066_v44  ;;  %v6343_v63 = vadd.f32 %v6091_v9, %v1277_v15  ;;  %v1334_v46 = vrot.slane %v7971_v39, %v6066_v44  ;;  %v1342_v22 = vcombine.high %v1318_v55, %v7967_v4 }
 0x33a   : > { %v1341_v21 = vrot.slane %v7972_v26, %v6066_v44  ;;  %v7973_v9 = vcombine.high %v6062_v57, %v6062_v57  ;;  %v2209_v16 = vrot.slane %v7974_v45, %v6049_v50  ;;  %v7977_v26 = vrot.slane %v6097_v11, %v6049_v50  ;;  %v1757_v45 = vld [vmem:[%s7798_s1 + $0x18] sm:$0xff] }
 0x33b   : > { %7969 = vst [vmem:[#allocation21_spill] sm:$0xff] %v6343_v63  ;;  %v6346_v13 = vadd.f32 %v6094_v10, %v1325_v17  ;;  %v1343_v10 = vcombine.high %v1325_v17, %v7967_v4  ;;  %v2568_v55 = vsel %vm2546_vm7, %v6343_v63, -inf  ;;  %v6373_v58 = vadd.f32 %v7975_v38, %v1334_v46 }
 0x33c   : > { %v2221_v15 = vrot.slane %v7973_v9, %v6049_v50  ;;  %v6378_v17 = vadd.f32 %v7977_v26, %v1342_v22  ;;  %2569 = vmax.xlane.f32.xlu0 %v2568_v55  ;;  %v2217_v9 = vrot.slane %v6104_v19, %v6049_v50  ;;  %v1883_v57 = vcombine.high %v6107_v24, %v6107_v24 }
 0x33d   : > { %7970 = vst [vmem:[#allocation22_spill] sm:$0xff] %v6346_v13  ;;  %v2577_v39 = vsel %vm2546_vm7, %v6346_v13, -inf  ;;  %7976 = vst [vmem:[#allocation23_spill] sm:$0xff] %v6373_v58  ;;  %v1913_v11 = vcombine.high %v6131_v59, %v6131_v59  ;;  %v1898_v22 = vrot.slane %v6134_v62, %v6025_v40  ;;  %v1884_v38 = vcombine.high %v6134_v62, %v6134_v62 }
 0x33e   : > { %7978 = vst [vmem:[#allocation24_spill] sm:$0xff] %v6378_v17  ;;  %2578 = vmax.xlane.f32.xlu1 %v2577_v39  ;;  %v6396_v55 = vrot.slane %v1757_v45, %v6025_v40  ;;  %v6398_v39 = vadd.f32 %v2221_v15, %v1341_v21  ;;  %v7980_v19 = vcombine.low %v6167_v32, %v6173_v48  ;;  %v2583_v35 = vsel %vm2546_vm7, %v6373_v58, -inf }
 0x33f   : > { %v2229_v24 = vrot.slane %v6131_v59, %v6049_v50  ;;  %v1917_v0 = vcombine.high %v1757_v45, %v1757_v45  ;;  %v2574_v62 = vsel %vm2546_vm7, %v6378_v17, -inf  ;;  %v6410_v47 = vadd.f32 %v2209_v16, %v1343_v10 }
 0x340   : > { %7979 = vst [vmem:[#allocation25_spill] sm:$0xff] %v6398_v39  ;;  %v1386_v26 = vrot.slane %v7980_v19, %v6066_v44  ;;  %v1344_v15 = vcombine.high %v1334_v46, %v7967_v4  ;;  %2575 = vmax.xlane.f32.xlu0 %v2574_v62  ;;  %v1905_v14 = vrot.slane %v1883_v57, %v6025_v40 }
 0x341   : > { %7981 = vst [vmem:[#allocation26_spill] sm:$0xff] %v6410_v47  ;;  %v7982_v19 = vcombine.high %v6167_v32, %v6173_v48  ;;  %v2237_v45 = vrot.slane %v1913_v11, %v6049_v50  ;;  %v1914_v60 = vcombine.high %v1898_v22, %v1898_v22  ;;  %v6420_v58 = vrot.slane %v1884_v38, %v6025_v40 }
 0x342   : > { %2584 = vmax.xlane.f32.xlu1 %v2583_v35  ;;  %v1345_v16 = vcombine.high %v1341_v21, %v7967_v4  ;;  %v2225_v10 = vrot.slane %v1867_v43, %v6049_v50  ;;  %v6426_v35 = vrot.slane %v6396_v55, %v6025_v40  ;;  %v6429_v46 = vrot.slane %v1917_v0, %v6025_v40 }
 0x343   : > { %v1393_v59 = vrot.slane %v7982_v19, %v6066_v44  ;;  %v2589_v32 = vsel %vm2546_vm7, %v6398_v39, -inf  ;;  %v2580_v48 = vsel %vm2546_vm7, %v6410_v47, -inf  ;;  %v6435_v57 = vadd.f32 %v2217_v9, %v1344_v15 }
 0x344   : > { %v6437_v11 = vadd.f32 %v2229_v24, %v1386_v26  ;;  %2581 = vmax.xlane.f32.xlu0 %v2580_v48  ;;  %v1915_v43 = vcombine.high %v1905_v14, %v1905_v14  ;;  %v2245_v38 = vrot.slane %v1898_v22, %v6049_v50  ;;  %v2253_v0 = vrot.slane %v1914_v60, %v6049_v50 }
 0x345   : > { %7983 = vst [vmem:[#allocation27_spill] sm:$0xff] %v6435_v57  ;;  %v6439_v21 = vadd.f32 %v2237_v45, %v1393_v59  ;;  %v1916_v62 = vcombine.high %v6420_v58, %v6420_v58  ;;  %v6445_v19 = vadd.f32 %v2225_v10, %v1345_v16  ;;  %v2233_v47 = vrot.slane %v1905_v14, %v6049_v50 }
 0x346   : > { %7984 = vst [vmem:[#allocation28_spill] sm:$0xff] %v6437_v11  ;;  %2590 = vmax.xlane.f32.xlu1 %v2589_v32  ;;  %v1962_v9 = vcombine.high %v6426_v35, %v6426_v35  ;;  %v6452_v24 = vrot.slane %v6429_v46, %v6025_v40  ;;  %v2586_v15 = vsel %vm2546_vm7, %v6435_v57, -inf  ;;  %v2595_v60 = vsel %vm2546_vm7, %v6437_v11, -inf }
 0x347   : > { %7985 = vst [vmem:[#allocation29_spill] sm:$0xff] %v6439_v21  ;;  %7986 = vst [vmem:[#allocation30_spill] sm:$0xff] %v6445_v19  ;;  %v7987_v22 = vcombine.low %v6170_v37, %v6176_v54  ;;  %v1410_v14 = vcombine.high %v1386_v26, %v7967_v4  ;;  %v2241_v16 = vrot.slane %v1915_v43, %v6049_v50  ;;  %v2601_v11 = vsel %vm2546_vm7, %v6439_v21, -inf }
 0x348   : > { %2587 = vmax.xlane.f32.xlu0 %v2586_v15  ;;  %v1932_v10 = vcombine.high %v6396_v55, %v6396_v55  ;;  %v7988_v32 = vcombine.low %v6223_v56, %v6229_v6  ;;  %v2261_v26 = vrot.slane %v6426_v35, %v6049_v50  ;;  %v2257_v43 = vrot.slane %v1916_v62, %v6049_v50 }
 0x349   : > { %v1402_v45 = vrot.slane %v7987_v22, %v6066_v44  ;;  %v2249_v22 = vrot.slane %v6420_v58, %v6049_v50  ;;  %v2592_v55 = vsel %vm2546_vm7, %v6445_v19, -inf  ;;  %v7989_v15 = vcombine.high %v6170_v37, %v6176_v54 }
 0x34a   : > { %2596 = vmax.xlane.f32.xlu1 %v2595_v60  ;;  %v6470_v48 = vrot.slane %v7988_v32, %v6066_v44  ;;  %v1411_v32 = vcombine.high %v1393_v59, %v7967_v4  ;;  %v7990_v21 = vcombine.high %v6223_v56, %v6229_v6  ;;  %v6494_v35 = vadd.f32 %v2233_v47, %v1410_v14 }
 0x34b   : > { %v1409_v60 = vrot.slane %v7989_v15, %v6066_v44  ;;  %v6492_v57 = vadd.f32 %v2245_v38, %v1402_v45  ;;  %v7993_v62 = vcombine.low %v6226_v34, %v6232_v5  ;;  %v2269_v6 = vrot.slane %v1962_v9, %v6049_v50  ;;  %v1758_v38 = vld [vmem:[%s7798_s1 + $0x20] sm:$0xff] }
 0x34c   : > { %v6490_v58 = vrot.slane %v7990_v21, %v6066_v44  ;;  %7992 = vst [vmem:[#allocation32_spill] sm:$0xff] %v6494_v35  ;;  %v6504_v37 = vcombine.high %v6470_v48, %v7967_v4  ;;  %2593 = vmax.xlane.f32.xlu0 %v2592_v55  ;;  %v7994_v54 = vcombine.high %v6226_v34, %v6232_v5  ;;  %v2598_v15 = vsel %vm2546_vm7, %v6494_v35, -inf }
 0x34d   : > { %7991 = vst [vmem:[#allocation31_spill] sm:$0xff] %v6492_v57  ;;  %v6500_v19 = vrot.slane %v7993_v62, %v6066_v44  ;;  %v2277_v59 = vrot.slane %v6452_v24, %v6049_v50  ;;  %v1954_v21 = vrot.slane %v1932_v10, %v6025_v40  ;;  %v6529_v34 = vadd.f32 %v2253_v0, %v1409_v60 }
 0x34e   : > { %2602 = vmax.xlane.f32.xlu1 %v2601_v11  ;;  %v6511_v56 = vrot.slane %v7994_v54, %v6066_v44  ;;  %v6515_v47 = vcombine.high %v6490_v58, %v7967_v4  ;;  %v1963_v11 = vcombine.high %v6452_v24, %v6452_v24  ;;  %v6531_v9 = vadd.f32 %v2241_v16, %v1411_v32 }
 0x34f   : > { %v6527_v5 = vcombine.high %v6500_v19, %v7967_v4  ;;  %7995 = vst [vmem:[#allocation33_spill] sm:$0xff] %v6529_v34  ;;  %v1412_v14 = vcombine.high %v1402_v45, %v7967_v4  ;;  %v7997_v10 = vcombine.low %v6235_v51, %v6241_v18  ;;  %v2607_v24 = vsel %vm2546_vm7, %v6492_v57, -inf }
 0x350   : > { %7996 = vst [vmem:[#allocation34_spill] sm:$0xff] %v6531_v9  ;;  %v7998_v0 = vcombine.low %v6179_v61, %v6193_v31  ;;  %v6550_v45 = vcombine.high %v6511_v56, %v7967_v4  ;;  %2599 = vmax.xlane.f32.xlu0 %v2598_v15  ;;  %v1933_v32 = vcombine.high %v6429_v46, %v6429_v46 }
 0x351   : > { %v6538_v55 = vrot.slane %v7997_v10, %v6066_v44  ;;  %v1966_v62 = vcombine.high %v1758_v38, %v1758_v38  ;;  %v7999_v54 = vcombine.high %v6235_v51, %v6241_v18  ;;  %v1413_v35 = vcombine.high %v1409_v60, %v7967_v4 }
 0x352   : > { %v1454_v16 = vrot.slane %v7998_v0, %v6066_v44  ;;  %2608 = vmax.xlane.f32.xlu1 %v2607_v24  ;;  %v2285_v0 = vrot.slane %v1963_v11, %v6049_v50  ;;  %v8000_v57 = vcombine.low %v6238_v41, %v6257_v30  ;;  %v6572_v15 = vadd.f32 %v2249_v22, %v1412_v14 }
 0x353   : > { %v6558_v10 = vrot.slane %v7999_v54, %v6066_v44  ;;  %v6570_v46 = vcombine.high %v6538_v55, %v7967_v4  ;;  %v8002_v51 = vcombine.high %v6179_v61, %v6193_v31  ;;  %v8003_v60 = vcombine.high %v6238_v41, %v6257_v30 }
 0x354   : > { %v6566_v24 = vrot.slane %v8000_v57, %v6066_v44  ;;  %8001 = vst [vmem:[#allocation35_spill] sm:$0xff] %v6572_v15  ;;  %v2613_v54 = vsel %vm2546_vm7, %v6529_v34, -inf  ;;  %v2604_v22 = vsel %vm2546_vm7, %v6531_v9, -inf  ;;  %v6592_v14 = vadd.f32 %v2261_v26, %v1454_v16 }
 0x355   : > { %v1461_v18 = vrot.slane %v8002_v51, %v6066_v44  ;;  %v6582_v11 = vrot.slane %v8003_v60, %v6066_v44  ;;  %v6586_v57 = vcombine.high %v6558_v10, %v7967_v4  ;;  %2605 = vmax.xlane.f32.xlu0 %v2604_v22  ;;  %v1964_v31 = vcombine.high %v1954_v21, %v1954_v21 }
 0x356   : > { %8004 = vst [vmem:[#allocation36_spill] sm:$0xff] %v6592_v14  ;;  %v6596_v61 = vcombine.high %v6566_v24, %v7967_v4  ;;  %2614 = vmax.xlane.f32.xlu1 %v2613_v54  ;;  %v1973_v41 = vrot.slane %v1758_v38, %v6025_v40  ;;  %v8005_v30 = vcombine.low %v6283_v27, %v6299_v25  ;;  %v2610_v54 = vsel %vm2546_vm7, %v6572_v15, -inf }
 0x357   : > { %v6605_v60 = vadd.f32 %v2257_v43, %v1413_v35  ;;  %v2265_v26 = vrot.slane %v1954_v21, %v6049_v50  ;;  %v1961_v9 = vrot.slane %v1933_v32, %v6025_v40  ;;  %v6611_v34 = vcombine.high %v6582_v11, %v7967_v4 }
 0x358   : > { %v6603_v51 = vrot.slane %v8005_v30, %v6066_v44  ;;  %v6615_v38 = vadd.f32 %v2269_v6, %v1461_v18  ;;  %v8007_v22 = vcombine.low %v6182_v42, %v6196_v33  ;;  %v8008_v43 = vcombine.high %v6283_v27, %v6299_v25 }
 0x359   : > { %8006 = vst [vmem:[#allocation37_spill] sm:$0xff] %v6605_v60  ;;  %v2619_v21 = vsel %vm2546_vm7, %v6592_v14, -inf  ;;  %v1478_v32 = vcombine.high %v1454_v16, %v7967_v4  ;;  %v8009_v6 = vcombine.low %v6286_v7, %v6306_v20  ;;  %2611 = vmax.xlane.f32.xlu0 %v2610_v54  ;;  %v1980_v25 = vrot.slane %v1966_v62, %v6025_v40 }
 0x35a   : > { %v1470_v30 = vrot.slane %v8007_v22, %v6066_v44  ;;  %v6625_v35 = vrot.slane %v8008_v43, %v6066_v44  ;;  %v6638_v22 = vcombine.high %v6603_v51, %v7967_v4  ;;  %2620 = vmax.xlane.f32.xlu1 %v2619_v21  ;;  %v8010_v27 = vcombine.high %v6286_v7, %v6306_v20 }
 0x35b   : > { %v6634_v15 = vrot.slane %v8009_v6, %v6066_v44  ;;  %v2273_v6 = vrot.slane %v1964_v31, %v6049_v50  ;;  %v2281_v14 = vrot.slane %v1961_v9, %v6049_v50  ;;  %v1989_v39 = vrot.slane %v1973_v41, %v6025_v40 }
 0x35c   : > { %v6645_v43 = vrot.slane %v8010_v27, %v6066_v44  ;;  %v6649_v16 = vcombine.high %v6625_v35, %v7967_v4  ;;  %v2616_v62 = vsel %vm2546_vm7, %v6605_v60, -inf  ;;  %v8011_v7 = vcombine.high %v6182_v42, %v6196_v33 }
 0x35d   : > { %v6656_v54 = vcombine.high %v6634_v15, %v7967_v4  ;;  %v1479_v21 = vcombine.high %v1461_v18, %v7967_v4  ;;  %v8012_v31 = vcombine.low %v6313_v23, %v6319_v2  ;;  %v2625_v17 = vsel %vm2546_vm7, %v6615_v38, -inf  ;;  %2617 = vmax.xlane.f32.xlu0 %v2616_v62 }
 0x35e   : > { %v1477_v20 = vrot.slane %v8011_v7, %v6066_v44  ;;  %v6673_v13 = vadd.f32 %v2277_v59, %v1470_v30  ;;  %v6675_v63 = vadd.f32 %v2265_v26, %v1478_v32  ;;  %v6679_v60 = vcombine.high %v6645_v43, %v7967_v4  ;;  %2626 = vmax.xlane.f32.xlu1 %v2625_v17 }
 0x35f   : > { %v6669_v27 = vrot.slane %v8012_v31, %v6066_v44  ;;  %v1965_v42 = vcombine.high %v1961_v9, %v1961_v9  ;;  %v1981_v33 = vcombine.high %v1973_v41, %v1973_v41  ;;  %v8014_v18 = vcombine.high %v6313_v23, %v6319_v2 }
 0x360   : > { %8013 = vst [vmem:[#allocation38_spill] sm:$0xff] %v6675_v63  ;;  %v2293_v31 = vrot.slane %v1989_v39, %v6049_v50  ;;  %v2011_v59 = vcombine.high %v1989_v39, %v1989_v39  ;;  %v8015_v26 = vcombine.low %v6316_v49, %v6322_v3  ;;  %v6698_v9 = vadd.f32 %v2285_v0, %v1477_v20 }
 0x361   : > { %v6685_v7 = vrot.slane %v8014_v18, %v6066_v44  ;;  %v6696_v17 = vcombine.high %v6669_v27, %v7967_v4  ;;  %v1480_v41 = vcombine.high %v1470_v30, %v7967_v4  ;;  %v8017_v23 = vcombine.high %v6316_v49, %v6322_v3 }
 0x362   : > { %v6692_v32 = vrot.slane %v8015_v26, %v6066_v44  ;;  %8016 = vst [vmem:[#allocation39_spill] sm:$0xff] %v6698_v9  ;;  %v2631_v62 = vsel %vm2546_vm7, %v6673_v13, -inf  ;;  %v2622_v18 = vsel %vm2546_vm7, %v6675_v63, -inf  ;;  %v6715_v0 = vadd.f32 %v2273_v6, %v1479_v21 }
 0x363   : > { %v6705_v2 = vrot.slane %v8017_v23, %v6066_v44  ;;  %v6709_v39 = vcombine.high %v6685_v7, %v7967_v4  ;;  %2632 = vmax.xlane.f32.xlu1 %v2631_v62  ;;  %2623 = vmax.xlane.f32.xlu0 %v2622_v18  ;;  %v1996_v3 = vrot.slane %v1980_v25, %v6025_v40  ;;  %v2637_v21 = vsel %vm2546_vm7, %v6698_v9, -inf }
 0x364   : > { %8018 = vst [vmem:[#allocation40_spill] sm:$0xff] %v6715_v0  ;;  %v6719_v30 = vcombine.high %v6692_v32, %v7967_v4  ;;  %v6726_v26 = vadd.f32 %v2281_v14, %v1480_v41  ;;  %v2289_v23 = vrot.slane %v1965_v42, %v6049_v50  ;;  %v2301_v44 = vrot.slane %v2011_v59, %v6049_v50  ;;  %v1759_v14 = vld [vmem:[%s7798_s1 + $0x28] sm:$0xff] }
 0x365   : > { %v6723_v49 = vcombine.high %v6705_v2, %v7967_v4  ;;  %v2003_v6 = vrot.slane %v1981_v33, %v6025_v40  ;;  %v2628_v62 = vsel %vm2546_vm7, %v6715_v0, -inf  ;;  %v6736_v18 = vadd.f32 %v2293_v31, %v6470_v48 }
 0x366   : > { %8019 = vst [vmem:[#allocation41_spill] sm:$0xff] %v6726_v26  ;;  %v1481_v63 = vcombine.high %v1477_v20, %v7967_v4  ;;  %v1982_v42 = vcombine.high %v1980_v25, %v1980_v25  ;;  %v2022_v33 = vrot.slane %v1759_v14, %v6025_v40  ;;  %v2309_v59 = vrot.slane %v1996_v3, %v6049_v50 }
 0x367   : > { %2638 = vmax.xlane.f32.xlu1 %v2637_v21  ;;  %2629 = vmax.xlane.f32.xlu0 %v2628_v62  ;;  %v2297_v41 = vrot.slane %v2003_v6, %v6049_v50  ;;  %v2012_v9 = vcombine.high %v1996_v3, %v1996_v3  ;;  %v2013_v0 = vcombine.high %v2003_v6, %v2003_v6  ;;  %v2634_v48 = vsel %vm2546_vm7, %v6726_v26, -inf }
 0x368   : > { %v2643_v4 = vsel %vm2546_vm7, %v6736_v18, -inf  ;;  %v6749_v20 = vadd.f32 %v2289_v23, %v1481_v63  ;;  %v6752_v31 = vadd.f32 %v2301_v44, %v6490_v58  ;;  %v2010_v25 = vrot.slane %v1982_v42, %v6025_v40 }
 0x369   : > { %v2015_v21 = vcombine.high %v1759_v14, %v1759_v14  ;;  %v2317_v62 = vrot.slane %v2012_v9, %v6049_v50  ;;  %v2305_v3 = vrot.slane %v2013_v0, %v6049_v50  ;;  %v2038_v6 = vrot.slane %v2022_v33, %v6025_v40 }
 0x36a   : > { %v2640_v26 = vsel %vm2546_vm7, %v6749_v20, -inf  ;;  %v2649_v63 = vsel %vm2546_vm7, %v6752_v31, -inf  ;;  %v6763_v44 = vadd.f32 %v2309_v59, %v6500_v19  ;;  %v6766_v58 = vadd.f32 %v2297_v41, %v6504_v37 }
 0x36b   : > { %2635 = vmax.xlane.f32.xlu0 %v2634_v48  ;;  %2644 = vmax.xlane.f32.xlu1 %v2643_v4  ;;  %v2014_v23 = vcombine.high %v2010_v25, %v2010_v25  ;;  %v2029_v9 = vrot.slane %v2015_v21, %v6025_v40  ;;  %v2313_v0 = vrot.slane %v2010_v25, %v6049_v50 }
 0x36c   : > { %v2325_v14 = vrot.slane %v2038_v6, %v6049_v50  ;;  %v2060_v42 = vcombine.high %v2038_v6, %v2038_v6  ;;  %v2030_v48 = vcombine.high %v2022_v33, %v2022_v33  ;;  %v2655_v4 = vsel %vm2546_vm7, %v6763_v44, -inf }
 0x36d   : > { %v2646_v19 = vsel %vm2546_vm7, %v6766_v58, -inf  ;;  %v6776_v37 = vadd.f32 %v2317_v62, %v6511_v56  ;;  %v2045_v59 = vrot.slane %v2029_v9, %v6025_v40  ;;  %v2321_v41 = vrot.slane %v2014_v23, %v6049_v50 }
 0x36e   : > { %v2333_v33 = vrot.slane %v2060_v42, %v6049_v50  ;;  %v2052_v25 = vrot.slane %v2030_v48, %v6025_v40  ;;  %v6790_v62 = vadd.f32 %v2313_v0, %v6527_v5  ;;  %v2031_v48 = vcombine.high %v2029_v9, %v2029_v9 }
 0x36f   : > { %2641 = vmax.xlane.f32.xlu0 %v2640_v26  ;;  %2650 = vmax.xlane.f32.xlu1 %v2649_v63  ;;  %v6779_v26 = vadd.f32 %v2305_v3, %v6515_v47  ;;  %v2661_v21 = vsel %vm2546_vm7, %v6776_v37, -inf  ;;  %v6793_v47 = vadd.f32 %v2325_v14, %v6538_v55  ;;  %v2341_v3 = vrot.slane %v2045_v59, %v6049_v50  ;;  %v1760_v63 = vld [vmem:[%s7798_s1 + $0x30] sm:$0xff] }
 0x370   : > { %v2061_v6 = vcombine.high %v2045_v59, %v2045_v59  ;;  %v2329_v23 = vrot.slane %v2052_v25, %v6049_v50  ;;  %v2062_v42 = vcombine.high %v2052_v25, %v2052_v25  ;;  %v2658_v5 = vsel %vm2546_vm7, %v6790_v62, -inf }
 0x371   : > { %v2652_v56 = vsel %vm2546_vm7, %v6779_v26, -inf  ;;  %v2667_v55 = vsel %vm2546_vm7, %v6793_v47, -inf  ;;  %v6806_v0 = vadd.f32 %v2321_v41, %v6550_v45  ;;  %v6809_v14 = vadd.f32 %v2333_v33, %v6558_v10 }
 0x372   : > { %v2349_v59 = vrot.slane %v2061_v6, %v6049_v50  ;;  %v2337_v9 = vrot.slane %v2062_v42, %v6049_v50  ;;  %v2059_v25 = vrot.slane %v2031_v48, %v6025_v40  ;;  %v6820_v10 = vadd.f32 %v2341_v3, %v6566_v24 }
 0x373   : > { %2656 = vmax.xlane.f32.xlu1 %v2655_v4  ;;  %2647 = vmax.xlane.f32.xlu0 %v2646_v19  ;;  %v2071_v4 = vrot.slane %v1760_v63, %v6025_v40  ;;  %v2064_v19 = vcombine.high %v1760_v63, %v1760_v63  ;;  %v2673_v45 = vsel %vm2546_vm7, %v6809_v14, -inf  ;;  %v6823_v41 = vadd.f32 %v2329_v23, %v6570_v46 }
 0x374   : > { %v2345_v33 = vrot.slane %v2059_v25, %v6049_v50  ;;  %v2063_v42 = vcombine.high %v2059_v25, %v2059_v25  ;;  %v6833_v46 = vadd.f32 %v2349_v59, %v6582_v11  ;;  %v6836_v3 = vadd.f32 %v2337_v9, %v6586_v57  ;;  %v1761_v9 = vld [vmem:[%s7798_s1 + $0x38] sm:$0xff] }
 0x375   : > { %v2078_v6 = vrot.slane %v2064_v19, %v6025_v40  ;;  %v2670_v24 = vsel %vm2546_vm7, %v6823_v41, -inf }
 0x376   : > { %v2353_v23 = vrot.slane %v2063_v42, %v6049_v50  ;;  %v2676_v11 = vsel %vm2546_vm7, %v6836_v3, -inf  ;;  %v6847_v59 = vadd.f32 %v2345_v33, %v6596_v61 }
 0x377   : > { %2662 = vmax.xlane.f32.xlu1 %v2661_v21  ;;  %2653 = vmax.xlane.f32.xlu0 %v2652_v56  ;;  %v2087_v21 = vrot.slane %v2071_v4, %v6025_v40  ;;  %v2664_v56 = vsel %vm2546_vm7, %v6806_v0, -inf }
 0x378   : > { %v2682_v61 = vsel %vm2546_vm7, %v6847_v59, -inf  ;;  %v6863_v33 = vadd.f32 %v2353_v23, %v6611_v34 }
 0x379   : > { %v2357_v63 = vrot.slane %v2087_v21, %v6049_v50  ;;  %v2109_v48 = vcombine.high %v2087_v21, %v2087_v21  ;;  %v2685_v21 = vsel %vm2546_vm7, %v6833_v46, -inf }
 0x37b   : > { %2659 = vmax.xlane.f32.xlu0 %v2658_v5  ;;  %2668 = vmax.xlane.f32.xlu1 %v2667_v55  ;;  %v2079_v5 = vcombine.high %v2071_v4, %v2071_v4  ;;  %v2679_v55 = vsel %vm2546_vm7, %v6820_v10, -inf  ;;  %v2365_v19 = vrot.slane %v2109_v48, %v6049_v50  ;;  %v2094_v4 = vrot.slane %v2078_v6, %v6025_v40 }
 0x37c   : > { %v6850_v57 = vadd.f32 %v2357_v63, %v6603_v51 }
 0x37d   : > { %v2101_v25 = vrot.slane %v2079_v5, %v6025_v40  ;;  %v2373_v42 = vrot.slane %v2094_v4, %v6049_v50  ;;  %v2110_v5 = vcombine.high %v2094_v4, %v2094_v4  ;;  %v6866_v63 = vadd.f32 %v2365_v19, %v6625_v35 }
 0x37e   : > { %v2691_v51 = vsel %vm2546_vm7, %v6850_v57, -inf }
 0x37f   : > { %2665 = vmax.xlane.f32.xlu0 %v2664_v56  ;;  %2674 = vmax.xlane.f32.xlu1 %v2673_v45  ;;  %v2080_v56 = vcombine.high %v2078_v6, %v2078_v6  ;;  %v2120_v45 = vrot.slane %v1761_v9, %v6025_v40  ;;  %v2361_v48 = vrot.slane %v2101_v25, %v6049_v50  ;;  %v2697_v34 = vsel %vm2546_vm7, %v6866_v63, -inf }
 0x380   : > { %v2381_v4 = vrot.slane %v2110_v5, %v6049_v50  ;;  %v6877_v35 = vadd.f32 %v2373_v42, %v6634_v15 }
 0x381   : > { %v2108_v6 = vrot.slane %v2080_v56, %v6025_v40  ;;  %v6880_v23 = vadd.f32 %v2361_v48, %v6638_v22 }
 0x382   : > { %v6890_v22 = vadd.f32 %v2381_v4, %v6645_v43 }
 0x383   : > { %2680 = vmax.xlane.f32.xlu1 %v2679_v55  ;;  %2671 = vmax.xlane.f32.xlu0 %v2670_v24  ;;  %v2111_v55 = vcombine.high %v2101_v25, %v2101_v25  ;;  %v2113_v24 = vcombine.high %v1761_v9, %v1761_v9  ;;  %v2112_v19 = vcombine.high %v2108_v6, %v2108_v6  ;;  %v2694_v15 = vsel %vm2546_vm7, %v6880_v23, -inf }
 0x384   : > { %v2377_v56 = vrot.slane %v2108_v6, %v6049_v50 }
 0x385   : > { %v2369_v25 = vrot.slane %v2111_v55, %v6049_v50  ;;  %v2127_v9 = vrot.slane %v2113_v24, %v6025_v40  ;;  %v2385_v6 = vrot.slane %v2112_v19, %v6049_v50 }
 0x386   : > { %v6904_v4 = vadd.f32 %v2377_v56, %v6656_v54 }
 0x387   : > { %2686 = vmax.xlane.f32.xlu1 %v2685_v21  ;;  %2677 = vmax.xlane.f32.xlu0 %v2676_v11  ;;  %v2136_v21 = vrot.slane %v2120_v45, %v6025_v40  ;;  %v2688_v11 = vsel %vm2546_vm7, %v6863_v33, -inf  ;;  %v6893_v42 = vadd.f32 %v2369_v25, %v6649_v16  ;;  %v2143_v48 = vrot.slane %v2127_v9, %v6025_v40 }
 0x388   : > { %v6916_v54 = vadd.f32 %v2385_v6, %v6679_v60 }
 0x389   : > { %v2389_v5 = vrot.slane %v2136_v21, %v6049_v50  ;;  %v2158_v55 = vcombine.high %v2136_v21, %v2136_v21  ;;  %v2709_v21 = vsel %vm2546_vm7, %v6890_v22, -inf  ;;  %v2700_v43 = vsel %vm2546_vm7, %v6893_v42, -inf }
 0x38a   : > { %v2159_v25 = vcombine.high %v2143_v48, %v2143_v48 }
 0x38b   : > { %2683 = vmax.xlane.f32.xlu0 %v2682_v61  ;;  %2692 = vmax.xlane.f32.xlu1 %v2691_v51  ;;  %v2128_v61 = vcombine.high %v2120_v45, %v2120_v45  ;;  %v2703_v51 = vsel %vm2546_vm7, %v6877_v35, -inf  ;;  %v2397_v45 = vrot.slane %v2158_v55, %v6049_v50  ;;  %v6907_v16 = vadd.f32 %v2389_v5, %v6669_v27 }
 0x38c   : > { %v2129_v55 = vcombine.high %v2127_v9, %v2127_v9  ;;  %v2413_v56 = vrot.slane %v2159_v25, %v6049_v50 }
 0x38d   : > { %v2150_v24 = vrot.slane %v2128_v61, %v6025_v40  ;;  %v2706_v61 = vsel %vm2546_vm7, %v6904_v4, -inf  ;;  %v6919_v27 = vadd.f32 %v2397_v45, %v6685_v7 }
 0x38e   : > { %v2157_v9 = vrot.slane %v2129_v55, %v6025_v40 }
 0x38f   : > { %2689 = vmax.xlane.f32.xlu0 %v2688_v11  ;;  %2698 = vmax.xlane.f32.xlu1 %v2697_v34  ;;  %v2405_v11 = vrot.slane %v2143_v48, %v6049_v50  ;;  %v2393_v34 = vrot.slane %v2150_v24, %v6049_v50  ;;  %v2160_v19 = vcombine.high %v2150_v24, %v2150_v24  ;;  %v2721_v48 = vsel %vm2546_vm7, %v6919_v27, -inf }
 0x390   : > { %v2409_v6 = vrot.slane %v2157_v9, %v6049_v50  ;;  %v2161_v45 = vcombine.high %v2157_v9, %v2157_v9 }
 0x391   : > { %v2401_v5 = vrot.slane %v2160_v19, %v6049_v50  ;;  %v6929_v60 = vadd.f32 %v2405_v11, %v6692_v32  ;;  %v6932_v7 = vadd.f32 %v2393_v34, %v6696_v17 }
 0x392   : > { %v6950_v25 = vadd.f32 %v2409_v6, %v6719_v30  ;;  %v2417_v11 = vrot.slane %v2161_v45, %v6049_v50 }
 0x393   : > { %2704 = vmax.xlane.f32.xlu1 %v2703_v51  ;;  %2695 = vmax.xlane.f32.xlu0 %v2694_v15  ;;  %v2715_v51 = vsel %vm2546_vm7, %v6907_v16, -inf  ;;  %v2712_v15 = vsel %vm2546_vm7, %v6916_v54, -inf  ;;  %v2727_v40 = vsel %vm2546_vm7, %v6929_v60, -inf  ;;  %v2718_v24 = vsel %vm2546_vm7, %v6932_v7, -inf }
 0x394   : > { %v6943_v32 = vadd.f32 %v2401_v5, %v6709_v39  ;;  %v6956_v39 = vadd.f32 %v2417_v11, %v6723_v49 }
 0x396   : > { %v2736_v34 = vsel %vm2546_vm7, %v6956_v39, -inf }
 0x397   : > { %2710 = vmax.xlane.f32.xlu1 %v2709_v21  ;;  %2701 = vmax.xlane.f32.xlu0 %v2700_v43  ;;  %v6940_v21 = vadd.f32 %v2413_v56, %v6705_v2  ;;  %v2724_v43 = vsel %vm2546_vm7, %v6943_v32, -inf  ;;  %v2730_v2 = vsel %vm2546_vm7, %v6950_v25, -inf }
 0x399   : > { %v2733_v17 = vsel %vm2546_vm7, %v6940_v21, -inf }
 0x39b   : > { %2707 = vmax.xlane.f32.xlu0 %v2706_v61  ;;  %2716 = vmax.xlane.f32.xlu1 %v2715_v51 }
 0x39f   : > { %2713 = vmax.xlane.f32.xlu0 %v2712_v15  ;;  %2722 = vmax.xlane.f32.xlu1 %v2721_v48 }
 0x3a3   : > { %2728 = vmax.xlane.f32.xlu1 %v2727_v40  ;;  %2719 = vmax.xlane.f32.xlu0 %v2718_v24 }
 0x3a7   : > { %2734 = vmax.xlane.f32.xlu1 %v2733_v17  ;;  %2725 = vmax.xlane.f32.xlu0 %v2724_v43 }
 0x3ab   : > { %2731 = vmax.xlane.f32.xlu0 %v2730_v2 }
 0x3af   : > { %2737 = vmax.xlane.f32.xlu0 %v2736_v34 }
 0x3b3   : > { %v6960_v19 = vpop.xlane.xlu1 %2560  ;;  %v6962_v55 = vpop.xlane.xlu0 %2548 }
 0x3b4   : > { %v2739_v50 = vsub.f32 %v6164_v53, %v6962_v55  ;;  %v2743_v51 = vsub.f32 %v6158_v52, %v6960_v19  ;;  %vm3127_vm8 = vcmp.gt.f32.partialorder %v6960_v19, -1e+29  ;;  %vm3123_vm9 = vcmp.gt.f32.partialorder %v6962_v55, -1e+29 }
 0x3b6   : > { %v2803_v30 = vmul.f32 1.442695, %v2739_v50  ;;  %v2811_v15 = vmul.f32 1.442695, %v2743_v51  ;;  %v8023_v51 = vld [vmem:[#allocation21_spill] sm:$0xff] }
 0x3b7   : > { %v6966_v61 = vpop.xlane.xlu0 %2554  ;;  %v6970_v49 = vpop.xlane.xlu1 %2566 }
 0x3b8   : > { %v2741_v56 = vsub.f32 %v6207_v29, %v6966_v61  ;;  %4936 = vpow2.f32 %v2803_v30  ;;  %v2745_v9 = vsub.f32 %v6204_v28, %v6970_v49  ;;  %vm3129_vm10 = vcmp.gt.f32.partialorder %v6970_v49, -1e+29 }
 0x3b9   : > { %vm3125_vm11 = vcmp.gt.f32.partialorder %v6966_v61, -1e+29 }
 0x3ba   : > { %v2807_v5 = vmul.f32 1.442695, %v2741_v56  ;;  %v2815_v6 = vmul.f32 1.442695, %v2745_v9  ;;  %v8024_v56 = vld [vmem:[#allocation22_spill] sm:$0xff] }
 0x3bb   : > { %v6976_v48 = vpop.xlane.xlu0 %2557 }
 0x3bc   : > { %4938 = vpow2.f32 %v2807_v5  ;;  %v2742_v53 = vsub.f32 %v6244_v1, %v6976_v48  ;;  %vm3126_vm12 = vcmp.gt.f32.partialorder %v6976_v48, -1e+29 }
 0x3bd   : > { %4940 = vpow2.f32 %v2811_v15 }
 0x3be   : > { %v2809_v40 = vmul.f32 1.442695, %v2742_v53  ;;  %4942 = vpow2.f32 %v2815_v6 }
 0x3bf   : > { %v6980_v45 = vpop.xlane.xlu1 %2551 }
 0x3c0   : > { %8020 = vst [vmem:[#allocation42_spill] sm:$0xff] %v6980_v45  ;;  %v2740_v52 = vsub.f32 %v6268_v36, %v6980_v45 }
 0x3c2   : > { %v2805_v24 = vmul.f32 1.442695, %v2740_v52  ;;  %v6988_v17 = vpop.eup %4936 }
 0x3c3   : > { %v6984_v29 = vpop.xlane.xlu0 %2563  ;;  %8021 = vst [vmem:[#allocation43_spill] sm:$0xff] %v6988_v17  ;;  %v6990_v43 = vpop.xlane.xlu1 %2572  ;;  %v2931_v11 = vsel %vm2546_vm7, %v6988_v17, 0.0  ;;  %v8038_v17 = vld [vmem:[#allocation28_spill] sm:$0xff] }
 0x3c4   : > { %v2744_v28 = vsub.f32 %v6291_v8, %v6984_v29  ;;  %4944 = vpow2.f32 %v2805_v24  ;;  %v2747_v1 = vsub.f32 %v6296_v12, %v6990_v43  ;;  %2932 = vadd.xlane.f32.xlu1 %v2931_v11  ;;  %v8026_v24 = vld [vmem:[#allocation23_spill] sm:$0xff]  ;;  %vm3128_vm13 = vcmp.gt.f32.partialorder %v6984_v29, -1e+29 }
 0x3c5   : > { %4946 = vpow2.f32 %v2809_v40  ;;  %vm3131_vm14 = vcmp.gt.f32.partialorder %v6990_v43, -1e+29 }
 0x3c6   : > { %v2813_v36 = vmul.f32 1.442695, %v2744_v28  ;;  %v2819_v2 = vmul.f32 1.442695, %v2747_v1  ;;  %v6996_v34 = vpop.eup %4938  ;;  %v8027_v1 = vld [vmem:[#allocation24_spill] sm:$0xff] }
 0x3c7   : > { %8022 = vst [vmem:[#allocation44_spill] sm:$0xff] %v6996_v34  ;;  %v2937_v30 = vsel %vm2546_vm7, %v6996_v34, 0.0  ;;  %v7008_v9 = vpop.eup %4940 }
 0x3c8   : > { %4948 = vpow2.f32 %v2819_v2  ;;  %2938 = vadd.xlane.f32.xlu1 %v2937_v30  ;;  %v7014_v40 = vpop.eup %4942  ;;  %v2943_v2 = vsel %vm2546_vm7, %v7008_v9, 0.0 }
 0x3c9   : > { %v6998_v8 = vpop.xlane.xlu0 %2569  ;;  %4950 = vpow2.f32 %v2813_v36 }
 0x3ca   : > { %v2746_v12 = vsub.f32 %v8023_v51, %v6998_v8  ;;  %vm3130_vm15 = vcmp.gt.f32.partialorder %v6998_v8, -1e+29 }
 0x3cb   : > { %v7000_v50 = vpop.xlane.xlu1 %2578 }
 0x3cc   : > { %v2749_v5 = vsub.f32 %v8024_v56, %v7000_v50  ;;  %v2817_v15 = vmul.f32 1.442695, %v2746_v12  ;;  %2944 = vadd.xlane.f32.xlu1 %v2943_v2  ;;  %vm3133_vm2 = vcmp.gt.f32.partialorder %v7000_v50, -1e+29 }
 0x3cd   : > { %v7012_v52 = vpop.xlane.xlu0 %2575 }
 0x3ce   : > { %v2823_v53 = vmul.f32 1.442695, %v2749_v5  ;;  %8025 = vst [vmem:[#allocation21_spill] sm:$0xff] %v7012_v52  ;;  %4952 = vpow2.f32 %v2817_v15  ;;  %v2748_v11 = vsub.f32 %v8027_v1, %v7012_v52  ;;  %v7022_v36 = vpop.eup %4944  ;;  %v8032_v52 = vld [vmem:[#allocation26_spill] sm:$0xff]  ;;  %v8136_v29 = vld [vmem:[#allocation44_spill] sm:$0xff] }
 0x3cf   : > { %v7010_v6 = vpop.xlane.xlu1 %2584  ;;  %8028 = vst [vmem:[#allocation22_spill] sm:$0xff] %v7022_v36  ;;  %v2934_v12 = vsel %vm2546_vm7, %v7022_v36, 0.0  ;;  %v7026_v56 = vpop.eup %4946 }
 0x3d0   : > { %v2751_v28 = vsub.f32 %v8026_v24, %v7010_v6  ;;  %4954 = vpow2.f32 %v2823_v53  ;;  %v2821_v51 = vmul.f32 1.442695, %v2748_v11  ;;  %8029 = vst [vmem:[#allocation23_spill] sm:$0xff] %v7026_v56  ;;  %2935 = vadd.xlane.f32.xlu0 %v2934_v12  ;;  %v8031_v24 = vld [vmem:[#allocation25_spill] sm:$0xff]  ;;  %v2940_v34 = vsel %vm2546_vm7, %v7026_v56, 0.0 }
 0x3d1   : > { %v7030_v15 = vpop.xlane.xlu0 %2581  ;;  %vm3135_vm0 = vcmp.gt.f32.partialorder %v7010_v6, -1e+29 }
 0x3d2   : > { %v2827_v30 = vmul.f32 1.442695, %v2751_v28  ;;  %8030 = vst [vmem:[#allocation24_spill] sm:$0xff] %v7030_v15  ;;  %v2750_v53 = vsub.f32 %v8032_v52, %v7030_v15  ;;  %v2949_v28 = vsel %vm2546_vm7, %v7014_v40, 0.0  ;;  %v7038_v11 = vpop.eup %4948  ;;  %v8037_v52 = vld [vmem:[#allocation27_spill] sm:$0xff] }
 0x3d3   : > { %v7028_v5 = vpop.xlane.xlu1 %2590  ;;  %8033 = vst [vmem:[#allocation25_spill] sm:$0xff] %v7038_v11  ;;  %2950 = vadd.xlane.f32.xlu1 %v2949_v28  ;;  %v7042_v12 = vpop.eup %4950 }
 0x3d4   : > { %4956 = vpow2.f32 %v2827_v30  ;;  %v2753_v1 = vsub.f32 %v8031_v24, %v7028_v5  ;;  %v2825_v36 = vmul.f32 1.442695, %v2750_v53  ;;  %8034 = vst [vmem:[#allocation26_spill] sm:$0xff] %v7042_v12  ;;  %2941 = vadd.xlane.f32.xlu0 %v2940_v34  ;;  %v2946_v45 = vsel %vm2546_vm7, %v7042_v12, 0.0 }
 0x3d5   : > { %4958 = vpow2.f32 %v2821_v51  ;;  %v7044_v30 = vpop.xlane.xlu0 %2587  ;;  %vm3137_vm3 = vcmp.gt.f32.partialorder %v7028_v5, -1e+29 }
 0x3d6   : > { %v2831_v2 = vmul.f32 1.442695, %v2753_v1  ;;  %8035 = vst [vmem:[#allocation45_spill] sm:$0xff] %v7044_v30  ;;  %v2752_v15 = vsub.f32 %v8037_v52, %v7044_v30  ;;  %v2955_v1 = vsel %vm2546_vm7, %v7038_v11, 0.0 }
 0x3d7   : > { %v7046_v24 = vpop.xlane.xlu1 %2596  ;;  %2956 = vadd.xlane.f32.xlu1 %v2955_v1 }
 0x3d8   : > { %8036 = vst [vmem:[#allocation46_spill] sm:$0xff] %v7046_v24  ;;  %4960 = vpow2.f32 %v2831_v2  ;;  %v2755_v51 = vsub.f32 %v8038_v17, %v7046_v24  ;;  %v7054_v53 = vpop.eup %4952  ;;  %v2829_v28 = vmul.f32 1.442695, %v2752_v15  ;;  %2947 = vadd.xlane.f32.xlu0 %v2946_v45  ;;  %v8043_v17 = vld [vmem:[#allocation30_spill] sm:$0xff] }
 0x3d9   : > { %4962 = vpow2.f32 %v2825_v36  ;;  %8039 = vst [vmem:[#allocation27_spill] sm:$0xff] %v7054_v53  ;;  %v7060_v2 = vpop.xlane.xlu0 %2593  ;;  %v8044_v36 = vld [vmem:[#allocation29_spill] sm:$0xff]  ;;  %v2952_v11 = vsel %vm2546_vm7, %v7054_v53, 0.0 }
 0x3da   : > { %v2835_v56 = vmul.f32 1.442695, %v2755_v51  ;;  %v7058_v34 = vpop.eup %4954  ;;  %8041 = vst [vmem:[#allocation47_spill] sm:$0xff] %v7060_v2  ;;  %4964 = vpow2.f32 %v2829_v28  ;;  %v2754_v24 = vsub.f32 %v8043_v17, %v7060_v2 }
 0x3db   : > { %8040 = vst [vmem:[#allocation28_spill] sm:$0xff] %v7058_v34  ;;  %v7062_v52 = vpop.xlane.xlu1 %2602  ;;  %v2961_v15 = vsel %vm2546_vm7, %v7058_v34, 0.0 }
 0x3dc   : > { %8042 = vst [vmem:[#allocation48_spill] sm:$0xff] %v7062_v52  ;;  %v2757_v1 = vsub.f32 %v8044_v36, %v7062_v52  ;;  %4966 = vpow2.f32 %v2835_v56  ;;  %v2833_v30 = vmul.f32 1.442695, %v2754_v24  ;;  %2962 = vadd.xlane.f32.xlu1 %v2961_v15  ;;  %2953 = vadd.xlane.f32.xlu0 %v2952_v11  ;;  %v8049_v56 = vld [vmem:[#allocation31_spill] sm:$0xff]  ;;  %v8050_v52 = vld [vmem:[#allocation32_spill] sm:$0xff] }
 0x3dd   : > { %v7078_v17 = vpop.xlane.xlu0 %2599 }
 0x3de   : > { %v7070_v51 = vpop.eup %4956  ;;  %v2839_v12 = vmul.f32 1.442695, %v2757_v1  ;;  %8048 = vst [vmem:[#allocation50_spill] sm:$0xff] %v7078_v17  ;;  %4968 = vpow2.f32 %v2833_v30  ;;  %v2756_v2 = vsub.f32 %v8050_v52, %v7078_v17  ;;  %v8056_v17 = vld [vmem:[#allocation34_spill] sm:$0xff] }
 0x3df   : > { %8045 = vst [vmem:[#allocation30_spill] sm:$0xff] %v7070_v51  ;;  %v7074_v45 = vpop.eup %4958  ;;  %v7076_v28 = vpop.xlane.xlu1 %2608  ;;  %v2967_v24 = vsel %vm2546_vm7, %v7070_v51, 0.0 }
 0x3e0   : > { %8046 = vst [vmem:[#allocation29_spill] sm:$0xff] %v7074_v45  ;;  %8047 = vst [vmem:[#allocation49_spill] sm:$0xff] %v7076_v28  ;;  %v2759_v36 = vsub.f32 %v8049_v56, %v7076_v28  ;;  %4970 = vpow2.f32 %v2839_v12  ;;  %v2837_v53 = vmul.f32 1.442695, %v2756_v2  ;;  %2968 = vadd.xlane.f32.xlu1 %v2967_v24  ;;  %v2958_v34 = vsel %vm2546_vm7, %v7074_v45, 0.0  ;;  %v8055_v12 = vld [vmem:[#allocation33_spill] sm:$0xff] }
 0x3e1   : > { %2959 = vadd.xlane.f32.xlu0 %v2958_v34 }
 0x3e2   : > { %v7086_v1 = vpop.eup %4960  ;;  %v2843_v15 = vmul.f32 1.442695, %v2759_v36  ;;  %v7094_v56 = vpop.xlane.xlu0 %2605 }
 0x3e3   : > { %8051 = vst [vmem:[#allocation31_spill] sm:$0xff] %v7086_v1  ;;  %v7090_v11 = vpop.eup %4962  ;;  %v7092_v30 = vpop.xlane.xlu1 %2614  ;;  %8054 = vst [vmem:[#allocation52_spill] sm:$0xff] %v7094_v56  ;;  %v2758_v28 = vsub.f32 %v8056_v17, %v7094_v56  ;;  %v2973_v2 = vsel %vm2546_vm7, %v7086_v1, 0.0  ;;  %v8061_v56 = vld [vmem:[#allocation36_spill] sm:$0xff] }
 0x3e4   : > { %8052 = vst [vmem:[#allocation32_spill] sm:$0xff] %v7090_v11  ;;  %8053 = vst [vmem:[#allocation51_spill] sm:$0xff] %v7092_v30  ;;  %4972 = vpow2.f32 %v2843_v15  ;;  %v2761_v52 = vsub.f32 %v8055_v12, %v7092_v30  ;;  %v7102_v36 = vpop.eup %4964  ;;  %2974 = vadd.xlane.f32.xlu1 %v2973_v2  ;;  %v2964_v51 = vsel %vm2546_vm7, %v7090_v11, 0.0 }
 0x3e5   : > { %4974 = vpow2.f32 %v2837_v53  ;;  %v2841_v45 = vmul.f32 1.442695, %v2758_v28  ;;  %2965 = vadd.xlane.f32.xlu0 %v2964_v51  ;;  %v8060_v53 = vld [vmem:[#allocation35_spill] sm:$0xff]  ;;  %v2970_v1 = vsel %vm2546_vm7, %v7102_v36, 0.0 }
 0x3e6   : > { %v2847_v24 = vmul.f32 1.442695, %v2761_v52  ;;  %v7106_v34 = vpop.eup %4966  ;;  %v7108_v15 = vpop.xlane.xlu0 %2611 }
 0x3e7   : > { %8057 = vst [vmem:[#allocation33_spill] sm:$0xff] %v7106_v34  ;;  %8058 = vst [vmem:[#allocation34_spill] sm:$0xff] %v7108_v15  ;;  %v7110_v12 = vpop.xlane.xlu1 %2620  ;;  %v2760_v17 = vsub.f32 %v8060_v53, %v7108_v15  ;;  %v2979_v28 = vsel %vm2546_vm7, %v7106_v34, 0.0 }
 0x3e8   : > { %8059 = vst [vmem:[#allocation53_spill] sm:$0xff] %v7110_v12  ;;  %4976 = vpow2.f32 %v2847_v24  ;;  %v2763_v30 = vsub.f32 %v8061_v56, %v7110_v12  ;;  %v7118_v52 = vpop.eup %4968  ;;  %2980 = vadd.xlane.f32.xlu1 %v2979_v28 }
 0x3e9   : > { %4978 = vpow2.f32 %v2841_v45  ;;  %v2845_v2 = vmul.f32 1.442695, %v2760_v17  ;;  %2971 = vadd.xlane.f32.xlu0 %v2970_v1  ;;  %v8065_v45 = vld [vmem:[#allocation37_spill] sm:$0xff]  ;;  %v2976_v15 = vsel %vm2546_vm7, %v7118_v52, 0.0 }
 0x3ea   : > { %v2851_v11 = vmul.f32 1.442695, %v2763_v30  ;;  %v7122_v51 = vpop.eup %4970  ;;  %v7124_v24 = vpop.xlane.xlu0 %2617  ;;  %v8134_v43 = vld [vmem:[#allocation31_spill] sm:$0xff] }
 0x3eb   : > { %8062 = vst [vmem:[#allocation35_spill] sm:$0xff] %v7122_v51  ;;  %8063 = vst [vmem:[#allocation36_spill] sm:$0xff] %v7124_v24  ;;  %v7126_v53 = vpop.xlane.xlu1 %2626  ;;  %4980 = vpow2.f32 %v2845_v2  ;;  %v2762_v56 = vsub.f32 %v8065_v45, %v7124_v24  ;;  %v2985_v30 = vsel %vm2546_vm7, %v7122_v51, 0.0 }
 0x3ec   : > { %8064 = vst [vmem:[#allocation54_spill] sm:$0xff] %v7126_v53  ;;  %v2765_v34 = vsub.f32 %v6615_v38, %v7126_v53  ;;  %4982 = vpow2.f32 %v2851_v11  ;;  %2986 = vadd.xlane.f32.xlu1 %v2985_v30  ;;  %v8070_v11 = vld [vmem:[#allocation38_spill] sm:$0xff] }
 0x3ed   : > { %v2849_v28 = vmul.f32 1.442695, %v2762_v56  ;;  %2977 = vadd.xlane.f32.xlu0 %v2976_v15 }
 0x3ee   : > { %v7134_v17 = vpop.eup %4972  ;;  %v2855_v12 = vmul.f32 1.442695, %v2765_v34 }
 0x3ef   : > { %8066 = vst [vmem:[#allocation37_spill] sm:$0xff] %v7134_v17  ;;  %v7138_v1 = vpop.eup %4974  ;;  %4984 = vpow2.f32 %v2849_v28  ;;  %v2991_v34 = vsel %vm2546_vm7, %v7134_v17, 0.0 }
 0x3f0   : > { %8067 = vst [vmem:[#allocation55_spill] sm:$0xff] %v7138_v1  ;;  %v7140_v2 = vpop.xlane.xlu1 %2632  ;;  %v7142_v45 = vpop.xlane.xlu0 %2623  ;;  %4986 = vpow2.f32 %v2855_v12  ;;  %2992 = vadd.xlane.f32.xlu1 %v2991_v34  ;;  %v2982_v24 = vsel %vm2546_vm7, %v7138_v1, 0.0  ;;  %v8074_v12 = vld [vmem:[#allocation39_spill] sm:$0xff] }
 0x3f1   : > { %8068 = vst [vmem:[#allocation56_spill] sm:$0xff] %v7140_v2  ;;  %8069 = vst [vmem:[#allocation57_spill] sm:$0xff] %v7142_v45  ;;  %v2767_v38 = vsub.f32 %v6673_v13, %v7140_v2  ;;  %v2764_v51 = vsub.f32 %v8070_v11, %v7142_v45  ;;  %2983 = vadd.xlane.f32.xlu0 %v2982_v24  ;;  %v8075_v45 = vld [vmem:[#allocation40_spill] sm:$0xff] }
 0x3f2   : > { %v7150_v56 = vpop.eup %4976 }
 0x3f3   : > { %v2859_v30 = vmul.f32 1.442695, %v2767_v38  ;;  %v2853_v53 = vmul.f32 1.442695, %v2764_v51  ;;  %v7154_v15 = vpop.eup %4978  ;;  %v2997_v51 = vsel %vm2546_vm7, %v7150_v56, 0.0 }
 0x3f4   : > { %8071 = vst [vmem:[#allocation38_spill] sm:$0xff] %v7154_v15  ;;  %v7156_v28 = vpop.xlane.xlu1 %2638  ;;  %v7158_v13 = vpop.xlane.xlu0 %2629  ;;  %2998 = vadd.xlane.f32.xlu1 %v2997_v51  ;;  %v2988_v2 = vsel %vm2546_vm7, %v7154_v15, 0.0 }
 0x3f5   : > { %8072 = vst [vmem:[#allocation58_spill] sm:$0xff] %v7156_v28  ;;  %8073 = vst [vmem:[#allocation59_spill] sm:$0xff] %v7158_v13  ;;  %4988 = vpow2.f32 %v2859_v30  ;;  %v2769_v11 = vsub.f32 %v8074_v12, %v7156_v28  ;;  %v2766_v17 = vsub.f32 %v8075_v45, %v7158_v13  ;;  %v7166_v38 = vpop.eup %4980  ;;  %2989 = vadd.xlane.f32.xlu0 %v2988_v2 }
 0x3f6   : > { %4990 = vpow2.f32 %v2853_v53  ;;  %8076 = vst [vmem:[#allocation39_spill] sm:$0xff] %v7166_v38  ;;  %v7170_v24 = vpop.eup %4982  ;;  %v8078_v53 = vld [vmem:[#allocation41_spill] sm:$0xff]  ;;  %v2994_v28 = vsel %vm2546_vm7, %v7166_v38, 0.0 }
 0x3f7   : > { %v2863_v34 = vmul.f32 1.442695, %v2769_v11  ;;  %v2857_v1 = vmul.f32 1.442695, %v2766_v17  ;;  %v3003_v17 = vsel %vm2546_vm7, %v7170_v24, 0.0 }
 0x3f8   : > { %v7172_v30 = vpop.xlane.xlu0 %2635  ;;  %v7174_v12 = vpop.xlane.xlu1 %2644  ;;  %3004 = vadd.xlane.f32.xlu1 %v3003_v17 }
 0x3f9   : > { %8077 = vst [vmem:[#allocation40_spill] sm:$0xff] %v7174_v12  ;;  %4992 = vpow2.f32 %v2863_v34  ;;  %v2768_v45 = vsub.f32 %v8078_v53, %v7172_v30  ;;  %v2771_v13 = vsub.f32 %v6736_v18, %v7174_v12  ;;  %v7182_v11 = vpop.eup %4984  ;;  %2995 = vadd.xlane.f32.xlu0 %v2994_v28 }
 0x3fa   : > { %4994 = vpow2.f32 %v2857_v1  ;;  %v7186_v2 = vpop.eup %4986  ;;  %v3000_v38 = vsel %vm2546_vm7, %v7182_v11, 0.0 }
 0x3fb   : > { %v2861_v51 = vmul.f32 1.442695, %v2768_v45  ;;  %v2867_v15 = vmul.f32 1.442695, %v2771_v13  ;;  %v3009_v13 = vsel %vm2546_vm7, %v7186_v2, 0.0 }
 0x3fc   : > { %v7188_v34 = vpop.xlane.xlu0 %2641  ;;  %v7190_v53 = vpop.xlane.xlu1 %2650  ;;  %3010 = vadd.xlane.f32.xlu1 %v3009_v13 }
 0x3fd   : > { %8079 = vst [vmem:[#allocation41_spill] sm:$0xff] %v7188_v34  ;;  %8080 = vst [vmem:[#allocation60_spill] sm:$0xff] %v7190_v53  ;;  %4996 = vpow2.f32 %v2861_v51  ;;  %v2770_v18 = vsub.f32 %v6749_v20, %v7188_v34  ;;  %v2773_v1 = vsub.f32 %v6752_v31, %v7190_v53  ;;  %3001 = vadd.xlane.f32.xlu0 %v3000_v38 }
 0x3fe   : > { %4998 = vpow2.f32 %v2867_v15 }
 0x3ff   : > { %v7198_v45 = vpop.eup %4988  ;;  %v2865_v17 = vmul.f32 1.442695, %v2770_v18  ;;  %v2871_v12 = vmul.f32 1.442695, %v2773_v1 }
 0x400   : > { %v7202_v28 = vpop.eup %4990  ;;  %v7204_v51 = vpop.xlane.xlu1 %2656  ;;  %v3015_v18 = vsel %vm2546_vm7, %v7198_v45, 0.0 }
 0x401   : > { %8081 = vst [vmem:[#allocation61_spill] sm:$0xff] %v7204_v51  ;;  %v7206_v20 = vpop.xlane.xlu0 %2647  ;;  %5000 = vpow2.f32 %v2865_v17  ;;  %v2775_v31 = vsub.f32 %v6763_v44, %v7204_v51  ;;  %3016 = vadd.xlane.f32.xlu1 %v3015_v18  ;;  %v3006_v34 = vsel %vm2546_vm7, %v7202_v28, 0.0 }
 0x402   : > { %8082 = vst [vmem:[#allocation62_spill] sm:$0xff] %v7206_v20  ;;  %v2772_v15 = vsub.f32 %v6766_v58, %v7206_v20  ;;  %5002 = vpow2.f32 %v2871_v12  ;;  %3007 = vadd.xlane.f32.xlu0 %v3006_v34 }
 0x403   : > { %v7214_v1 = vpop.eup %4992  ;;  %v2875_v13 = vmul.f32 1.442695, %v2775_v31 }
 0x404   : > { %v2869_v53 = vmul.f32 1.442695, %v2772_v15  ;;  %v7218_v38 = vpop.eup %4994  ;;  %v7220_v17 = vpop.xlane.xlu1 %2662  ;;  %v3021_v31 = vsel %vm2546_vm7, %v7214_v1, 0.0 }
 0x405   : > { %8083 = vst [vmem:[#allocation63_spill] sm:$0xff] %v7220_v17  ;;  %v7222_v44 = vpop.xlane.xlu0 %2653  ;;  %5004 = vpow2.f32 %v2875_v13  ;;  %v2777_v58 = vsub.f32 %v6776_v37, %v7220_v17  ;;  %3022 = vadd.xlane.f32.xlu1 %v3021_v31  ;;  %v3012_v51 = vsel %vm2546_vm7, %v7218_v38, 0.0 }
 0x406   : > { %8084 = vst [vmem:[#allocation64_spill] sm:$0xff] %v7222_v44  ;;  %v2774_v12 = vsub.f32 %v6779_v26, %v7222_v44  ;;  %5006 = vpow2.f32 %v2869_v53  ;;  %3013 = vadd.xlane.f32.xlu0 %v3012_v51 }
 0x407   : > { %v7230_v15 = vpop.eup %4996  ;;  %v2879_v18 = vmul.f32 1.442695, %v2777_v58 }
 0x408   : > { %v2873_v20 = vmul.f32 1.442695, %v2774_v12  ;;  %v7234_v34 = vpop.eup %4998  ;;  %v7238_v37 = vpop.xlane.xlu1 %2668  ;;  %v3018_v17 = vsel %vm2546_vm7, %v7230_v15, 0.0 }
 0x409   : > { %v7236_v13 = vpop.xlane.xlu0 %2659  ;;  %8086 = vst [vmem:[#allocation66_spill] sm:$0xff] %v7238_v37  ;;  %5008 = vpow2.f32 %v2879_v18  ;;  %v2779_v53 = vsub.f32 %v6793_v47, %v7238_v37  ;;  %v3027_v58 = vsel %vm2546_vm7, %v7234_v34, 0.0 }
 0x40a   : > { %8085 = vst [vmem:[#allocation65_spill] sm:$0xff] %v7236_v13  ;;  %v2776_v26 = vsub.f32 %v6790_v62, %v7236_v13  ;;  %5010 = vpow2.f32 %v2873_v20  ;;  %3028 = vadd.xlane.f32.xlu1 %v3027_v58  ;;  %3019 = vadd.xlane.f32.xlu0 %v3018_v17 }
 0x40b   : > { %v7246_v12 = vpop.eup %5000  ;;  %v2883_v44 = vmul.f32 1.442695, %v2779_v53 }
 0x40c   : > { %v2877_v31 = vmul.f32 1.442695, %v2776_v26  ;;  %v7250_v51 = vpop.eup %5002  ;;  %v7254_v62 = vpop.xlane.xlu1 %2674  ;;  %v3024_v13 = vsel %vm2546_vm7, %v7246_v12, 0.0 }
 0x40d   : > { %v7252_v18 = vpop.xlane.xlu0 %2665  ;;  %8088 = vst [vmem:[#allocation68_spill] sm:$0xff] %v7254_v62  ;;  %v2781_v20 = vsub.f32 %v6809_v14, %v7254_v62  ;;  %v3033_v26 = vsel %vm2546_vm7, %v7250_v51, 0.0 }
 0x40e   : > { %8087 = vst [vmem:[#allocation67_spill] sm:$0xff] %v7252_v18  ;;  %5012 = vpow2.f32 %v2877_v31  ;;  %v2778_v47 = vsub.f32 %v6806_v0, %v7252_v18  ;;  %3034 = vadd.xlane.f32.xlu1 %v3033_v26  ;;  %3025 = vadd.xlane.f32.xlu0 %v3024_v13 }
 0x40f   : > { %5014 = vpow2.f32 %v2883_v44  ;;  %v7262_v53 = vpop.eup %5004  ;;  %v2887_v37 = vmul.f32 1.442695, %v2781_v20 }
 0x410   : > { %v2881_v58 = vmul.f32 1.442695, %v2778_v47  ;;  %v7266_v17 = vpop.eup %5006  ;;  %v7268_v31 = vpop.xlane.xlu1 %2680  ;;  %v3039_v47 = vsel %vm2546_vm7, %v7262_v53, 0.0 }
 0x411   : > { %8089 = vst [vmem:[#allocation69_spill] sm:$0xff] %v7268_v31  ;;  %v7270_v0 = vpop.xlane.xlu0 %2671  ;;  %v2783_v14 = vsub.f32 %v6820_v10, %v7268_v31  ;;  %v3030_v18 = vsel %vm2546_vm7, %v7266_v17, 0.0 }
 0x412   : > { %8090 = vst [vmem:[#allocation70_spill] sm:$0xff] %v7270_v0  ;;  %5016 = vpow2.f32 %v2881_v58  ;;  %v2780_v44 = vsub.f32 %v6823_v41, %v7270_v0  ;;  %3040 = vadd.xlane.f32.xlu1 %v3039_v47  ;;  %3031 = vadd.xlane.f32.xlu0 %v3030_v18 }
 0x413   : > { %5018 = vpow2.f32 %v2887_v37  ;;  %v7278_v20 = vpop.eup %5008  ;;  %v2891_v26 = vmul.f32 1.442695, %v2783_v14 }
 0x414   : > { %v2885_v62 = vmul.f32 1.442695, %v2780_v44  ;;  %v7282_v13 = vpop.eup %5010  ;;  %v7284_v58 = vpop.xlane.xlu1 %2686  ;;  %v3045_v14 = vsel %vm2546_vm7, %v7278_v20, 0.0 }
 0x415   : > { %8091 = vst [vmem:[#allocation71_spill] sm:$0xff] %v7284_v58  ;;  %v7286_v10 = vpop.xlane.xlu0 %2677  ;;  %5020 = vpow2.f32 %v2891_v26  ;;  %v2785_v41 = vsub.f32 %v6833_v46, %v7284_v58  ;;  %v3036_v31 = vsel %vm2546_vm7, %v7282_v13, 0.0 }
 0x416   : > { %8092 = vst [vmem:[#allocation72_spill] sm:$0xff] %v7286_v10  ;;  %v2782_v37 = vsub.f32 %v6836_v3, %v7286_v10  ;;  %5022 = vpow2.f32 %v2885_v62  ;;  %3046 = vadd.xlane.f32.xlu1 %v3045_v14  ;;  %3037 = vadd.xlane.f32.xlu0 %v3036_v31 }
 0x417   : > { %v2895_v47 = vmul.f32 1.442695, %v2785_v41 }
 0x418   : > { %v7294_v44 = vpop.eup %5012  ;;  %v2889_v0 = vmul.f32 1.442695, %v2782_v37  ;;  %v7302_v46 = vpop.xlane.xlu1 %2692 }
 0x419   : > { %v7298_v18 = vpop.eup %5014  ;;  %v7300_v26 = vpop.xlane.xlu0 %2683  ;;  %8094 = vst [vmem:[#allocation74_spill] sm:$0xff] %v7302_v46  ;;  %5024 = vpow2.f32 %v2895_v47  ;;  %v2787_v62 = vsub.f32 %v6850_v57, %v7302_v46  ;;  %v3042_v58 = vsel %vm2546_vm7, %v7294_v44, 0.0 }
 0x41a   : > { %8093 = vst [vmem:[#allocation73_spill] sm:$0xff] %v7300_v26  ;;  %v2784_v3 = vsub.f32 %v6847_v59, %v7300_v26  ;;  %5026 = vpow2.f32 %v2889_v0  ;;  %v3051_v41 = vsel %vm2546_vm7, %v7298_v18, 0.0  ;;  %3043 = vadd.xlane.f32.xlu0 %v3042_v58 }
 0x41b   : > { %v2899_v10 = vmul.f32 1.442695, %v2787_v62  ;;  %3052 = vadd.xlane.f32.xlu1 %v3051_v41 }
 0x41c   : > { %v7310_v37 = vpop.eup %5016  ;;  %v2893_v14 = vmul.f32 1.442695, %v2784_v3  ;;  %v7318_v59 = vpop.xlane.xlu1 %2698 }
 0x41d   : > { %v7314_v31 = vpop.eup %5018  ;;  %v7316_v47 = vpop.xlane.xlu0 %2689  ;;  %8096 = vst [vmem:[#allocation76_spill] sm:$0xff] %v7318_v59  ;;  %v2789_v0 = vsub.f32 %v6866_v63, %v7318_v59  ;;  %v3048_v26 = vsel %vm2546_vm7, %v7310_v37, 0.0 }
 0x41e   : > { %8095 = vst [vmem:[#allocation75_spill] sm:$0xff] %v7316_v47  ;;  %5028 = vpow2.f32 %v2893_v14  ;;  %v2786_v57 = vsub.f32 %v6863_v33, %v7316_v47  ;;  %v3057_v3 = vsel %vm2546_vm7, %v7314_v31, 0.0  ;;  %3049 = vadd.xlane.f32.xlu0 %v3048_v26 }
 0x41f   : > { %5030 = vpow2.f32 %v2899_v10  ;;  %v7326_v62 = vpop.eup %5020  ;;  %v2903_v46 = vmul.f32 1.442695, %v2789_v0  ;;  %3058 = vadd.xlane.f32.xlu1 %v3057_v3 }
 0x420   : > { %v2897_v41 = vmul.f32 1.442695, %v2786_v57  ;;  %v7330_v58 = vpop.eup %5022  ;;  %v7332_v14 = vpop.xlane.xlu1 %2704  ;;  %v3063_v57 = vsel %vm2546_vm7, %v7326_v62, 0.0 }
 0x421   : > { %8097 = vst [vmem:[#allocation77_spill] sm:$0xff] %v7332_v14  ;;  %v7334_v33 = vpop.xlane.xlu0 %2695  ;;  %v2791_v63 = vsub.f32 %v6877_v35, %v7332_v14  ;;  %v3054_v47 = vsel %vm2546_vm7, %v7330_v58, 0.0 }
 0x422   : > { %8098 = vst [vmem:[#allocation78_spill] sm:$0xff] %v7334_v33  ;;  %5032 = vpow2.f32 %v2897_v41  ;;  %v2788_v10 = vsub.f32 %v6880_v23, %v7334_v33  ;;  %3055 = vadd.xlane.f32.xlu0 %v3054_v47 }
 0x423   : > { %5034 = vpow2.f32 %v2903_v46  ;;  %v7342_v0 = vpop.eup %5024  ;;  %v2907_v3 = vmul.f32 1.442695, %v2791_v63  ;;  %3064 = vadd.xlane.f32.xlu1 %v3063_v57 }
 0x424   : > { %v2901_v59 = vmul.f32 1.442695, %v2788_v10  ;;  %v7346_v26 = vpop.eup %5026  ;;  %v7348_v41 = vpop.xlane.xlu1 %2710  ;;  %v3069_v63 = vsel %vm2546_vm7, %v7342_v0, 0.0 }
 0x425   : > { %8099 = vst [vmem:[#allocation79_spill] sm:$0xff] %v7346_v26  ;;  %8100 = vst [vmem:[#allocation80_spill] sm:$0xff] %v7348_v41  ;;  %v7350_v35 = vpop.xlane.xlu0 %2701  ;;  %5036 = vpow2.f32 %v2907_v3  ;;  %v2793_v23 = vsub.f32 %v6890_v22, %v7348_v41  ;;  %v3060_v14 = vsel %vm2546_vm7, %v7346_v26, 0.0 }
 0x426   : > { %8101 = vst [vmem:[#allocation81_spill] sm:$0xff] %v7350_v35  ;;  %v2790_v46 = vsub.f32 %v6893_v42, %v7350_v35  ;;  %5038 = vpow2.f32 %v2901_v59  ;;  %3061 = vadd.xlane.f32.xlu0 %v3060_v14 }
 0x427   : > { %v2911_v57 = vmul.f32 1.442695, %v2793_v23  ;;  %3070 = vadd.xlane.f32.xlu1 %v3069_v63 }
 0x428   : > { %v7358_v10 = vpop.eup %5028  ;;  %v2905_v33 = vmul.f32 1.442695, %v2790_v46  ;;  %v7366_v22 = vpop.xlane.xlu1 %2716 }
 0x429   : > { %8102 = vst [vmem:[#allocation82_spill] sm:$0xff] %v7358_v10  ;;  %v7362_v47 = vpop.eup %5030  ;;  %v7364_v3 = vpop.xlane.xlu0 %2707  ;;  %8105 = vst [vmem:[#allocation85_spill] sm:$0xff] %v7366_v22  ;;  %5040 = vpow2.f32 %v2911_v57  ;;  %v2795_v59 = vsub.f32 %v6907_v16, %v7366_v22  ;;  %v3066_v41 = vsel %vm2546_vm7, %v7358_v10, 0.0  ;;  %v8143_v10 = vld [vmem:[#allocation24_spill] sm:$0xff] }
 0x42a   : > { %8103 = vst [vmem:[#allocation83_spill] sm:$0xff] %v7362_v47  ;;  %8104 = vst [vmem:[#allocation84_spill] sm:$0xff] %v7364_v3  ;;  %v2792_v42 = vsub.f32 %v6904_v4, %v7364_v3  ;;  %5042 = vpow2.f32 %v2905_v33  ;;  %v3075_v23 = vsel %vm2546_vm7, %v7362_v47, 0.0  ;;  %3067 = vadd.xlane.f32.xlu0 %v3066_v41  ;;  %v8139_v47 = vld [vmem:[#allocation23_spill] sm:$0xff] }
 0x42b   : > { %v2915_v35 = vmul.f32 1.442695, %v2795_v59  ;;  %3076 = vadd.xlane.f32.xlu1 %v3075_v23 }
 0x42c   : > { %v7374_v46 = vpop.eup %5032  ;;  %v2909_v63 = vmul.f32 1.442695, %v2792_v42  ;;  %v7382_v4 = vpop.xlane.xlu1 %2722 }
 0x42d   : > { %8106 = vst [vmem:[#allocation86_spill] sm:$0xff] %v7374_v46  ;;  %v7378_v14 = vpop.eup %5034  ;;  %v7380_v57 = vpop.xlane.xlu0 %2713  ;;  %8109 = vst [vmem:[#allocation89_spill] sm:$0xff] %v7382_v4  ;;  %v2797_v33 = vsub.f32 %v6919_v27, %v7382_v4  ;;  %v3072_v3 = vsel %vm2546_vm7, %v7374_v46, 0.0  ;;  %v8140_v46 = vld [vmem:[#allocation26_spill] sm:$0xff] }
 0x42e   : > { %8107 = vst [vmem:[#allocation87_spill] sm:$0xff] %v7378_v14  ;;  %8108 = vst [vmem:[#allocation88_spill] sm:$0xff] %v7380_v57  ;;  %5044 = vpow2.f32 %v2909_v63  ;;  %v2794_v16 = vsub.f32 %v6916_v54, %v7380_v57  ;;  %v3081_v42 = vsel %vm2546_vm7, %v7378_v14, 0.0  ;;  %3073 = vadd.xlane.f32.xlu0 %v3072_v3 }
 0x42f   : > { %5046 = vpow2.f32 %v2915_v35  ;;  %v7390_v59 = vpop.eup %5036  ;;  %v2919_v22 = vmul.f32 1.442695, %v2797_v33  ;;  %3082 = vadd.xlane.f32.xlu1 %v3081_v42 }
 0x430   : > { %8110 = vst [vmem:[#allocation90_spill] sm:$0xff] %v7390_v59  ;;  %v2913_v23 = vmul.f32 1.442695, %v2794_v16  ;;  %v7394_v41 = vpop.eup %5038  ;;  %v7396_v63 = vpop.xlane.xlu1 %2728  ;;  %v3087_v16 = vsel %vm2546_vm7, %v7390_v59, 0.0 }
 0x431   : > { %8111 = vst [vmem:[#allocation91_spill] sm:$0xff] %v7394_v41  ;;  %8112 = vst [vmem:[#allocation92_spill] sm:$0xff] %v7396_v63  ;;  %v7398_v54 = vpop.xlane.xlu0 %2719  ;;  %v2799_v27 = vsub.f32 %v6929_v60, %v7396_v63  ;;  %v3078_v57 = vsel %vm2546_vm7, %v7394_v41, 0.0 }
 0x432   : > { %8113 = vst [vmem:[#allocation93_spill] sm:$0xff] %v7398_v54  ;;  %5048 = vpow2.f32 %v2913_v23  ;;  %v2796_v35 = vsub.f32 %v6932_v7, %v7398_v54  ;;  %3079 = vadd.xlane.f32.xlu0 %v3078_v57 }
 0x433   : > { %5050 = vpow2.f32 %v2919_v22  ;;  %v7406_v33 = vpop.eup %5040  ;;  %v2923_v42 = vmul.f32 1.442695, %v2799_v27  ;;  %3088 = vadd.xlane.f32.xlu1 %v3087_v16 }
 0x434   : > { %8114 = vst [vmem:[#allocation94_spill] sm:$0xff] %v7406_v33  ;;  %v2917_v4 = vmul.f32 1.442695, %v2796_v35  ;;  %v7410_v3 = vpop.eup %5042  ;;  %v7412_v23 = vpop.xlane.xlu1 %2734  ;;  %v3093_v27 = vsel %vm2546_vm7, %v7406_v33, 0.0 }
 0x435   : > { %8115 = vst [vmem:[#allocation95_spill] sm:$0xff] %v7410_v3  ;;  %8116 = vst [vmem:[#allocation96_spill] sm:$0xff] %v7412_v23  ;;  %v7414_v60 = vpop.xlane.xlu0 %2725  ;;  %5052 = vpow2.f32 %v2923_v42  ;;  %v2801_v7 = vsub.f32 %v6940_v21, %v7412_v23  ;;  %v3084_v63 = vsel %vm2546_vm7, %v7410_v3, 0.0 }
 0x436   : > { %8117 = vst [vmem:[#allocation97_spill] sm:$0xff] %v7414_v60  ;;  %v2798_v22 = vsub.f32 %v6943_v32, %v7414_v60  ;;  %5054 = vpow2.f32 %v2917_v4  ;;  %3085 = vadd.xlane.f32.xlu0 %v3084_v63 }
 0x437   : > { %v2927_v16 = vmul.f32 1.442695, %v2801_v7  ;;  %3094 = vadd.xlane.f32.xlu1 %v3093_v27 }
 0x438   : > { %v7422_v35 = vpop.eup %5044  ;;  %v2921_v54 = vmul.f32 1.442695, %v2798_v22 }
 0x439   : > { %8118 = vst [vmem:[#allocation98_spill] sm:$0xff] %v7422_v35  ;;  %v7426_v57 = vpop.eup %5046  ;;  %v7428_v42 = vpop.xlane.xlu0 %2731  ;;  %5056 = vpow2.f32 %v2927_v16  ;;  %v3090_v22 = vsel %vm2546_vm7, %v7422_v35, 0.0 }
 0x43a   : > { %8119 = vst [vmem:[#allocation99_spill] sm:$0xff] %v7426_v57  ;;  %8120 = vst [vmem:[#allocation100_spill] sm:$0xff] %v7428_v42  ;;  %v2800_v21 = vsub.f32 %v6950_v25, %v7428_v42  ;;  %5058 = vpow2.f32 %v2921_v54  ;;  %v3099_v32 = vsel %vm2546_vm7, %v7426_v57, 0.0  ;;  %3091 = vadd.xlane.f32.xlu0 %v3090_v22 }
 0x43b   : > { %3100 = vadd.xlane.f32.xlu1 %v3099_v32 }
 0x43c   : > { %v7434_v4 = vpop.eup %5048  ;;  %v2925_v7 = vmul.f32 1.442695, %v2800_v21 }
 0x43d   : > { %8121 = vst [vmem:[#allocation101_spill] sm:$0xff] %v7434_v4  ;;  %v7438_v27 = vpop.eup %5050  ;;  %v7440_v60 = vpop.xlane.xlu0 %2737  ;;  %v3096_v21 = vsel %vm2546_vm7, %v7434_v4, 0.0 }
 0x43e   : > { %8122 = vst [vmem:[#allocation102_spill] sm:$0xff] %v7438_v27  ;;  %8123 = vst [vmem:[#allocation103_spill] sm:$0xff] %v7440_v60  ;;  %v2802_v63 = vsub.f32 %v6956_v39, %v7440_v60  ;;  %5060 = vpow2.f32 %v2925_v7  ;;  %v3105_v25 = vsel %vm2546_vm7, %v7438_v27, 0.0  ;;  %3097 = vadd.xlane.f32.xlu0 %v3096_v21 }
 0x43f   : > { %v7446_v54 = vpop.eup %5052  ;;  %3106 = vadd.xlane.f32.xlu1 %v3105_v25 }
 0x440   : > { %8124 = vst [vmem:[#allocation104_spill] sm:$0xff] %v7446_v54  ;;  %v2929_v16 = vmul.f32 1.442695, %v2802_v63  ;;  %v7450_v32 = vpop.eup %5054  ;;  %v3111_v22 = vsel %vm2546_vm7, %v7446_v54, 0.0 }
 0x441   : > { %8125 = vst [vmem:[#allocation105_spill] sm:$0xff] %v7450_v32  ;;  %v3102_v39 = vsel %vm2546_vm7, %v7450_v32, 0.0 }
 0x442   : > { %5062 = vpow2.f32 %v2929_v16  ;;  %3103 = vadd.xlane.f32.xlu0 %v3102_v39 }
 0x443   : > { %v7454_v42 = vpop.eup %5056  ;;  %3112 = vadd.xlane.f32.xlu1 %v3111_v22 }
 0x444   : > { %8126 = vst [vmem:[#allocation106_spill] sm:$0xff] %v7454_v42  ;;  %v7458_v7 = vpop.eup %5058  ;;  %v3117_v63 = vsel %vm2546_vm7, %v7454_v42, 0.0 }
 0x445   : > { %8127 = vst [vmem:[#allocation107_spill] sm:$0xff] %v7458_v7  ;;  %v3108_v25 = vsel %vm2546_vm7, %v7458_v7, 0.0 }
 0x446   : > { %3109 = vadd.xlane.f32.xlu0 %v3108_v25 }
 0x447   : > { %3118 = vadd.xlane.f32.xlu1 %v3117_v63 }
 0x448   : > { %v7464_v16 = vpop.eup %5060 }
 0x449   : > { %8128 = vst [vmem:[#allocation108_spill] sm:$0xff] %v7464_v16  ;;  %v3114_v21 = vsel %vm2546_vm7, %v7464_v16, 0.0 }
 0x44a   : > { %3115 = vadd.xlane.f32.xlu0 %v3114_v21 }
 0x44c   : > { %v7468_v22 = vpop.eup %5062 }
 0x44d   : > { %8129 = vst [vmem:[#allocation109_spill] sm:$0xff] %v7468_v22  ;;  %v3120_v60 = vsel %vm2546_vm7, %v7468_v22, 0.0  ;;  %vm3134_vm7 = vcmp.gt.f32.partialorder %v8143_v10, -1e+29 }
 0x44e   : > { %3121 = vadd.xlane.f32.xlu0 %v3120_v60 }
 0x451   : > { %v2933_v39 = vpop.xlane.xlu1 %2932 }
 0x452   : > { %5064 = vrcp.f32 %v2933_v39 }
 0x455   : > { %v2939_v32 = vpop.xlane.xlu1 %2938 }
 0x456   : > { %5066 = vrcp.f32 %v2939_v32 }
 0x459   : > { %v2945_v42 = vpop.xlane.xlu1 %2944 }
 0x45a   : > { %5068 = vrcp.f32 %v2945_v42 }
 0x45c   : > { %v5065_v22 = vpop.eup %5064 }
 0x45d   : > { %v2936_v63 = vpop.xlane.xlu0 %2935  ;;  %v3315_v8 = vsel %vm3123_vm9, %v5065_v22, 0.0  ;;  %v8130_v22 = vld [vmem:[#allocation30_spill] sm:$0xff] }
 0x460   : > { %v2951_v27 = vpop.xlane.xlu1 %2950  ;;  %v5067_v4 = vpop.eup %5066 }
 0x461   : > { %v2942_v23 = vpop.xlane.xlu0 %2941  ;;  %5070 = vrcp.f32 %v2951_v27 }
 0x462   : > { %5072 = vrcp.f32 %v2942_v23 }
 0x464   : > { %v2957_v7 = vpop.xlane.xlu1 %2956  ;;  %v5069_v39 = vpop.eup %5068 }
 0x465   : > { %v2948_v54 = vpop.xlane.xlu0 %2947  ;;  %v3319_v49 = vsel %vm3127_vm8, %v5069_v39, 0.0  ;;  %v3317_v39 = vsel %vm3125_vm11, %v5067_v4, 0.0  ;;  %v8131_v4 = vld [vmem:[#allocation42_spill] sm:$0xff] }
 0x466   : > { %vm3124_vm4 = vcmp.gt.f32.partialorder %v8131_v4, -1e+29 }
 0x469   : > { %v2963_v25 = vpop.xlane.xlu1 %2962  ;;  %v2954_v16 = vpop.xlane.xlu0 %2953 }
 0x46a   : > { %5074 = vrcp.f32 %v2963_v25 }
 0x46b   : > { %5076 = vrcp.f32 %v2954_v16  ;;  %v5071_v32 = vpop.eup %5070  ;;  %v7482_v16 = vld [vmem:[%s5645_s24] sm:$0xff]  }
 0x46c   : > { %v5073_v42 = vpop.eup %5072  ;;  %4811 = vmatprep.subr.bf16.mxu1 %v7482_v16 }
 0x46d   : > { %v2969_v21 = vpop.xlane.xlu1 %2968  ;;  %v3318_v33 = vsel %vm3126_vm12, %v5073_v42, 0.0  ;;  %v8135_v42 = vld [vmem:[#allocation43_spill] sm:$0xff] }
 0x46e   : > { %5078 = vrcp.f32 %v2969_v21  ;;  %v2960_v60 = vpop.xlane.xlu0 %2959  ;;  %v3379_v14 = vmul.f32 %v8135_v42, %v3315_v8  ;;  %v3382_v4 = vmul.f32 %v8139_v47, %v3318_v33  ;;  %v8142_v42 = vld [vmem:[#allocation22_spill] sm:$0xff]  ;;  %v8144_v33 = vld [vmem:[#allocation19_spill] sm:$0xff] }
 0x46f   : > { %5080 = vrcp.f32 %v2957_v7 }
 0x470   : > { %5082 = vrcp.f32 %v2948_v54 }
 0x471   : > { %5084 = vrcp.f32 %v2936_v63  ;;  %v2975_v57 = vpop.xlane.xlu1 %2974 }
 0x472   : > { %5086 = vrcp.f32 %v2975_v57  ;;  %v2966_v3 = vpop.xlane.xlu0 %2965 }
 0x473   : > { %5088 = vrcp.f32 %v2960_v60 }
 0x474   : > { %v5075_v23 = vpop.eup %5074  ;;  %5090 = vrcp.f32 %v2966_v3  ;;  %v3321_v3 = vsel %vm3129_vm10, %v5071_v32, 0.0  ;;  %v3383_v32 = vmul.f32 %v7008_v9, %v3319_v49  ;;  %v8132_v9 = vld [vmem:[#allocation28_spill] sm:$0xff] }
 0x475   : > { %v7472_v27 = vpop.xlane.xlu1 %2980  ;;  %v5077_v7 = vpop.eup %5076  ;;  %v3325_v41 = vsel %vm3133_vm2, %v5075_v23, 0.0  ;;  %v3385_v50 = vmul.f32 %v7014_v40, %v3321_v3  ;;  %v8133_v40 = vld [vmem:[#allocation27_spill] sm:$0xff] }
 0x476   : > { %v2972_v54 = vpop.xlane.xlu0 %2971  ;;  %v3322_v6 = vsel %vm3130_vm15, %v5077_v7, 0.0  ;;  %v3389_v49 = vmul.f32 %v8132_v9, %v3325_v41 }
 0x477   : > { %5092 = vrcp.f32 %v2972_v54  ;;  %v3386_v3 = vmul.f32 %v8133_v40, %v3322_v6  ;;  %v8141_v40 = vld [vmem:[#allocation45_spill] sm:$0xff] }
 0x478   : > { %v5079_v57 = vpop.eup %5078  ;;  %vm3136_vm6 = vcmp.gt.f32.partialorder %v8141_v40, -1e+29 }
 0x479   : > { %v5081_v63 = vpop.eup %5080  ;;  %v2987_v25 = vpop.xlane.xlu1 %2986  ;;  %v3327_v60 = vsel %vm3135_vm0, %v5079_v57, 0.0 }
 0x47a   : > { %v5083_v21 = vpop.eup %5082  ;;  %v2978_v54 = vpop.xlane.xlu0 %2977  ;;  %v3323_v57 = vsel %vm3131_vm14, %v5081_v63, 0.0  ;;  %v3391_v23 = vmul.f32 %v8130_v22, %v3327_v60  ;;  %v8137_v60 = vld [vmem:[#allocation25_spill] sm:$0xff] }
 0x47b   : > { %v5085_v35 = vpop.eup %5084  ;;  %5094 = vrcp.f32 %v2978_v54  ;;  %v3320_v55 = vsel %vm3128_vm13, %v5083_v21, 0.0  ;;  %v3381_v21 = vmul.f32 %v8136_v29, %v3317_v39  ;;  %v3387_v22 = vmul.f32 %v8137_v60, %v3323_v57 }
 0x47c   : > { %v5087_v19 = vpop.eup %5086  ;;  %v3316_v59 = vsel %vm3124_vm4, %v5085_v35, 0.0  ;;  %v3384_v41 = vmul.f32 %v8140_v46, %v3320_v55  ;;  %v4582_v35 = vpack.c.bf16 %v3386_v3, %v3382_v4  ;;  %v8145_v55 = vld [vmem:[#allocation47_spill] sm:$0xff]  ;;  %5096 = vrcp.f32 %v7472_v27 }
 0x47d   : > { %v3329_v7 = vsel %vm3137_vm3, %v5087_v19, 0.0  ;;  %v2993_v61 = vpop.xlane.xlu1 %2992  ;;  %v5089_v48 = vpop.eup %5088  ;;  %v8138_v19 = vld [vmem:[#allocation21_spill] sm:$0xff]  ;;  %v4579_v26 = vpack.c.bf16 %v3391_v23, %v3387_v22  ;;  %v3380_v39 = vmul.f32 %v8142_v42, %v3316_v59  ;;  %vm3138_vm8 = vcmp.gt.f32.partialorder %v8145_v55, -1e+29  ;;  %v8147_v22 = vld [vmem:[#allocation32_spill] sm:$0xff] }
 0x47e   : > { %v3393_v63 = vmul.f32 %v8134_v43, %v3329_v7  ;;  %v2984_v54 = vpop.xlane.xlu0 %2983  ;;  %v5091_v5 = vpop.eup %5090  ;;  %vm3132_vm5 = vcmp.gt.f32.partialorder %v8138_v19, -1e+29  ;;  %v4577_v7 = vpack.c.bf16 %v3383_v32, %v3379_v14  ;;  %v4578_v43 = vpack.c.bf16 %v3385_v50, %v3381_v21  ;;  %v8146_v32 = vld [vmem:[#allocation29_spill] sm:$0xff] }
 0x47f   : > { %v3324_v29 = vsel %vm3132_vm5, %v5089_v48, 0.0  ;;  %v3530_v3 = vrot.slane %v4579_v26, %v8144_v33  ;;  %5098 = vrcp.f32 %v2987_v25  ;;  %v3572_v21 = vrot.slane %v4582_v35, %v8144_v33 }
 0x480   : > { %v4580_v9 = vpack.c.bf16 %v3393_v63, %v3389_v49  ;;  %v4581_v49 = vpack.c.bf16 %v3384_v41, %v3380_v39  ;;  %v3326_v63 = vsel %vm3134_vm7, %v5091_v5, 0.0  ;;  %v3388_v50 = vmul.f32 %v8146_v32, %v3324_v29 }
 0x481   : > { %v5093_v6 = vpop.eup %5092  ;;  %v2999_v8 = vpop.xlane.xlu1 %2998  ;;  %v3522_v23 = vrot.slane %v4578_v43, %v8144_v33  ;;  %v3390_v19 = vmul.f32 %v8147_v22, %v3326_v63 }
 0x482   : > { %v3328_v57 = vsel %vm3136_vm6, %v5093_v6, 0.0  ;;  %v2990_v60 = vpop.xlane.xlu0 %2989  ;;  %v3538_v46 = vrot.slane %v4580_v9, %v8144_v33  ;;  %5100 = vrcp.f32 %v2999_v8  ;;  %v3564_v27 = vrot.slane %v4581_v49, %v8144_v33 }
 0x483   : > { %v3392_v47 = vmul.f32 %v7102_v36, %v3328_v57  ;;  %v3514_v36 = vrot.slane %v4577_v7, %v8144_v33  ;;  %5102 = vrcp.f32 %v2993_v61  ;;  %v8148_v7 = vld [vmem:[#allocation20_spill] sm:$0xff] }
 0x484   : > { %v3547_v41 = vcombine.low %v3530_v3, %v3538_v46  ;;  %5104 = vrcp.f32 %v2984_v54  ;;  %v3589_v40 = vcombine.low %v3564_v27, %v3572_v21  ;;  %v8155_v27 = vld [vmem:[#allocation34_spill] sm:$0xff] }
 0x485   : > { %v5095_v14 = vpop.eup %5094  ;;  %v3005_v59 = vpop.xlane.xlu1 %3004  ;;  %v4583_v5 = vpack.c.bf16 %v3392_v47, %v3388_v50  ;;  %v3539_v26 = vcombine.low %v3514_v36, %v3522_v23  ;;  %v8149_v50 = vld [vmem:[#allocation46_spill] sm:$0xff]  ;;  %vm3144_vm15 = vcmp.gt.f32.partialorder %v8155_v27, -1e+29  ;;  %v8165_v27 = vld [vmem:[#allocation59_spill] sm:$0xff] }
 0x486   : > { %v3330_v10 = vsel %vm3138_vm8, %v5095_v14, 0.0  ;;  %v2996_v48 = vpop.xlane.xlu0 %2995  ;;  %5106 = vrcp.f32 %v3005_v59  ;;  %v3554_v43 = vrot.slane %v3547_v41, %v8148_v7  ;;  %v5097_v29 = vpop.eup %5096  ;;  %v3596_v57 = vrot.slane %v3589_v40, %v8148_v7  ;;  %v8150_v59 = vld [vmem:[#allocation48_spill] sm:$0xff]  ;;  %v8156_v40 = vld [vmem:[#allocation53_spill] sm:$0xff] }
 0x487   : > { %v3394_v4 = vmul.f32 %v7118_v52, %v3330_v10  ;;  %v3580_v42 = vrot.slane %v4583_v5, %v8144_v33  ;;  %v3546_v8 = vrot.slane %v3539_v26, %v8148_v7  ;;  %vm3139_vm9 = vcmp.gt.f32.partialorder %v8149_v50, -1e+29  ;;  %v8152_v10 = vld [vmem:[#allocation50_spill] sm:$0xff]  ;;  %v8154_v41 = vld [vmem:[#allocation52_spill] sm:$0xff]  ;;  %v8161_v50 = vld [vmem:[#allocation35_spill] sm:$0xff] }
 0x488   : > { %vm3141_vm10 = vcmp.gt.f32.partialorder %v8150_v59, -1e+29  ;;  %vm3140_vm12 = vcmp.gt.f32.partialorder %v8152_v10, -1e+29  ;;  %vm3142_vm14 = vcmp.gt.f32.partialorder %v8154_v41, -1e+29 }
 0x489   : > { %v4584_v9 = vpack.c.bf16 %v3394_v4, %v3390_v19  ;;  %v3011_v6 = vpop.xlane.xlu1 %3010  ;;  %v3555_v54 = vcombine.low %v3546_v8, %v3554_v43  ;;  %v5099_v46 = vpop.eup %5098  ;;  %v3556_v55 = vcombine.high %v3546_v8, %v3554_v43  ;;  %vm3147_vm0 = vcmp.gt.f32.partialorder %v8156_v40, -1e+29 }
 0x48a   : > { %v3002_v25 = vpop.xlane.xlu0 %3001  ;;  %5108 = vrcp.f32 %v3011_v6  ;;  %vm3150_vm7 = vcmp.gt.f32.partialorder %v8165_v27, -1e+29  ;;  %vm3152_vm8 = vcmp.gt.f32.partialorder %v7172_v30, -1e+29 }
 0x48b   : > { %v3588_v39 = vrot.slane %v4584_v9, %v8144_v33  ;;  %5110 = vrcp.f32 %v3002_v25  ;;  %v3911_v36 = vshrl.u32 %v3555_v54, 16  ;;  %v3919_v19 = vshrl.u32 %v3556_v55, 16 }
 0x48c   : > { %v5101_v32 = vpop.eup %5100 }
 0x48d   : > { %v3597_v35 = vcombine.low %v3580_v42, %v3588_v39  ;;  %v5103_v3 = vpop.eup %5102 }
 0x48e   : > { %v3017_v52 = vpop.xlane.xlu1 %3016  ;;  %v5105_v22 = vpop.eup %5104 }
 0x48f   : > { %5112 = vrcp.f32 %v3017_v52  ;;  %v3008_v61 = vpop.xlane.xlu0 %3007  ;;  %v3604_v47 = vrot.slane %v3597_v35, %v8148_v7  ;;  %v4933_v52 = vld [vmem:[%s5645_s24 + $0x8] sm:$0xff]  }
 0x490   : > { %5114 = vrcp.f32 %v2990_v60  ;;  %v8151_v60 = vld [vmem:[#allocation49_spill] sm:$0xff]  ;;  %v5107_v4 = vpop.eup %5106  ;;  %v8157_v35 = vld [vmem:[#allocation36_spill] sm:$0xff] }
 0x491   : > { %5116 = vrcp.f32 %v2996_v48  ;;  %v3605_v63 = vcombine.low %v3596_v57, %v3604_v47  ;;  %v3606_v14 = vcombine.high %v3596_v57, %v3604_v47  ;;  %vm3143_vm11 = vcmp.gt.f32.partialorder %v8151_v60, -1e+29  ;;  %v8153_v48 = vld [vmem:[#allocation51_spill] sm:$0xff] }
 0x492   : > { %v3023_v49 = vpop.xlane.xlu1 %3022  ;;  %vm3145_vm13 = vcmp.gt.f32.partialorder %v8153_v48, -1e+29  ;;  %vm3146_vm2 = vcmp.gt.f32.partialorder %v8157_v35, -1e+29  ;;  %v8162_v48 = vld [vmem:[#allocation33_spill] sm:$0xff] }
 0x493   : > { %5118 = vrcp.f32 %v3023_v49  ;;  %v3014_v23 = vpop.xlane.xlu0 %3013  ;;  %v3912_v21 = vshrl.u32 %v3605_v63, 16  ;;  %v3920_v5 = vshrl.u32 %v3606_v14, 16  ;;  %v3337_v9 = vsel %vm3145_vm13, %v5101_v32, 0.0  ;;  %v8158_v49 = vld [vmem:[#allocation56_spill] sm:$0xff] }
 0x494   : > { %5120 = vrcp.f32 %v3008_v61  ;;  %v5109_v25 = vpop.eup %5108  ;;  %v3909_v42 = vpack.i.b16 %v3605_v63, %v3555_v54  ;;  %v3333_v61 = vsel %vm3141_vm10, %v5099_v46, 0.0  ;;  %v3917_v57 = vpack.i.b16 %v3606_v14, %v3556_v55  ;;  %v8160_v46 = vld [vmem:[#allocation58_spill] sm:$0xff] }
 0x495   : > { %v3913_v26 = vpack.i.b16 %v3912_v21, %v3911_v36  ;;  %5122 = vrcp.f32 %v3014_v23  ;;  %v3921_v39 = vpack.i.b16 %v3920_v5, %v3919_v19  ;;  %v5111_v8 = vpop.eup %5110  ;;  %vm3151_vm3 = vcmp.gt.f32.partialorder %v8158_v49, -1e+29  ;;  %v8159_v36 = vld [vmem:[#allocation54_spill] sm:$0xff]  ;;  %v8163_v5 = vld [vmem:[#allocation37_spill] sm:$0xff]  ;;  %v8167_v49 = vld [vmem:[#allocation55_spill] sm:$0xff] }
 0x496   : > { %v3331_v32 = vsel %vm3139_vm9, %v5097_v29, 0.0  ;;  %v3335_v54 = vsel %vm3143_vm11, %v5103_v3, 0.0  ;;  %v3401_v63 = vmul.f32 %v7150_v56, %v3337_v9  ;;  %vm3149_vm4 = vcmp.gt.f32.partialorder %v8159_v36, -1e+29 }
 0x497   : > { %v3029_v6 = vpop.xlane.xlu1 %3028  ;;  %v3020_v43 = vpop.xlane.xlu0 %3019  ;;  %4099 = vmatprep.mubr.bf16.mxu1 %v3913_v26  ;;  %4164 = vmatprep.mubr.bf16.mxu0 %v3921_v39  ;;  %vm3153_vm5 = vcmp.gt.f32.partialorder %v8160_v46, -1e+29  ;;  %v3339_v55 = vsel %vm3147_vm0, %v5107_v4, 0.0  ;;  %v3397_v3 = vmul.f32 %v8161_v50, %v3333_v61  ;;  %v3338_v56 = vsel %vm3146_vm2, %v5111_v8, 0.0 }
 0x498   : > { %5124 = vrcp.f32 %v3020_v43  ;;  %4100 = vmatmul.mubr.bf16.vlgmr.msra.gmra.mrb[20].mxu1 %v3909_v42  ;;  %4165 = vmatmul.mubr.bf16.vlgmr.msra.gmra.mrb[44].mxu0 %v3917_v57  ;;  %v3395_v19 = vmul.f32 %v8162_v48, %v3331_v32  ;;  %v3399_v4 = vmul.f32 %v8163_v5, %v3335_v54  ;;  %v3341_v9 = vsel %vm3149_vm4, %v5109_v25, 0.0  ;;  %v8168_v32 = vld [vmem:[#allocation39_spill] sm:$0xff]  ;;  %v8170_v5 = vld [vmem:[#allocation41_spill] sm:$0xff] }
 0x499   : > { %v5113_v47 = vpop.eup %5112  ;;  %4812 = vmatpush3.bf16.msra.mxu1 %v7482_v16  ;;  %5126 = vrcp.f32 %v3029_v6  ;;  %v3332_v26 = vsel %vm3140_vm12, %v5105_v22, 0.0  ;;  %v4586_v40 = vpack.c.bf16 %v3401_v63, %v3397_v3  ;;  %v3402_v42 = vmul.f32 %v7182_v11, %v3338_v56  ;;  %v8166_v11 = vld [vmem:[#allocation38_spill] sm:$0xff] }
 0x49a   : > { %v5115_v23 = vpop.eup %5114  ;;  %v3343_v14 = vsel %vm3151_vm3, %v5113_v47, 0.0  ;;  %4813 = vmatprep.subr.bf16.mxu1 %v4933_v52  ;;  %v3405_v10 = vmul.f32 %v7186_v2, %v3341_v9  ;;  %v4585_v61 = vpack.c.bf16 %v3399_v4, %v3395_v19  ;;  %v8169_v19 = vld [vmem:[#allocation40_spill] sm:$0xff]  ;;  %vm3154_vm10 = vcmp.gt.f32.partialorder %v8170_v5, -1e+29 }
 0x49b   : > { %v3035_v59 = vpop.xlane.xlu1 %3034  ;;  %v5117_v29 = vpop.eup %5116  ;;  %v3407_v60 = vmul.f32 %v7198_v45, %v3343_v14  ;;  %v3334_v43 = vsel %vm3142_vm14, %v5115_v23, 0.0  ;;  %v3403_v45 = vmul.f32 %v7170_v24, %v3339_v55  ;;  %v8164_v24 = vld [vmem:[#allocation57_spill] sm:$0xff]  ;;  %v3622_v46 = vrot.slane %v4586_v40, %v8144_v33 }
 0x49c   : > { %v3026_v21 = vpop.xlane.xlu0 %3025  ;;  %v3336_v6 = vsel %vm3144_vm15, %v5117_v29, 0.0  ;;  %vm3148_vm6 = vcmp.gt.f32.partialorder %v8164_v24, -1e+29  ;;  %v3398_v57 = vmul.f32 %v8166_v11, %v3334_v43  ;;  %v3614_v3 = vrot.slane %v4585_v61, %v8144_v33 }
 0x49d   : > { %5128 = vrcp.f32 %v3026_v21  ;;  %v5119_v16 = vpop.eup %5118  ;;  %4814 = vmatpush3.bf16.msra.mxu1 %v4933_v52  ;;  %v4587_v22 = vpack.c.bf16 %v3407_v60, %v3403_v45  ;;  %v3396_v52 = vmul.f32 %v8167_v49, %v3332_v26  ;;  %v3400_v54 = vmul.f32 %v8168_v32, %v3336_v6 }
 0x49e   : > { %v3345_v39 = vsel %vm3153_vm5, %v5119_v16, 0.0  ;;  %5130 = vrcp.f32 %v3035_v59  ;;  %v5121_v8 = vpop.eup %5120  ;;  %v4590_v23 = vpack.c.bf16 %v3402_v42, %v3398_v57  ;;  %vm3155_vm9 = vcmp.gt.f32.partialorder %v8169_v19, -1e+29 }
 0x49f   : > { %v3041_v25 = vpop.xlane.xlu1 %3040  ;;  %v3409_v41 = vmul.f32 %v7214_v1, %v3345_v39  ;;  %v5123_v47 = vpop.eup %5122  ;;  %v3340_v1 = vsel %vm3148_vm6, %v5121_v8, 0.0  ;;  %v3630_v59 = vrot.slane %v4587_v22, %v8144_v33  ;;  %v4589_v60 = vpack.c.bf16 %v3400_v54, %v3396_v52  ;;  %v8171_v8 = vld [vmem:[#allocation61_spill] sm:$0xff]  ;;  %v8172_v22 = vld [vmem:[#allocation60_spill] sm:$0xff]  ;;  %v8173_v54 = vld [vmem:[#allocation62_spill] sm:$0xff] }
 0x4a0   : > { %5132 = vrcp.f32 %v3041_v25  ;;  %v3032_v35 = vpop.xlane.xlu0 %3031  ;;  %v3342_v30 = vsel %vm3150_vm7, %v5123_v47, 0.0  ;;  %v3404_v4 = vmul.f32 %v7202_v28, %v3340_v1  ;;  %v3639_v16 = vcombine.low %v3614_v3, %v3622_v46  ;;  %v8175_v3 = vld [vmem:[#allocation64_spill] sm:$0xff] }
 0x4a1   : > { %v4588_v2 = vpack.c.bf16 %v3409_v41, %v3405_v10  ;;  %5134 = vrcp.f32 %v3032_v35  ;;  %v3406_v26 = vmul.f32 %v7218_v38, %v3342_v30  ;;  %vm3159_vm11 = vcmp.gt.f32.partialorder %v8171_v8, -1e+29 }
 0x4a2   : > { %v5125_v63 = vpop.eup %5124  ;;  %v3664_v10 = vrot.slane %v4589_v60, %v8144_v33  ;;  %vm3157_vm12 = vcmp.gt.f32.partialorder %v8172_v22, -1e+29  ;;  %v3646_v24 = vrot.slane %v3639_v16, %v8148_v7  ;;  %vm3156_vm13 = vcmp.gt.f32.partialorder %v8173_v54, -1e+29  ;;  %v8180_v54 = vld [vmem:[#allocation68_spill] sm:$0xff] }
 0x4a3   : > { %v3047_v36 = vpop.xlane.xlu1 %3046  ;;  %v3344_v55 = vsel %vm3152_vm8, %v5125_v63, 0.0  ;;  %v3638_v29 = vrot.slane %v4588_v2, %v8144_v33  ;;  %v5127_v56 = vpop.eup %5126  ;;  %v8174_v2 = vld [vmem:[#allocation63_spill] sm:$0xff]  ;;  %vm3158_vm15 = vcmp.gt.f32.partialorder %v8175_v3, -1e+29  ;;  %vm3165_vm5 = vcmp.gt.f32.partialorder %v8180_v54, -1e+29 }
 0x4a4   : > { %5136 = vrcp.f32 %v3047_v36  ;;  %v3038_v14 = vpop.xlane.xlu0 %3037  ;;  %v3408_v50 = vmul.f32 %v7230_v15, %v3344_v55  ;;  %v3672_v15 = vrot.slane %v4590_v23, %v8144_v33  ;;  %v3347_v6 = vsel %vm3155_vm9, %v5127_v56, 0.0  ;;  %v8176_v56 = vld [vmem:[#allocation65_spill] sm:$0xff] }
 0x4a5   : > { %v3647_v21 = vcombine.low %v3630_v59, %v3638_v29  ;;  %5138 = vrcp.f32 %v3038_v14  ;;  %v3411_v27 = vmul.f32 %v7234_v34, %v3347_v6  ;;  %vm3161_vm14 = vcmp.gt.f32.partialorder %v8174_v2, -1e+29 }
 0x4a6   : > { %v4591_v42 = vpack.c.bf16 %v3408_v50, %v3404_v4  ;;  %v3689_v11 = vcombine.low %v3664_v10, %v3672_v15  ;;  %vm3160_vm0 = vcmp.gt.f32.partialorder %v8176_v56, -1e+29 }
 0x4a7   : > { %v5129_v48 = vpop.eup %5128  ;;  %v3654_v28 = vrot.slane %v3647_v21, %v8148_v7 }
 0x4a8   : > { %v3053_v9 = vpop.xlane.xlu1 %3052  ;;  %v3346_v40 = vsel %vm3154_vm10, %v5129_v48, 0.0  ;;  %v3044_v43 = vpop.xlane.xlu0 %3043  ;;  %v3680_v49 = vrot.slane %v4591_v42, %v8144_v33  ;;  %v3696_v29 = vrot.slane %v3689_v11, %v8148_v7 }
 0x4a9   : > { %v5131_v45 = vpop.eup %5130  ;;  %v3410_v39 = vmul.f32 %v7246_v12, %v3346_v40  ;;  %5140 = vrcp.f32 %v3044_v43  ;;  %v3655_v23 = vcombine.low %v3646_v24, %v3654_v28  ;;  %v3656_v36 = vcombine.high %v3646_v24, %v3654_v28  ;;  %v8177_v28 = vld [vmem:[#allocation67_spill] sm:$0xff] }
 0x4aa   : > { %v5133_v25 = vpop.eup %5132  ;;  %5142 = vrcp.f32 %v3053_v9  ;;  %v3349_v47 = vsel %vm3157_vm12, %v5131_v45, 0.0  ;;  %vm3162_vm2 = vcmp.gt.f32.partialorder %v8177_v28, -1e+29 }
 0x4ab   : > { %v4592_v38 = vpack.c.bf16 %v3410_v39, %v3406_v26  ;;  %v3351_v41 = vsel %vm3159_vm11, %v5133_v25, 0.0  ;;  %v5135_v57 = vpop.eup %5134  ;;  %v3413_v46 = vmul.f32 %v7250_v51, %v3349_v47  ;;  %v3927_v21 = vshrl.u32 %v3655_v23, 16  ;;  %v8179_v47 = vld [vmem:[#allocation69_spill] sm:$0xff] }
 0x4ac   : > { %v3059_v35 = vpop.xlane.xlu1 %3058  ;;  %v3415_v61 = vmul.f32 %v7262_v53, %v3351_v41  ;;  %v3050_v12 = vpop.xlane.xlu0 %3049  ;;  %v3348_v55 = vsel %vm3156_vm13, %v5135_v57, 0.0  ;;  %vm3167_vm4 = vcmp.gt.f32.partialorder %v8179_v47, -1e+29 }
 0x4ad   : > { %5144 = vrcp.f32 %v3050_v12  ;;  %v3688_v52 = vrot.slane %v4592_v38, %v8144_v33  ;;  %v3412_v19 = vmul.f32 %v7266_v17, %v3348_v55 }
 0x4ae   : > { %v5137_v32 = vpop.eup %5136  ;;  %v4593_v63 = vpack.c.bf16 %v3415_v61, %v3411_v27  ;;  %5146 = vrcp.f32 %v3059_v35 }
 0x4af   : > { %v3353_v34 = vsel %vm3161_vm14, %v5137_v32, 0.0  ;;  %v3697_v1 = vcombine.low %v3680_v49, %v3688_v52  ;;  %v5139_v50 = vpop.eup %5138 }
 0x4b0   : > { %v3065_v53 = vpop.xlane.xlu1 %3064  ;;  %v3417_v14 = vmul.f32 %v7278_v20, %v3353_v34  ;;  %v3056_v59 = vpop.xlane.xlu0 %3055  ;;  %v3935_v20 = vshrl.u32 %v3656_v36, 16  ;;  %v7618_v26 = vrot.slane %v4593_v63, %v8144_v33  ;;  %v3350_v17 = vsel %vm3158_vm15, %v5139_v50, 0.0 }
 0x4b1   : > { %5148 = vrcp.f32 %v3065_v53  ;;  %v3704_v30 = vrot.slane %v3697_v1, %v8148_v7  ;;  %v3414_v61 = vmul.f32 %v7282_v13, %v3350_v17  ;;  %v8181_v1 = vld [vmem:[#allocation71_spill] sm:$0xff] }
 0x4b2   : > { %v4594_v60 = vpack.c.bf16 %v3417_v14, %v3413_v46  ;;  %vm3169_vm6 = vcmp.gt.f32.partialorder %v8181_v1, -1e+29  ;;  %v8187_v17 = vld [vmem:[#allocation75_spill] sm:$0xff]  ;;  %v8194_v1 = vld [vmem:[#allocation80_spill] sm:$0xff] }
 0x4b3   : > { %v5141_v48 = vpop.eup %5140  ;;  %v3705_v5 = vcombine.low %v3696_v29, %v3704_v30  ;;  %v3706_v4 = vcombine.high %v3696_v29, %v3704_v30  ;;  %v8182_v30 = vld [vmem:[#allocation70_spill] sm:$0xff]  ;;  %vm3170_vm11 = vcmp.gt.f32.partialorder %v8187_v17, -1e+29  ;;  %vm3177_vm14 = vcmp.gt.f32.partialorder %v8194_v1, -1e+29 }
 0x4b4   : > { %v3071_v51 = vpop.xlane.xlu1 %3070  ;;  %v3352_v9 = vsel %vm3160_vm0, %v5141_v48, 0.0  ;;  %v3062_v16 = vpop.xlane.xlu0 %3061  ;;  %v7621_v40 = vrot.slane %v4594_v60, %v8144_v33  ;;  %vm3164_vm7 = vcmp.gt.f32.partialorder %v8182_v30, -1e+29 }
 0x4b5   : > { %5150 = vrcp.f32 %v3071_v51  ;;  %v3416_v43 = vmul.f32 %v7294_v44, %v3352_v9  ;;  %v3928_v15 = vshrl.u32 %v3705_v5, 16  ;;  %v3936_v45 = vshrl.u32 %v3706_v4, 16  ;;  %v5143_v6 = vpop.eup %5142  ;;  %v8178_v44 = vld [vmem:[#allocation66_spill] sm:$0xff] }
 0x4b6   : > { %5152 = vrcp.f32 %v3056_v59  ;;  %v3925_v42 = vpack.i.b16 %v3705_v5, %v3655_v23  ;;  %v3933_v39 = vpack.i.b16 %v3706_v4, %v3656_v36  ;;  %v3739_v25 = vcombine.low %v7618_v26, %v7621_v40  ;;  %v8191_v40 = vld [vmem:[#allocation76_spill] sm:$0xff] }
 0x4b7   : > { %v5145_v8 = vpop.eup %5144  ;;  %v4597_v10 = vpack.c.bf16 %v3416_v43, %v3412_v19  ;;  %v3929_v38 = vpack.i.b16 %v3928_v15, %v3927_v21  ;;  %v3937_v41 = vpack.i.b16 %v3936_v45, %v3935_v20  ;;  %vm3163_vm3 = vcmp.gt.f32.partialorder %v8178_v44, -1e+29  ;;  %v8183_v21 = vld [vmem:[#allocation73_spill] sm:$0xff]  ;;  %v8185_v20 = vld [vmem:[#allocation82_spill] sm:$0xff] }
 0x4b8   : > { %v3077_v22 = vpop.xlane.xlu1 %3076  ;;  %v3354_v35 = vsel %vm3162_vm2, %v5145_v8, 0.0  ;;  %5154 = vrcp.f32 %v3062_v16  ;;  %v3068_v24 = vpop.xlane.xlu0 %3067  ;;  %v3355_v12 = vsel %vm3163_vm3, %v5143_v6, 0.0  ;;  %vm3168_vm8 = vcmp.gt.f32.partialorder %v8183_v21, -1e+29  ;;  %v8186_v6 = vld [vmem:[#allocation74_spill] sm:$0xff] }
 0x4b9   : > { %v5147_v27 = vpop.eup %5146  ;;  %v3418_v11 = vmul.f32 %v7310_v37, %v3354_v35  ;;  %5156 = vrcp.f32 %v3068_v24  ;;  %4107 = vmatprep.mubr.bf16.mxu1 %v3929_v38  ;;  %4172 = vmatprep.mubr.bf16.mxu0 %v3937_v41  ;;  %v3419_v2 = vmul.f32 %v7298_v18, %v3355_v12  ;;  %v7637_v23 = vrot.slane %v4597_v10, %v8144_v33  ;;  %v8188_v38 = vld [vmem:[#allocation79_spill] sm:$0xff]  ;;  %v8189_v35 = vld [vmem:[#allocation86_spill] sm:$0xff] }
 0x4ba   : > { %4108 = vmatmul.mubr.bf16.gmra.mrb[24].mxu1 %v3925_v42  ;;  %4173 = vmatmul.mubr.bf16.gmra.mrb[48].mxu0 %v3933_v39  ;;  %5158 = vrcp.f32 %v3077_v22  ;;  %v3357_v37 = vsel %vm3165_vm5, %v5147_v27, 0.0  ;;  %vm3171_vm10 = vcmp.gt.f32.partialorder %v8186_v6, -1e+29  ;;  %vm3173_vm13 = vcmp.gt.f32.partialorder %v8191_v40, -1e+29  ;;  %v8201_v6 = vld [vmem:[#allocation98_spill] sm:$0xff] }
 0x4bb   : > { %v5149_v57 = vpop.eup %5148  ;;  %v4598_v49 = vpack.c.bf16 %v3418_v11, %v3414_v61  ;;  %v3421_v14 = vmul.f32 %v7314_v31, %v3357_v37  ;;  %v8190_v61 = vld [vmem:[#allocation77_spill] sm:$0xff] }
 0x4bc   : > { %v3359_v52 = vsel %vm3167_vm4, %v5149_v57, 0.0  ;;  %v3083_v32 = vpop.xlane.xlu1 %3082  ;;  %v3074_v63 = vpop.xlane.xlu0 %3073  ;;  %vm3175_vm12 = vcmp.gt.f32.partialorder %v8190_v61, -1e+29 }
 0x4bd   : > { %v3423_v13 = vmul.f32 %v7326_v62, %v3359_v52  ;;  %5160 = vrcp.f32 %v3074_v63  ;;  %v7640_v34 = vrot.slane %v4598_v49, %v8144_v33  ;;  %v8193_v52 = vld [vmem:[#allocation90_spill] sm:$0xff] }
 0x4be   : > { %5162 = vrcp.f32 %v3083_v32 }
 0x4bf   : > { %v5151_v53 = vpop.eup %5150  ;;  %v4595_v36 = vpack.c.bf16 %v3423_v13, %v3419_v2  ;;  %v3789_v62 = vcombine.low %v7637_v23, %v7640_v34 }
 0x4c0   : > { %v5153_v46 = vpop.eup %5152  ;;  %v3361_v55 = vsel %vm3169_vm6, %v5151_v53, 0.0  ;;  %v3089_v18 = vpop.xlane.xlu1 %3088 }
 0x4c1   : > { %v3425_v59 = vmul.f32 %v7342_v0, %v3361_v55  ;;  %5164 = vrcp.f32 %v3089_v18  ;;  %v3080_v29 = vpop.xlane.xlu0 %3079  ;;  %v3356_v3 = vsel %vm3164_vm7, %v5153_v46, 0.0  ;;  %v3730_v5 = vrot.slane %v4595_v36, %v8144_v33  ;;  %v8184_v0 = vld [vmem:[#allocation72_spill] sm:$0xff]  ;;  %v8195_v46 = vld [vmem:[#allocation78_spill] sm:$0xff] }
 0x4c2   : > { %v5155_v50 = vpop.eup %5154  ;;  %5166 = vrcp.f32 %v3080_v29  ;;  %vm3166_vm9 = vcmp.gt.f32.partialorder %v8184_v0, -1e+29  ;;  %v3420_v4 = vmul.f32 %v7330_v58, %v3356_v3  ;;  %v3746_v58 = vrot.slane %v3739_v25, %v8148_v7  ;;  %v8192_v25 = vld [vmem:[#allocation83_spill] sm:$0xff] }
 0x4c3   : > { %v4596_v56 = vpack.c.bf16 %v3425_v59, %v3421_v14  ;;  %v5157_v60 = vpop.eup %5156  ;;  %v3358_v43 = vsel %vm3166_vm9, %v5155_v50, 0.0  ;;  %vm3172_vm15 = vcmp.gt.f32.partialorder %v8195_v46, -1e+29  ;;  %v8196_v59 = vld [vmem:[#allocation87_spill] sm:$0xff]  ;;  %v8197_v50 = vld [vmem:[#allocation94_spill] sm:$0xff] }
 0x4c4   : > { %v3095_v48 = vpop.xlane.xlu1 %3094  ;;  %v3360_v19 = vsel %vm3168_vm8, %v5157_v60, 0.0  ;;  %v5159_v16 = vpop.eup %5158  ;;  %v3422_v41 = vmul.f32 %v8188_v38, %v3358_v43  ;;  %v3796_v60 = vrot.slane %v3789_v62, %v8148_v7 }
 0x4c5   : > { %5168 = vrcp.f32 %v3095_v48  ;;  %v3086_v51 = vpop.xlane.xlu0 %3085  ;;  %v3738_v31 = vrot.slane %v4596_v56, %v8144_v33  ;;  %v3424_v9 = vmul.f32 %v8185_v20, %v3360_v19  ;;  %v3363_v44 = vsel %vm3171_vm10, %v5159_v16, 0.0  ;;  %v8198_v19 = vld [vmem:[#allocation81_spill] sm:$0xff] }
 0x4c6   : > { %5170 = vrcp.f32 %v3086_v51  ;;  %v3427_v49 = vmul.f32 %v8192_v25, %v3363_v44  ;;  %vm3174_vm0 = vcmp.gt.f32.partialorder %v8198_v19, -1e+29  ;;  %v8199_v51 = vld [vmem:[#allocation84_spill] sm:$0xff]  ;;  %v8205_v25 = vld [vmem:[#allocation101_spill] sm:$0xff] }
 0x4c7   : > { %v3747_v15 = vcombine.low %v3730_v5, %v3738_v31  ;;  %v5161_v45 = vpop.eup %5160  ;;  %v4599_v42 = vpack.c.bf16 %v3424_v9, %v3420_v4  ;;  %vm3176_vm2 = vcmp.gt.f32.partialorder %v8199_v51, -1e+29  ;;  %v8200_v4 = vld [vmem:[#allocation91_spill] sm:$0xff] }
 0x4c8   : > { %v3101_v39 = vpop.xlane.xlu1 %3100  ;;  %v3362_v8 = vsel %vm3170_vm11, %v5161_v45, 0.0  ;;  %v5163_v22 = vpop.eup %5162 }
 0x4c9   : > { %v3092_v28 = vpop.xlane.xlu0 %3091  ;;  %v3754_v10 = vrot.slane %v3747_v15, %v8148_v7  ;;  %v3426_v24 = vmul.f32 %v8189_v35, %v3362_v8  ;;  %v3365_v13 = vsel %vm3173_vm13, %v5163_v22, 0.0  ;;  %v3780_v63 = vrot.slane %v4599_v42, %v8144_v33 }
 0x4ca   : > { %5172 = vrcp.f32 %v3092_v28  ;;  %v3429_v29 = vmul.f32 %v8196_v59, %v3365_v13  ;;  %v8208_v13 = vld [vmem:[#allocation99_spill] sm:$0xff] }
 0x4cb   : > { %v5165_v27 = vpop.eup %5164  ;;  %v7664_v12 = vcombine.low %v3746_v58, %v3754_v10  ;;  %v7666_v11 = vcombine.high %v3746_v58, %v3754_v10  ;;  %v4600_v57 = vpack.c.bf16 %v3426_v24, %v3422_v41  ;;  %5174 = vrcp.f32 %v3101_v39  ;;  %v8202_v41 = vld [vmem:[#allocation88_spill] sm:$0xff] }
 0x4cc   : > { %v3367_v47 = vsel %vm3175_vm12, %v5165_v27, 0.0  ;;  %v3107_v26 = vpop.xlane.xlu1 %3106  ;;  %v5167_v2 = vpop.eup %5166  ;;  %vm3178_vm3 = vcmp.gt.f32.partialorder %v8202_v41, -1e+29  ;;  %v8203_v27 = vld [vmem:[#allocation85_spill] sm:$0xff] }
 0x4cd   : > { %v3431_v32 = vmul.f32 %v8193_v52, %v3367_v47  ;;  %v3098_v54 = vpop.xlane.xlu0 %3097  ;;  %v3788_v37 = vrot.slane %v4600_v57, %v8144_v33  ;;  %v3364_v30 = vsel %vm3172_vm15, %v5167_v2, 0.0  ;;  %v3943_v31 = vshrl.u32 %v7664_v12, 16  ;;  %v8206_v52 = vld [vmem:[#allocation92_spill] sm:$0xff]  ;;  %v8207_v2 = vld [vmem:[#allocation89_spill] sm:$0xff] }
 0x4ce   : > { %5176 = vrcp.f32 %v3098_v54  ;;  %v3428_v20 = vmul.f32 %v8200_v4, %v3364_v30  ;;  %v3951_v15 = vshrl.u32 %v7666_v11, 16  ;;  %vm3179_vm4 = vcmp.gt.f32.partialorder %v8203_v27, -1e+29 }
 0x4cf   : > { %v5169_v53 = vpop.eup %5168  ;;  %v4601_v36 = vpack.c.bf16 %v3431_v32, %v3427_v49  ;;  %5178 = vrcp.f32 %v3107_v26  ;;  %v3797_v14 = vcombine.low %v3780_v63, %v3788_v37  ;;  %v8204_v26 = vld [vmem:[#allocation95_spill] sm:$0xff]  ;;  %vm3183_vm5 = vcmp.gt.f32.partialorder %v8206_v52, -1e+29  ;;  %v8209_v37 = vld [vmem:[#allocation104_spill] sm:$0xff] }
 0x4d0   : > { %v3369_v55 = vsel %vm3177_vm14, %v5169_v53, 0.0  ;;  %v3113_v18 = vpop.xlane.xlu1 %3112  ;;  %v5171_v48 = vpop.eup %5170  ;;  %vm3181_vm6 = vcmp.gt.f32.partialorder %v8207_v2, -1e+29 }
 0x4d1   : > { %v3433_v3 = vmul.f32 %v8197_v50, %v3369_v55  ;;  %5180 = vrcp.f32 %v3113_v18  ;;  %v3104_v56 = vpop.xlane.xlu0 %3103  ;;  %v3804_v21 = vrot.slane %v3797_v14, %v8148_v7  ;;  %v7688_v62 = vrot.slane %v4601_v36, %v8144_v33  ;;  %v8210_v14 = vld [vmem:[#allocation96_spill] sm:$0xff] }
 0x4d2   : > { %v3366_v28 = vsel %vm3174_vm0, %v5171_v48, 0.0  ;;  %vm3185_vm7 = vcmp.gt.f32.partialorder %v8210_v14, -1e+29  ;;  %v8213_v48 = vld [vmem:[#allocation93_spill] sm:$0xff] }
 0x4d3   : > { %v4602_v5 = vpack.c.bf16 %v3433_v3, %v3429_v29  ;;  %v3805_v16 = vcombine.low %v3796_v60, %v3804_v21  ;;  %v3806_v43 = vcombine.high %v3796_v60, %v3804_v21  ;;  %v3430_v40 = vmul.f32 %v8204_v26, %v3366_v28  ;;  %v8211_v3 = vld [vmem:[#allocation102_spill] sm:$0xff] }
 0x4d4   : > { %v5173_v0 = vpop.eup %5172  ;;  %v3119_v9 = vpop.xlane.xlu1 %3118  ;;  %v8212_v60 = vld [vmem:[#allocation106_spill] sm:$0xff]  ;;  %vm3180_vm8 = vcmp.gt.f32.partialorder %v8213_v48, -1e+29 }
 0x4d5   : > { %v3368_v23 = vsel %vm3176_vm2, %v5173_v0, 0.0  ;;  %5182 = vrcp.f32 %v3119_v9  ;;  %v3110_v34 = vpop.xlane.xlu0 %3109  ;;  %v7691_v45 = vrot.slane %v4602_v5, %v8144_v33  ;;  %v3944_v42 = vshrl.u32 %v3805_v16, 16  ;;  %v5175_v8 = vpop.eup %5174  ;;  %v8214_v0 = vld [vmem:[#allocation100_spill] sm:$0xff] }
 0x4d6   : > { %v3432_v17 = vmul.f32 %v8201_v6, %v3368_v23  ;;  %5184 = vrcp.f32 %v3104_v56  ;;  %v3952_v39 = vshrl.u32 %v3806_v43, 16  ;;  %v3941_v58 = vpack.i.b16 %v3805_v16, %v7664_v12  ;;  %v8215_v16 = vld [vmem:[#allocation97_spill] sm:$0xff]  ;;  %v8217_v23 = vld [vmem:[#allocation108_spill] sm:$0xff] }
 0x4d7   : > { %v3949_v10 = vpack.i.b16 %v3806_v43, %v7666_v11  ;;  %v3839_v22 = vcombine.low %v7688_v62, %v7691_v45  ;;  %v3945_v35 = vpack.i.b16 %v3944_v42, %v3943_v31  ;;  %5186 = vrcp.f32 %v3110_v34  ;;  %v8216_v43 = vld [vmem:[#allocation105_spill] sm:$0xff] }
 0x4d8   : > { %v5177_v38 = vpop.eup %5176  ;;  %v4605_v44 = vpack.c.bf16 %v3432_v17, %v3428_v20  ;;  %v3953_v24 = vpack.i.b16 %v3952_v39, %v3951_v15  ;;  %v3371_v12 = vsel %vm3179_vm4, %v5175_v8, 0.0  ;;  %vm3184_vm9 = vcmp.gt.f32.partialorder %v8214_v0, -1e+29  ;;  %v8218_v17 = vld [vmem:[#allocation103_spill] sm:$0xff] }
 0x4d9   : > { %v3370_v61 = vsel %vm3178_vm3, %v5177_v38, 0.0  ;;  %v3116_v57 = vpop.xlane.xlu0 %3115  ;;  %v5179_v47 = vpop.eup %5178  ;;  %4115 = vmatprep.mubr.bf16.mxu1 %v3945_v35  ;;  %v3435_v63 = vmul.f32 %v8208_v13, %v3371_v12  ;;  %vm3182_vm10 = vcmp.gt.f32.partialorder %v8215_v16, -1e+29  ;;  %vm3186_vm11 = vcmp.gt.f32.partialorder %v8218_v17, -1e+29  ;;  %v8220_v38 = vld [vmem:[#allocation109_spill] sm:$0xff] }
 0x4da   : > { %v3434_v11 = vmul.f32 %v8205_v25, %v3370_v61  ;;  %5188 = vrcp.f32 %v3116_v57  ;;  %4180 = vmatprep.mubr.bf16.mxu0 %v3953_v24  ;;  %4116 = vmatmul.mubr.bf16.gmra.mrb[28].mxu1 %v3941_v58  ;;  %v3373_v36 = vsel %vm3181_vm6, %v5179_v47, 0.0  ;;  %v3864_v46 = vrot.slane %v4605_v44, %v8144_v33  ;;  %v8219_v58 = vld [vmem:[#allocation107_spill] sm:$0xff]  ;;  %v8223_v13 = vld [vmem:[#allocation17_spill] sm:$0xff] }
 0x4db   : > { %v5181_v49 = vpop.eup %5180  ;;  %4181 = vmatmul.mubr.bf16.gmra.mrb[52].mxu0 %v3949_v10  ;;  %v3437_v56 = vmul.f32 %v8211_v3, %v3373_v36  ;;  %v3846_v8 = vrot.slane %v3839_v22, %v8148_v7 }
 0x4dc   : > { %v4606_v32 = vpack.c.bf16 %v3434_v11, %v3430_v40  ;;  %v3375_v54 = vsel %vm3183_vm5, %v5181_v49, 0.0 }
 0x4dd   : > { %v3439_v53 = vmul.f32 %v8209_v37, %v3375_v54  ;;  %v3122_v1 = vpop.xlane.xlu0 %3121  ;;  %v4934_v37 = vld [vmem:[%s5643_s17] sm:$0xff]  }
 0x4de   : > { %5190 = vrcp.f32 %v3122_v1  ;;  %v3872_v55 = vrot.slane %v4606_v32, %v8144_v33  ;;  %4823 = vmatprep.subr.bf16.mxu1 %v4934_v37 }
 0x4df   : > { %v5183_v18 = vpop.eup %5182  ;;  %v4603_v59 = vpack.c.bf16 %v3439_v53, %v3435_v63  ;;  %v8224_v63 = vld [vmem:[#allocation18_spill] sm:$0xff] }
 0x4e0   : > { %v5185_v29 = vpop.eup %5184  ;;  %v3377_v30 = vsel %vm3185_vm7, %v5183_v18, 0.0  ;;  %v3889_v50 = vcombine.low %v3864_v46, %v3872_v55  ;;  %v4935_v53 = vld [vmem:[%s5643_s17 + $0x8] sm:$0xff]  }
 0x4e1   : > { %v3441_v21 = vmul.f32 %v8212_v60, %v3377_v30  ;;  %v5187_v19 = vpop.eup %5186  ;;  %v3372_v51 = vsel %vm3180_vm8, %v5185_v29, 0.0  ;;  %v3830_v20 = vrot.slane %v4603_v59, %v8144_v33 }
 0x4e2   : > { %v3436_v15 = vmul.f32 %v8216_v43, %v3372_v51  ;;  %v3374_v62 = vsel %vm3182_vm10, %v5187_v19, 0.0  ;;  %v3896_v47 = vrot.slane %v3889_v50, %v8148_v7 }
 0x4e3   : > { %v4604_v5 = vpack.c.bf16 %v3441_v21, %v3437_v56  ;;  %v3438_v10 = vmul.f32 %v8219_v58, %v3374_v62 }
 0x4e4   : > { %v5189_v31 = vpop.eup %5188 }
 0x4e5   : > { %v3376_v4 = vsel %vm3184_vm9, %v5189_v31, 0.0  ;;  %v3838_v9 = vrot.slane %v4604_v5, %v8144_v33 }
 0x4e6   : > { %v3440_v34 = vmul.f32 %v8217_v23, %v3376_v4 }
 0x4e7   : > { %v3847_v45 = vcombine.low %v3830_v20, %v3838_v9 }
 0x4e8   : > { %v5191_v6 = vpop.eup %5190  ;;  %v4607_v42 = vpack.c.bf16 %v3440_v34, %v3436_v15 }
 0x4e9   : > { %v3378_v39 = vsel %vm3186_vm11, %v5191_v6, 0.0  ;;  %v3854_v28 = vrot.slane %v3847_v45, %v8148_v7 }
 0x4ea   : > { %v3442_v41 = vmul.f32 %v8220_v38, %v3378_v39  ;;  %v3880_v27 = vrot.slane %v4607_v42, %v8144_v33 }
 0x4eb   : > { %v3855_v44 = vcombine.low %v3846_v8, %v3854_v28  ;;  %v3856_v35 = vcombine.high %v3846_v8, %v3854_v28 }
 0x4ec   : > { %v4608_v24 = vpack.c.bf16 %v3442_v41, %v3438_v10 }
 0x4ed   : > { %v3959_v12 = vshrl.u32 %v3855_v44, 16  ;;  %v3967_v25 = vshrl.u32 %v3856_v35, 16 }
 0x4ee   : > { %v3888_v61 = vrot.slane %v4608_v24, %v8144_v33  ;;  %v8221_v33 = vld [vmem:[#allocation15_spill] sm:$0xff] }
 0x4f0   : > { %v3897_v57 = vcombine.low %v3880_v27, %v3888_v61 }
 0x4f2   : > { %v3904_v26 = vrot.slane %v3897_v57, %v8148_v7  ;;  %v8222_v7 = vld [vmem:[#allocation16_spill] sm:$0xff] }
 0x4f4   : > { %v3905_v40 = vcombine.low %v3896_v47, %v3904_v26  ;;  %v3906_v22 = vcombine.high %v3896_v47, %v3904_v26 }
 0x4f6   : > { %v3960_v11 = vshrl.u32 %v3905_v40, 16  ;;  %v3968_v49 = vshrl.u32 %v3906_v22, 16  ;;  %v3957_v52 = vpack.i.b16 %v3905_v40, %v3855_v44  ;;  %v3965_v32 = vpack.i.b16 %v3906_v22, %v3856_v35 }
 0x4f8   : > { %v3961_v54 = vpack.i.b16 %v3960_v11, %v3959_v12  ;;  %v3969_v2 = vpack.i.b16 %v3968_v49, %v3967_v25 }
 0x4fa   : > { %4123 = vmatprep.mubr.bf16.mxu1 %v3961_v54  ;;  %4188 = vmatprep.mubr.bf16.mxu0 %v3969_v2 }
 0x4fb   : > { %4124 = vmatmul.mubr.bf16.gmra.mrb[32].mxu1 %v3957_v52  ;;  %4189 = vmatmul.mubr.bf16.gmra.mrb[56].mxu0 %v3965_v32 }
 0x4fc   : > { %4815 = vmatprep.mubr.msk.bf16.mxu1 %vm551_vm1, %v8221_v33 }
 0x503   : > { %4816 = vmatmul.mubr.msk.bf16.vlgmr.msra.gmra.mrb[36].mxu1 %vm551_vm1, %v8222_v7 }
 0x504   : > { %4819 = vmatprep.mubr.msk.bf16.mxu1 %vm551_vm1, %v8223_v13  ;;  %4824 = vmatpush3.bf16.msra.mxu1 %v4934_v37 }
 0x505   : > { %4825 = vmatprep.subr.bf16.mxu1 %v4935_v53 }
 0x508   : > { %4826 = vmatpush3.bf16.msra.mxu1 %v4935_v53 }
 0x50b   : > { %4820 = vmatmul.mubr.msk.bf16.gmra.mrb[40].mxu1 %vm551_vm1, %v8224_v63 }
 0x56b   : > { %v4675_v1 = vpop.f32.mrb[20].mxu1  ;;  %v4715_v36 = vpop.f32.mrb[44].mxu0 }
 0x56c   : > { %v4676_v46 = vpop.f32.mrb[21].mxu1  ;;  %v4716_v18 = vpop.f32.mrb[45].mxu0 }
 0x56d   : > { %v4677_v55 = vadd.f32 %v4676_v46, %v4675_v1  ;;  %v4678_v14 = vpop.f32.mrb[22].mxu1  ;;  %v4717_v59 = vadd.f32 %v4716_v18, %v4715_v36  ;;  %v4718_v29 = vpop.f32.mrb[46].mxu0 }
 0x56e   : > { %v4679_v30 = vpop.f32.mrb[23].mxu1  ;;  %v4719_v3 = vpop.f32.mrb[47].mxu0 }
 0x56f   : > { %v4680_v50 = vadd.f32 %v4679_v30, %v4678_v14  ;;  %v4167_v56 = vadd.f32 %v4717_v59, %v4677_v55  ;;  %v4720_v60 = vadd.f32 %v4719_v3, %v4718_v29 }
 0x571   : > { %v4170_v21 = vadd.f32 %v4720_v60, %v4680_v50 }
 0x573   : > { %v4197_v48 = vpack.c.bf16 %v4170_v21, %v4167_v56 }
 0x575   : > { %4827 = vmatprep.mubr.msk.bf16.mxu1 %vm551_vm1, %v4197_v48 }
 0x58d   : > { %v4681_v19 = vpop.f32.mrb[24].mxu1  ;;  %v4721_v51 = vpop.f32.mrb[48].mxu0 }
 0x58e   : > { %v4682_v5 = vpop.f32.mrb[25].mxu1  ;;  %v4722_v31 = vpop.f32.mrb[49].mxu0 }
 0x58f   : > { %v4683_v0 = vadd.f32 %v4682_v5, %v4681_v19  ;;  %v4723_v4 = vadd.f32 %v4722_v31, %v4721_v51  ;;  %v4684_v20 = vpop.f32.mrb[26].mxu1  ;;  %v4724_v9 = vpop.f32.mrb[50].mxu0 }
 0x590   : > { %v4685_v16 = vpop.f32.mrb[27].mxu1  ;;  %v4725_v43 = vpop.f32.mrb[51].mxu0 }
 0x591   : > { %v4175_v15 = vadd.f32 %v4723_v4, %v4683_v0  ;;  %v4686_v23 = vadd.f32 %v4685_v16, %v4684_v20  ;;  %v4726_v34 = vadd.f32 %v4725_v43, %v4724_v9 }
 0x593   : > { %v4178_v62 = vadd.f32 %v4726_v34, %v4686_v23 }
 0x595   : > { %v4198_v45 = vpack.c.bf16 %v4178_v62, %v4175_v15 }
 0x597   : > { %4828 = vmatmul.mubr.msk.bf16.vlgmr.msra.gmra.mrb[36].mxu1 %vm551_vm1, %v4198_v45 }
 0x5ad   : > { %v4687_v6 = vpop.f32.mrb[28].mxu1 }
 0x5ae   : > { %v4727_v17 = vpop.f32.mrb[52].mxu0  ;;  %v4688_v42 = vpop.f32.mrb[29].mxu1 }
 0x5af   : > { %v4728_v39 = vpop.f32.mrb[53].mxu0  ;;  %v4689_v8 = vadd.f32 %v4688_v42, %v4687_v6  ;;  %v4690_v58 = vpop.f32.mrb[30].mxu1 }
 0x5b0   : > { %v4729_v28 = vadd.f32 %v4728_v39, %v4727_v17  ;;  %v4730_v10 = vpop.f32.mrb[54].mxu0  ;;  %v4691_v38 = vpop.f32.mrb[31].mxu1 }
 0x5b1   : > { %v4731_v41 = vpop.f32.mrb[55].mxu0  ;;  %v4692_v35 = vadd.f32 %v4691_v38, %v4690_v58 }
 0x5b2   : > { %v4183_v44 = vadd.f32 %v4729_v28, %v4689_v8  ;;  %v4732_v24 = vadd.f32 %v4731_v41, %v4730_v10 }
 0x5b4   : > { %v4186_v27 = vadd.f32 %v4732_v24, %v4692_v35 }
 0x5b6   : > { %v4199_v61 = vpack.c.bf16 %v4186_v27, %v4183_v44 }
 0x5b8   : > { %4831 = vmatprep.mubr.msk.bf16.mxu1 %vm551_vm1, %v4199_v61 }
 0x5ce   : > { %v4693_v57 = vpop.f32.mrb[32].mxu1  ;;  %v4733_v47 = vpop.f32.mrb[56].mxu0 }
 0x5cf   : > { %v4694_v26 = vpop.f32.mrb[33].mxu1  ;;  %v4734_v40 = vpop.f32.mrb[57].mxu0 }
 0x5d0   : > { %v4695_v22 = vadd.f32 %v4694_v26, %v4693_v57  ;;  %v4735_v12 = vadd.f32 %v4734_v40, %v4733_v47  ;;  %v4696_v25 = vpop.f32.mrb[34].mxu1  ;;  %v4736_v11 = vpop.f32.mrb[58].mxu0 }
 0x5d1   : > { %v4697_v49 = vpop.f32.mrb[35].mxu1  ;;  %v4737_v52 = vpop.f32.mrb[59].mxu0 }
 0x5d2   : > { %v4191_v32 = vadd.f32 %v4735_v12, %v4695_v22  ;;  %v4698_v54 = vadd.f32 %v4697_v49, %v4696_v25  ;;  %v4738_v2 = vadd.f32 %v4737_v52, %v4736_v11 }
 0x5d4   : > { %v4194_v33 = vadd.f32 %v4738_v2, %v4698_v54 }
 0x5d6   : > { %v4200_v7 = vpack.c.bf16 %v4194_v33, %v4191_v32 }
 0x5d8   : > { %4832 = vmatmul.mubr.msk.bf16.gmra.mrb[40].mxu1 %vm551_vm1, %v4200_v7 }
 0x66a   : > { %v4829_v13 = vpop.f32.mrb[36].mxu1 }
 0x66b   : > { %4377 = vst.msk [vmem:[#allocation2 + $0x10] sm:$0xff] %vm551_vm1, %v4829_v13  ;;  %v4344_v63 = vpop.f32.mrb[37].mxu1  ;;  %4389 = vst.msk [vmem:[%s7804_s7 + $0x10] sm:$0xff] (!%p4621_p5), %vm551_vm1, %v4829_v13 }
 0x66c   : > { %4375 = vst.msk [vmem:[#allocation2] sm:$0xff] %vm551_vm1, %v4344_v63  ;;  %v4830_v37 = vpop.f32.mrb[38].mxu1  ;;  %4387 = vst.msk [vmem:[%s7804_s7] sm:$0xff] (!%p4621_p5), %vm551_vm1, %v4344_v63 }
 0x66d   : > { %4378 = vst.msk [vmem:[#allocation2 + $0x18] sm:$0xff] %vm551_vm1, %v4830_v37  ;;  %v4347_v53 = vpop.f32.mrb[39].mxu1  ;;  %4390 = vst.msk [vmem:[%s7804_s7 + $0x18] sm:$0xff] (!%p4621_p5), %vm551_vm1, %v4830_v37 }
 0x66e   : > { %4376 = vst.msk [vmem:[#allocation2 + $0x8] sm:$0xff] %vm551_vm1, %v4347_v53  ;;  %4388 = vst.msk [vmem:[%s7804_s7 + $0x8] sm:$0xff] (!%p4621_p5), %vm551_vm1, %v4347_v53 }
 0x6a9   : > { %4386 = sbr.rel (%p4621_p5) target bundleno = 1712 (0x6b0), region = 72 }
 0x6ab   : > { %v4833_v1 = vpop.f32.mrb[40].mxu1 }
 0x6ac   : > { %4381 = vst.msk [vmem:[#allocation2 + $0x30] sm:$0xff] %vm551_vm1, %v4833_v1  ;;  %v4360_v36 = vpop.f32.mrb[41].mxu1  ;;  %4393 = vst.msk [vmem:[%s7804_s7 + $0x30] sm:$0xff] (!%p4621_p5), %vm551_vm1, %v4833_v1 }
 0x6ad   : > { %4379 = vst.msk [vmem:[#allocation2 + $0x20] sm:$0xff] %vm551_vm1, %v4360_v36  ;;  %v4834_v46 = vpop.f32.mrb[42].mxu1  ;;  %4391 = vst.msk [vmem:[%s7804_s7 + $0x20] sm:$0xff] (!%p4621_p5), %vm551_vm1, %v4360_v36 }
 0x6ae   : > { %4382 = vst.msk [vmem:[#allocation2 + $0x38] sm:$0xff] %vm551_vm1, %v4834_v46  ;;  %v4363_v55 = vpop.f32.mrb[43].mxu1  ;;  %4394 = vst.msk [vmem:[%s7804_s7 + $0x38] sm:$0xff] (!%p4621_p5), %vm551_vm1, %v4834_v46 }
 0x6af   : > { %4380 = vst.msk [vmem:[#allocation2 + $0x28] sm:$0xff] %vm551_vm1, %v4363_v55  ;;  %4392 = vst.msk [vmem:[%s7804_s7 + $0x28] sm:$0xff] (!%p4621_p5), %vm551_vm1, %v4363_v55 }
 0x6b0 PF: > { %p23_p6 = scmp.ge.s32.totalorder %s5431_s29, 4   ;;  %s8225_s24 = smov %s5346_s25 }
 0x6b1   : > { %s8226_s25 = smov %s5350_s26  ;;  %s8227_s26 = smov %s5441_s9 }
 0x6b2   : > { %s8228_s27 = smov %s5431_s29  ;;  %25 = sbr.rel (!%p23_p6) target bundleno = 10 (0xa), region = 134 }
 0x6b9   :  { %4406 = vsyncpa [#allocation6], 1 }
 0x6ba   :  { %4408 = vsyncpa [#allocation6 + $0x1], 1 }
 0x6bb   :  { %4409 = vsyncpa [#allocation8], 1 }
 0x6bc   :  { %4411 = vsyncpa [#allocation8 + $0x1], 1 }
 0x6bd   :  { %4412 = vsyncpa [#allocation11], 1 }
 0x6be   :  { %4414 = vsyncpa [#allocation11 + $0x1], 1 }

</bundles_post_ra>
